<compile_context>
chip_gen: v7x
topology: tpu7x:2x2x1
jax: 0.10.0
libtpu: 0.0.40
codegen_flags: <defaults>
</compile_context>

<pallas_src>
import functools

import jax
import jax.numpy as jnp
from jax.experimental import pallas as pl
from jax.experimental.pallas import tpu as pltpu


def _cross_attn_kernel(text_ref, vis_ref,
                       ln1_g_ref, ln1_b_ref, ln2_g_ref, ln2_b_ref,
                       wqkv1_ref, bqkv1_ref, wqkv2_ref, bqkv2_ref,
                       out1_ref, out2_ref, *, heads, dk):
    eps = 1e-5
    scale = float(dk) ** -0.5

    t = text_ref[0]                      # (Nt, D)
    v = vis_ref[0]                       # (Nv, D)
    D = t.shape[-1]
    mm_dtype = wqkv1_ref.dtype           # bf16 (set by wrapper): MXU operand dtype

    def layernorm(x, g_ref, b_ref):
        xf = x.astype(jnp.float32)                       # statistics in f32
        mu = jnp.mean(xf, axis=-1, keepdims=True)
        var = jnp.mean((xf - mu) ** 2, axis=-1, keepdims=True)
        xhat = (xf - mu) * jax.lax.rsqrt(var + eps)
        y = xhat * g_ref[...].astype(jnp.float32) + b_ref[...].astype(jnp.float32)
        return y.astype(mm_dtype)                        # matmuls run in bf16

    tn = layernorm(t, ln1_g_ref, ln1_b_ref)
    vn = layernorm(v, ln2_g_ref, ln2_b_ref)

    # Fused QKV projection: one (N, D) x (D, 3D) bf16 MXU pass per stream,
    # f32 accumulation, bias added in f32.
    t_qkv = jnp.dot(tn, wqkv1_ref[...], preferred_element_type=jnp.float32)
    t_qkv = t_qkv + bqkv1_ref[...].astype(jnp.float32)
    v_qkv = jnp.dot(vn, wqkv2_ref[...], preferred_element_type=jnp.float32)
    v_qkv = v_qkv + bqkv2_ref[...].astype(jnp.float32)

    def head_stack(x2d):
        # (N, D) -> (H, N, dk) head-major, via static lane slices + stack.
        # One-time O(N*D) layout shim per tile; all heavy math stays batched MXU.
        return jnp.stack([x2d[:, h * dk:(h + 1) * dk] for h in range(heads)],
                         axis=0)

    tq = head_stack((t_qkv[:, :D] * scale).astype(mm_dtype))   # fold 1/sqrt(dk) into Q
    tk = head_stack(t_qkv[:, D:2 * D].astype(mm_dtype))
    tv = head_stack(t_qkv[:, 2 * D:].astype(mm_dtype))
    vq = head_stack((v_qkv[:, :D] * scale).astype(mm_dtype))
    vk = head_stack(v_qkv[:, D:2 * D].astype(mm_dtype))
    vv = head_stack(v_qkv[:, 2 * D:].astype(mm_dtype))

    def attention(q3, k3, v3):
        # q3: (H, Nq, dk); k3/v3: (H, Nkv, dk).  Head-batched matmuls only —
        # each head contracts dk columns (no block-diag waste, no explicit K.T).
        s = jnp.einsum('hqd,hkd->hqk', q3, k3,
                       preferred_element_type=jnp.float32)       # (H, Nq, Nkv) f32
        m = jnp.max(s, axis=-1, keepdims=True)                   # per-head stabilizer
        p = jnp.exp(s - m)
        l = jnp.sum(p, axis=-1, keepdims=True)                   # (H, Nq, 1)
        inv = pl.reciprocal(l, approx=True)                      # EUP, per-(head,row)
        ctx = jnp.einsum('hqk,hkd->hqd', p.astype(mm_dtype), v3,
                         preferred_element_type=jnp.float32)     # (H, Nq, dk) f32
        ctx = ctx * inv
        # Merge heads back to the (Nq, H*dk) output layout (static lane concat).
        return jnp.concatenate([ctx[h] for h in range(heads)], axis=-1)

    out1_ref[0] = attention(tq, vk, vv).astype(out1_ref.dtype)   # text Q -> vision K/V
    out2_ref[0] = attention(vq, tk, tv).astype(out2_ref.dtype)   # vision Q -> text K/V


def cross_attention_pallas(text, vision, params, *, heads,
                           param_dtype=jnp.bfloat16):
    B, Nt, D = text.shape
    Bv, Nv, Dv = vision.shape
    assert B == Bv and D == Dv and D % heads == 0
    dk = D // heads

    # Pack Q/K/V weights & biases into one fused projection per stream; bf16
    # operands (f32 accumulation happens in-kernel via preferred_element_type).
    wqkv1 = jnp.concatenate([params["wq1"], params["wk1"], params["wv1"]],
                            axis=1).astype(param_dtype)
    bqkv1 = jnp.concatenate([params["bq1"], params["bk1"], params["bv1"]],
                            axis=1).astype(param_dtype)
    wqkv2 = jnp.concatenate([params["wq2"], params["wk2"], params["wv2"]],
                            axis=1).astype(param_dtype)
    bqkv2 = jnp.concatenate([params["bq2"], params["bk2"], params["bv2"]],
                            axis=1).astype(param_dtype)

    # Explicit scoped-VMEM budget: pipelined I/O blocks (double-buffered) +
    # single-buffered params + allowance for in-kernel f32 intermediates.
    fsz = jnp.dtype(jnp.float32).itemsize
    psz = jnp.dtype(param_dtype).itemsize
    xsz = jnp.dtype(text.dtype).itemsize
    io_bytes = 2 * 2 * (Nt + Nv) * D * xsz
    par_bytes = 4 * D * fsz + 2 * (3 * D * D + 3 * D) * psz
    tmp_bytes = (fsz * (2 * 3 * (Nt + Nv) * D + 2 * heads * Nt * Nv)
                 + psz * 2 * 3 * (Nt + Nv) * D)
    vmem_limit = int(max(32 << 20,
                         min(io_bytes + par_bytes + 2 * tmp_bytes + (4 << 20),
                             64 << 20)))  # stay under v7x's 64 MiB physical VMEM

    kernel = functools.partial(_cross_attn_kernel, heads=heads, dk=dk)
    out_shape = (jax.ShapeDtypeStruct((B, Nt, D), text.dtype),
                 jax.ShapeDtypeStruct((B, Nv, D), vision.dtype))

    def build(single_buffer_params):
        const2 = lambda b: (0, 0)
        pm = {}
        if single_buffer_params:
            # Constant index_map => no re-DMA between grid steps; single-buffer
            # so the (D, 3D) weights don't waste a second VMEM buffer.
            pm = dict(pipeline_mode=pl.Buffered(1))
        ln_spec = pl.BlockSpec((1, D), const2, **pm)
        w_spec = pl.BlockSpec((D, 3 * D), const2, **pm)
        b_spec = pl.BlockSpec((1, 3 * D), const2, **pm)
        return pl.pallas_call(
            kernel,
            out_shape=out_shape,
            grid_spec=pltpu.PrefetchScalarGridSpec(
                num_scalar_prefetch=0,
                grid=(B,),
                in_specs=[
                    pl.BlockSpec((1, Nt, D), lambda b: (b, 0, 0)),
                    pl.BlockSpec((1, Nv, D), lambda b: (b, 0, 0)),
                    ln_spec, ln_spec, ln_spec, ln_spec,      # LN params
                    w_spec, b_spec,                          # fused QKV (text)
                    w_spec, b_spec,                          # fused QKV (vision)
                ],
                out_specs=[
                    pl.BlockSpec((1, Nt, D), lambda b: (b, 0, 0)),
                    pl.BlockSpec((1, Nv, D), lambda b: (b, 0, 0)),
                ]),
            compiler_params=pltpu.CompilerParams(
                dimension_semantics=("parallel",),
                vmem_limit_bytes=vmem_limit),
        )

    args = (text, vision,
            params["ln1_g"], params["ln1_b"], params["ln2_g"], params["ln2_b"],
            wqkv1, bqkv1, wqkv2, bqkv2)
    try:
        attn1, attn2 = build(True)(*args)
    except Exception:
        # If this JAX build rejects single-buffered pipeline_mode on pallas_call
        # BlockSpecs, fall back to default double buffering (identical results).
        attn1, attn2 = build(False)(*args)

    # residual outputs are pure pass-through
    return attn1, attn2, text, vision


def _reference(text, vision, params, *, heads):
    """Pure-JAX f32 reference mirroring the PyTorch forward."""
    D = text.shape[-1]
    dk = D // heads
    eps = 1e-5

    def ln(x, g, b):
        mu = jnp.mean(x, axis=-1, keepdims=True)
        var = jnp.mean((x - mu) ** 2, axis=-1, keepdims=True)
        return (x - mu) / jnp.sqrt(var + eps) * g + b

    def lin(x, w, b):
        return x @ w + b

    def split_heads(x):  # (B, N, D) -> (B, H, N, dk)
        B, N, _ = x.shape
        return x.reshape(B, N, heads, dk).transpose(0, 2, 1, 3)

    tn = ln(text, params["ln1_g"], params["ln1_b"])
    vn = ln(vision, params["ln2_g"], params["ln2_b"])
    tq = split_heads(lin(tn, params["wq1"], params["bq1"]))
    tk = split_heads(lin(tn, params["wk1"], params["bk1"]))
    tv = split_heads(lin(tn, params["wv1"], params["bv1"]))
    vq = split_heads(lin(vn, params["wq2"], params["bq2"]))
    vk = split_heads(lin(vn, params["wk2"], params["bk2"]))
    vv = split_heads(lin(vn, params["wv2"], params["bv2"]))

    scale = dk ** (-0.5)
    a1 = jax.nn.softmax(jnp.einsum("bhnd,bhmd->bhnm", tq, vk) * scale, -1)
    a1 = jnp.einsum("bhnm,bhmd->bhnd", a1, vv)
    a2 = jax.nn.softmax(jnp.einsum("bhnd,bhmd->bhnm", vq, tk) * scale, -1)
    a2 = jnp.einsum("bhnm,bhmd->bhnd", a2, tv)

    def merge(x):
        B, H, N, d = x.shape
        return x.transpose(0, 2, 1, 3).reshape(B, N, H * d)

    return merge(a1), merge(a2), text, vision


def init_params(key, dim):
    ks = jax.random.split(key, 12)
    scale = 1.0 / jnp.sqrt(dim)

    def mat(k):
        return jax.random.normal(k, (dim, dim), jnp.float32) * scale

    def vec(k):
        return jax.random.normal(k, (1, dim), jnp.float32) * scale

    return {
        "ln1_g": jnp.ones((1, dim), jnp.float32),
        "ln1_b": jnp.zeros((1, dim), jnp.float32),
        "ln2_g": jnp.ones((1, dim), jnp.float32),
        "ln2_b": jnp.zeros((1, dim), jnp.float32),
        "wq1": mat(ks[0]), "bq1": vec(ks[1]),
        "wk1": mat(ks[2]), "bk1": vec(ks[3]),
        "wv1": mat(ks[4]), "bv1": vec(ks[5]),
        "wq2": mat(ks[6]), "bq2": vec(ks[7]),
        "wk2": mat(ks[8]), "bk2": vec(ks[9]),
        "wv2": mat(ks[10]), "bv2": vec(ks[11]),
    }


if __name__ == "__main__":
    B, dim, heads = 2, 32, 8
    Nt, Nv = 8, 16

    key = jax.random.PRNGKey(0)
    k_t, k_v, k_p = jax.random.split(key, 3)
    text = jax.random.normal(k_t, (B, Nt, dim), jnp.float32)
    vision = jax.random.normal(k_v, (B, Nv, dim), jnp.float32)
    params = init_params(k_p, dim)

    attn1, attn2, t_res, v_res = cross_attention_pallas(
        text, vision, params, heads=heads)
    jax.block_until_ready((attn1, attn2, t_res, v_res))

    r1, r2, rt, rv = _reference(text, vision, params, heads=heads)
    # Tolerance accommodates bf16 MXU operands (per perf review) and the EUP
    # approx-reciprocal softmax normalization; structural bugs would be O(1) off.
    assert jnp.allclose(attn1, r1, atol=5e-2, rtol=5e-2)
    assert jnp.allclose(attn2, r2, atol=5e-2, rtol=5e-2)
    assert jnp.array_equal(t_res, rt) and jnp.array_equal(v_res, rv)

    print("KERNEL_OK")
</pallas_src>

<mosaic_0001>
module attributes {stable_mosaic.version = 11 : i64} {
  func.func @_cross_attn_kernel(%arg0: i32, %arg1: memref<1x8x32xf32, #tpu.memory_space<vmem>>, %arg2: memref<1x16x32xf32, #tpu.memory_space<vmem>>, %arg3: memref<1x32xf32, #tpu.memory_space<vmem>>, %arg4: memref<1x32xf32, #tpu.memory_space<vmem>>, %arg5: memref<1x32xf32, #tpu.memory_space<vmem>>, %arg6: memref<1x32xf32, #tpu.memory_space<vmem>>, %arg7: memref<32x96xbf16, #tpu.memory_space<vmem>>, %arg8: memref<1x96xbf16, #tpu.memory_space<vmem>>, %arg9: memref<32x96xbf16, #tpu.memory_space<vmem>>, %arg10: memref<1x96xbf16, #tpu.memory_space<vmem>>, %arg11: memref<1x8x32xf32, #tpu.memory_space<vmem>>, %arg12: memref<1x16x32xf32, #tpu.memory_space<vmem>>) attributes {dimension_semantics = [#tpu.dimension_semantics<parallel>], iteration_bounds = array<i64: 2>, scalar_prefetch = 0 : i64, scratch_operands = 0 : i64, tpu.core_type = #tpu.core_type<tc>, window_params = [{transform_indices = @transform_0, window_bounds = array<i64: 1, 8, 32>}, {transform_indices = @transform_1, window_bounds = array<i64: 1, 16, 32>}, {pipeline_mode = #tpu.pipeline_mode<synchronous>, transform_indices = @transform_2, window_bounds = array<i64: 1, 32>}, {pipeline_mode = #tpu.pipeline_mode<synchronous>, transform_indices = @transform_3, window_bounds = array<i64: 1, 32>}, {pipeline_mode = #tpu.pipeline_mode<synchronous>, transform_indices = @transform_4, window_bounds = array<i64: 1, 32>}, {pipeline_mode = #tpu.pipeline_mode<synchronous>, transform_indices = @transform_5, window_bounds = array<i64: 1, 32>}, {pipeline_mode = #tpu.pipeline_mode<synchronous>, transform_indices = @transform_6, window_bounds = array<i64: 32, 96>}, {pipeline_mode = #tpu.pipeline_mode<synchronous>, transform_indices = @transform_7, window_bounds = array<i64: 1, 96>}, {pipeline_mode = #tpu.pipeline_mode<synchronous>, transform_indices = @transform_8, window_bounds = array<i64: 32, 96>}, {pipeline_mode = #tpu.pipeline_mode<synchronous>, transform_indices = @transform_9, window_bounds = array<i64: 1, 96>}, {transform_indices = @transform_10, window_bounds = array<i64: 1, 8, 32>}, {transform_indices = @transform_11, window_bounds = array<i64: 1, 16, 32>}]} {
    %c0 = arith.constant 0 : index
    %c0_0 = arith.constant 0 : index
    %c0_1 = arith.constant 0 : index
    %0 = vector.load %arg1[%c0, %c0_0, %c0_1] : memref<1x8x32xf32, #tpu.memory_space<vmem>>, vector<1x8x32xf32>
    %1 = vector.shape_cast %0 : vector<1x8x32xf32> to vector<8x32xf32>
    %c0_2 = arith.constant 0 : index
    %c0_3 = arith.constant 0 : index
    %c0_4 = arith.constant 0 : index
    %2 = vector.load %arg2[%c0_2, %c0_3, %c0_4] : memref<1x16x32xf32, #tpu.memory_space<vmem>>, vector<1x16x32xf32>
    %3 = vector.shape_cast %2 : vector<1x16x32xf32> to vector<16x32xf32>
    %cst = arith.constant dense<0.000000e+00> : vector<8xf32>
    %4 = vector.multi_reduction <add>, %1, %cst [1] : vector<8x32xf32> to vector<8xf32>
    %5 = vector.shape_cast %4 : vector<8xf32> to vector<8x1xf32>
    %cst_5 = arith.constant 3.200000e+01 : f32
    %6 = vector.broadcast %cst_5 : f32 to vector<8x1xf32>
    %7 = arith.divf %5, %6 : vector<8x1xf32>
    %8 = vector.broadcast %7 : vector<8x1xf32> to vector<8x32xf32>
    %9 = arith.subf %1, %8 : vector<8x32xf32>
    %10 = arith.mulf %9, %9 : vector<8x32xf32>
    %cst_6 = arith.constant dense<0.000000e+00> : vector<8xf32>
    %11 = vector.multi_reduction <add>, %10, %cst_6 [1] : vector<8x32xf32> to vector<8xf32>
    %12 = vector.shape_cast %11 : vector<8xf32> to vector<8x1xf32>
    %cst_7 = arith.constant 3.200000e+01 : f32
    %13 = vector.broadcast %cst_7 : f32 to vector<8x1xf32>
    %14 = arith.divf %12, %13 : vector<8x1xf32>
    %15 = vector.broadcast %7 : vector<8x1xf32> to vector<8x32xf32>
    %16 = arith.subf %1, %15 : vector<8x32xf32>
    %cst_8 = arith.constant 9.99999974E-6 : f32
    %17 = vector.broadcast %cst_8 : f32 to vector<8x1xf32>
    %18 = arith.addf %14, %17 : vector<8x1xf32>
    %19 = math.rsqrt %18 : vector<8x1xf32>
    %20 = vector.broadcast %19 : vector<8x1xf32> to vector<8x32xf32>
    %21 = arith.mulf %16, %20 : vector<8x32xf32>
    %c0_9 = arith.constant 0 : index
    %c0_10 = arith.constant 0 : index
    %22 = vector.load %arg3[%c0_9, %c0_10] : memref<1x32xf32, #tpu.memory_space<vmem>>, vector<1x32xf32>
    %23 = vector.broadcast %22 : vector<1x32xf32> to vector<8x32xf32>
    %24 = arith.mulf %21, %23 : vector<8x32xf32>
    %c0_11 = arith.constant 0 : index
    %c0_12 = arith.constant 0 : index
    %25 = vector.load %arg4[%c0_11, %c0_12] : memref<1x32xf32, #tpu.memory_space<vmem>>, vector<1x32xf32>
    %26 = vector.broadcast %25 : vector<1x32xf32> to vector<8x32xf32>
    %27 = arith.addf %24, %26 : vector<8x32xf32>
    %28 = arith.truncf %27 : vector<8x32xf32> to vector<8x32xbf16>
    %cst_13 = arith.constant dense<0.000000e+00> : vector<16xf32>
    %29 = vector.multi_reduction <add>, %3, %cst_13 [1] : vector<16x32xf32> to vector<16xf32>
    %30 = vector.shape_cast %29 : vector<16xf32> to vector<16x1xf32>
    %cst_14 = arith.constant 3.200000e+01 : f32
    %31 = vector.broadcast %cst_14 : f32 to vector<16x1xf32>
    %32 = arith.divf %30, %31 : vector<16x1xf32>
    %33 = vector.broadcast %32 : vector<16x1xf32> to vector<16x32xf32>
    %34 = arith.subf %3, %33 : vector<16x32xf32>
    %35 = arith.mulf %34, %34 : vector<16x32xf32>
    %cst_15 = arith.constant dense<0.000000e+00> : vector<16xf32>
    %36 = vector.multi_reduction <add>, %35, %cst_15 [1] : vector<16x32xf32> to vector<16xf32>
    %37 = vector.shape_cast %36 : vector<16xf32> to vector<16x1xf32>
    %cst_16 = arith.constant 3.200000e+01 : f32
    %38 = vector.broadcast %cst_16 : f32 to vector<16x1xf32>
    %39 = arith.divf %37, %38 : vector<16x1xf32>
    %40 = vector.broadcast %32 : vector<16x1xf32> to vector<16x32xf32>
    %41 = arith.subf %3, %40 : vector<16x32xf32>
    %cst_17 = arith.constant 9.99999974E-6 : f32
    %42 = vector.broadcast %cst_17 : f32 to vector<16x1xf32>
    %43 = arith.addf %39, %42 : vector<16x1xf32>
    %44 = math.rsqrt %43 : vector<16x1xf32>
    %45 = vector.broadcast %44 : vector<16x1xf32> to vector<16x32xf32>
    %46 = arith.mulf %41, %45 : vector<16x32xf32>
    %c0_18 = arith.constant 0 : index
    %c0_19 = arith.constant 0 : index
    %47 = vector.load %arg5[%c0_18, %c0_19] : memref<1x32xf32, #tpu.memory_space<vmem>>, vector<1x32xf32>
    %48 = vector.broadcast %47 : vector<1x32xf32> to vector<16x32xf32>
    %49 = arith.mulf %46, %48 : vector<16x32xf32>
    %c0_20 = arith.constant 0 : index
    %c0_21 = arith.constant 0 : index
    %50 = vector.load %arg6[%c0_20, %c0_21] : memref<1x32xf32, #tpu.memory_space<vmem>>, vector<1x32xf32>
    %51 = vector.broadcast %50 : vector<1x32xf32> to vector<16x32xf32>
    %52 = arith.addf %49, %51 : vector<16x32xf32>
    %53 = arith.truncf %52 : vector<16x32xf32> to vector<16x32xbf16>
    %c0_22 = arith.constant 0 : index
    %c0_23 = arith.constant 0 : index
    %54 = vector.load %arg7[%c0_22, %c0_23] : memref<32x96xbf16, #tpu.memory_space<vmem>>, vector<32x96xbf16>
    %cst_24 = arith.constant dense<0.000000e+00> : vector<8x96xf32>
    %55 = tpu.matmul %28, %54, %cst_24 {dimension_numbers = #tpu.dot_dimension_numbers<[1], [0], [0], [1], [0, 0, 1, 1], [], []>} : vector<8x32xbf16>, vector<32x96xbf16>, vector<8x96xf32> -> vector<8x96xf32>
    %c0_25 = arith.constant 0 : index
    %c0_26 = arith.constant 0 : index
    %56 = vector.load %arg8[%c0_25, %c0_26] : memref<1x96xbf16, #tpu.memory_space<vmem>>, vector<1x96xbf16>
    %57 = arith.extf %56 : vector<1x96xbf16> to vector<1x96xf32>
    %58 = vector.broadcast %57 : vector<1x96xf32> to vector<8x96xf32>
    %59 = arith.addf %55, %58 : vector<8x96xf32>
    %c0_27 = arith.constant 0 : index
    %c0_28 = arith.constant 0 : index
    %60 = vector.load %arg9[%c0_27, %c0_28] : memref<32x96xbf16, #tpu.memory_space<vmem>>, vector<32x96xbf16>
    %cst_29 = arith.constant dense<0.000000e+00> : vector<16x96xf32>
    %61 = tpu.matmul %53, %60, %cst_29 {dimension_numbers = #tpu.dot_dimension_numbers<[1], [0], [0], [1], [0, 0, 1, 1], [], []>} : vector<16x32xbf16>, vector<32x96xbf16>, vector<16x96xf32> -> vector<16x96xf32>
    %c0_30 = arith.constant 0 : index
    %c0_31 = arith.constant 0 : index
    %62 = vector.load %arg10[%c0_30, %c0_31] : memref<1x96xbf16, #tpu.memory_space<vmem>>, vector<1x96xbf16>
    %63 = arith.extf %62 : vector<1x96xbf16> to vector<1x96xf32>
    %64 = vector.broadcast %63 : vector<1x96xf32> to vector<16x96xf32>
    %65 = arith.addf %61, %64 : vector<16x96xf32>
    %66 = vector.extract_strided_slice %59 {offsets = [0, 0], sizes = [8, 32], strides = [1, 1]} : vector<8x96xf32> to vector<8x32xf32>
    %cst_32 = arith.constant 5.000000e-01 : f32
    %67 = vector.broadcast %cst_32 : f32 to vector<8x32xf32>
    %68 = arith.mulf %66, %67 : vector<8x32xf32>
    %69 = arith.truncf %68 : vector<8x32xf32> to vector<8x32xbf16>
    %70 = vector.extract_strided_slice %69 {offsets = [0, 0], sizes = [8, 4], strides = [1, 1]} : vector<8x32xbf16> to vector<8x4xbf16>
    %71 = vector.extract_strided_slice %69 {offsets = [0, 4], sizes = [8, 4], strides = [1, 1]} : vector<8x32xbf16> to vector<8x4xbf16>
    %72 = vector.extract_strided_slice %69 {offsets = [0, 8], sizes = [8, 4], strides = [1, 1]} : vector<8x32xbf16> to vector<8x4xbf16>
    %73 = vector.extract_strided_slice %69 {offsets = [0, 12], sizes = [8, 4], strides = [1, 1]} : vector<8x32xbf16> to vector<8x4xbf16>
    %74 = vector.extract_strided_slice %69 {offsets = [0, 16], sizes = [8, 4], strides = [1, 1]} : vector<8x32xbf16> to vector<8x4xbf16>
    %75 = vector.extract_strided_slice %69 {offsets = [0, 20], sizes = [8, 4], strides = [1, 1]} : vector<8x32xbf16> to vector<8x4xbf16>
    %76 = vector.extract_strided_slice %69 {offsets = [0, 24], sizes = [8, 4], strides = [1, 1]} : vector<8x32xbf16> to vector<8x4xbf16>
    %77 = vector.extract_strided_slice %69 {offsets = [0, 28], sizes = [8, 4], strides = [1, 1]} : vector<8x32xbf16> to vector<8x4xbf16>
    %78 = vector.shape_cast %70 : vector<8x4xbf16> to vector<1x8x4xbf16>
    %79 = vector.shape_cast %71 : vector<8x4xbf16> to vector<1x8x4xbf16>
    %80 = vector.shape_cast %72 : vector<8x4xbf16> to vector<1x8x4xbf16>
    %81 = vector.shape_cast %73 : vector<8x4xbf16> to vector<1x8x4xbf16>
    %82 = vector.shape_cast %74 : vector<8x4xbf16> to vector<1x8x4xbf16>
    %83 = vector.shape_cast %75 : vector<8x4xbf16> to vector<1x8x4xbf16>
    %84 = vector.shape_cast %76 : vector<8x4xbf16> to vector<1x8x4xbf16>
    %85 = vector.shape_cast %77 : vector<8x4xbf16> to vector<1x8x4xbf16>
    %86 = tpu.concatenate %78, %79, %80, %81, %82, %83, %84, %85 in 0 : vector<1x8x4xbf16>, vector<1x8x4xbf16>, vector<1x8x4xbf16>, vector<1x8x4xbf16>, vector<1x8x4xbf16>, vector<1x8x4xbf16>, vector<1x8x4xbf16>, vector<1x8x4xbf16> -> vector<8x8x4xbf16>
    %87 = vector.extract_strided_slice %59 {offsets = [0, 32], sizes = [8, 32], strides = [1, 1]} : vector<8x96xf32> to vector<8x32xf32>
    %88 = arith.truncf %87 : vector<8x32xf32> to vector<8x32xbf16>
    %89 = vector.extract_strided_slice %88 {offsets = [0, 0], sizes = [8, 4], strides = [1, 1]} : vector<8x32xbf16> to vector<8x4xbf16>
    %90 = vector.extract_strided_slice %88 {offsets = [0, 4], sizes = [8, 4], strides = [1, 1]} : vector<8x32xbf16> to vector<8x4xbf16>
    %91 = vector.extract_strided_slice %88 {offsets = [0, 8], sizes = [8, 4], strides = [1, 1]} : vector<8x32xbf16> to vector<8x4xbf16>
    %92 = vector.extract_strided_slice %88 {offsets = [0, 12], sizes = [8, 4], strides = [1, 1]} : vector<8x32xbf16> to vector<8x4xbf16>
    %93 = vector.extract_strided_slice %88 {offsets = [0, 16], sizes = [8, 4], strides = [1, 1]} : vector<8x32xbf16> to vector<8x4xbf16>
    %94 = vector.extract_strided_slice %88 {offsets = [0, 20], sizes = [8, 4], strides = [1, 1]} : vector<8x32xbf16> to vector<8x4xbf16>
    %95 = vector.extract_strided_slice %88 {offsets = [0, 24], sizes = [8, 4], strides = [1, 1]} : vector<8x32xbf16> to vector<8x4xbf16>
    %96 = vector.extract_strided_slice %88 {offsets = [0, 28], sizes = [8, 4], strides = [1, 1]} : vector<8x32xbf16> to vector<8x4xbf16>
    %97 = vector.shape_cast %89 : vector<8x4xbf16> to vector<1x8x4xbf16>
    %98 = vector.shape_cast %90 : vector<8x4xbf16> to vector<1x8x4xbf16>
    %99 = vector.shape_cast %91 : vector<8x4xbf16> to vector<1x8x4xbf16>
    %100 = vector.shape_cast %92 : vector<8x4xbf16> to vector<1x8x4xbf16>
    %101 = vector.shape_cast %93 : vector<8x4xbf16> to vector<1x8x4xbf16>
    %102 = vector.shape_cast %94 : vector<8x4xbf16> to vector<1x8x4xbf16>
    %103 = vector.shape_cast %95 : vector<8x4xbf16> to vector<1x8x4xbf16>
    %104 = vector.shape_cast %96 : vector<8x4xbf16> to vector<1x8x4xbf16>
    %105 = tpu.concatenate %97, %98, %99, %100, %101, %102, %103, %104 in 0 : vector<1x8x4xbf16>, vector<1x8x4xbf16>, vector<1x8x4xbf16>, vector<1x8x4xbf16>, vector<1x8x4xbf16>, vector<1x8x4xbf16>, vector<1x8x4xbf16>, vector<1x8x4xbf16> -> vector<8x8x4xbf16>
    %106 = vector.extract_strided_slice %59 {offsets = [0, 64], sizes = [8, 32], strides = [1, 1]} : vector<8x96xf32> to vector<8x32xf32>
    %107 = arith.truncf %106 : vector<8x32xf32> to vector<8x32xbf16>
    %108 = vector.extract_strided_slice %107 {offsets = [0, 0], sizes = [8, 4], strides = [1, 1]} : vector<8x32xbf16> to vector<8x4xbf16>
    %109 = vector.extract_strided_slice %107 {offsets = [0, 4], sizes = [8, 4], strides = [1, 1]} : vector<8x32xbf16> to vector<8x4xbf16>
    %110 = vector.extract_strided_slice %107 {offsets = [0, 8], sizes = [8, 4], strides = [1, 1]} : vector<8x32xbf16> to vector<8x4xbf16>
    %111 = vector.extract_strided_slice %107 {offsets = [0, 12], sizes = [8, 4], strides = [1, 1]} : vector<8x32xbf16> to vector<8x4xbf16>
    %112 = vector.extract_strided_slice %107 {offsets = [0, 16], sizes = [8, 4], strides = [1, 1]} : vector<8x32xbf16> to vector<8x4xbf16>
    %113 = vector.extract_strided_slice %107 {offsets = [0, 20], sizes = [8, 4], strides = [1, 1]} : vector<8x32xbf16> to vector<8x4xbf16>
    %114 = vector.extract_strided_slice %107 {offsets = [0, 24], sizes = [8, 4], strides = [1, 1]} : vector<8x32xbf16> to vector<8x4xbf16>
    %115 = vector.extract_strided_slice %107 {offsets = [0, 28], sizes = [8, 4], strides = [1, 1]} : vector<8x32xbf16> to vector<8x4xbf16>
    %116 = vector.shape_cast %108 : vector<8x4xbf16> to vector<1x8x4xbf16>
    %117 = vector.shape_cast %109 : vector<8x4xbf16> to vector<1x8x4xbf16>
    %118 = vector.shape_cast %110 : vector<8x4xbf16> to vector<1x8x4xbf16>
    %119 = vector.shape_cast %111 : vector<8x4xbf16> to vector<1x8x4xbf16>
    %120 = vector.shape_cast %112 : vector<8x4xbf16> to vector<1x8x4xbf16>
    %121 = vector.shape_cast %113 : vector<8x4xbf16> to vector<1x8x4xbf16>
    %122 = vector.shape_cast %114 : vector<8x4xbf16> to vector<1x8x4xbf16>
    %123 = vector.shape_cast %115 : vector<8x4xbf16> to vector<1x8x4xbf16>
    %124 = tpu.concatenate %116, %117, %118, %119, %120, %121, %122, %123 in 0 : vector<1x8x4xbf16>, vector<1x8x4xbf16>, vector<1x8x4xbf16>, vector<1x8x4xbf16>, vector<1x8x4xbf16>, vector<1x8x4xbf16>, vector<1x8x4xbf16>, vector<1x8x4xbf16> -> vector<8x8x4xbf16>
    %125 = vector.extract_strided_slice %65 {offsets = [0, 0], sizes = [16, 32], strides = [1, 1]} : vector<16x96xf32> to vector<16x32xf32>
    %cst_33 = arith.constant 5.000000e-01 : f32
    %126 = vector.broadcast %cst_33 : f32 to vector<16x32xf32>
    %127 = arith.mulf %125, %126 : vector<16x32xf32>
    %128 = arith.truncf %127 : vector<16x32xf32> to vector<16x32xbf16>
    %129 = vector.extract_strided_slice %128 {offsets = [0, 0], sizes = [16, 4], strides = [1, 1]} : vector<16x32xbf16> to vector<16x4xbf16>
    %130 = vector.extract_strided_slice %128 {offsets = [0, 4], sizes = [16, 4], strides = [1, 1]} : vector<16x32xbf16> to vector<16x4xbf16>
    %131 = vector.extract_strided_slice %128 {offsets = [0, 8], sizes = [16, 4], strides = [1, 1]} : vector<16x32xbf16> to vector<16x4xbf16>
    %132 = vector.extract_strided_slice %128 {offsets = [0, 12], sizes = [16, 4], strides = [1, 1]} : vector<16x32xbf16> to vector<16x4xbf16>
    %133 = vector.extract_strided_slice %128 {offsets = [0, 16], sizes = [16, 4], strides = [1, 1]} : vector<16x32xbf16> to vector<16x4xbf16>
    %134 = vector.extract_strided_slice %128 {offsets = [0, 20], sizes = [16, 4], strides = [1, 1]} : vector<16x32xbf16> to vector<16x4xbf16>
    %135 = vector.extract_strided_slice %128 {offsets = [0, 24], sizes = [16, 4], strides = [1, 1]} : vector<16x32xbf16> to vector<16x4xbf16>
    %136 = vector.extract_strided_slice %128 {offsets = [0, 28], sizes = [16, 4], strides = [1, 1]} : vector<16x32xbf16> to vector<16x4xbf16>
    %137 = vector.shape_cast %129 : vector<16x4xbf16> to vector<1x16x4xbf16>
    %138 = vector.shape_cast %130 : vector<16x4xbf16> to vector<1x16x4xbf16>
    %139 = vector.shape_cast %131 : vector<16x4xbf16> to vector<1x16x4xbf16>
    %140 = vector.shape_cast %132 : vector<16x4xbf16> to vector<1x16x4xbf16>
    %141 = vector.shape_cast %133 : vector<16x4xbf16> to vector<1x16x4xbf16>
    %142 = vector.shape_cast %134 : vector<16x4xbf16> to vector<1x16x4xbf16>
    %143 = vector.shape_cast %135 : vector<16x4xbf16> to vector<1x16x4xbf16>
    %144 = vector.shape_cast %136 : vector<16x4xbf16> to vector<1x16x4xbf16>
    %145 = tpu.concatenate %137, %138, %139, %140, %141, %142, %143, %144 in 0 : vector<1x16x4xbf16>, vector<1x16x4xbf16>, vector<1x16x4xbf16>, vector<1x16x4xbf16>, vector<1x16x4xbf16>, vector<1x16x4xbf16>, vector<1x16x4xbf16>, vector<1x16x4xbf16> -> vector<8x16x4xbf16>
    %146 = vector.extract_strided_slice %65 {offsets = [0, 32], sizes = [16, 32], strides = [1, 1]} : vector<16x96xf32> to vector<16x32xf32>
    %147 = arith.truncf %146 : vector<16x32xf32> to vector<16x32xbf16>
    %148 = vector.extract_strided_slice %147 {offsets = [0, 0], sizes = [16, 4], strides = [1, 1]} : vector<16x32xbf16> to vector<16x4xbf16>
    %149 = vector.extract_strided_slice %147 {offsets = [0, 4], sizes = [16, 4], strides = [1, 1]} : vector<16x32xbf16> to vector<16x4xbf16>
    %150 = vector.extract_strided_slice %147 {offsets = [0, 8], sizes = [16, 4], strides = [1, 1]} : vector<16x32xbf16> to vector<16x4xbf16>
    %151 = vector.extract_strided_slice %147 {offsets = [0, 12], sizes = [16, 4], strides = [1, 1]} : vector<16x32xbf16> to vector<16x4xbf16>
    %152 = vector.extract_strided_slice %147 {offsets = [0, 16], sizes = [16, 4], strides = [1, 1]} : vector<16x32xbf16> to vector<16x4xbf16>
    %153 = vector.extract_strided_slice %147 {offsets = [0, 20], sizes = [16, 4], strides = [1, 1]} : vector<16x32xbf16> to vector<16x4xbf16>
    %154 = vector.extract_strided_slice %147 {offsets = [0, 24], sizes = [16, 4], strides = [1, 1]} : vector<16x32xbf16> to vector<16x4xbf16>
    %155 = vector.extract_strided_slice %147 {offsets = [0, 28], sizes = [16, 4], strides = [1, 1]} : vector<16x32xbf16> to vector<16x4xbf16>
    %156 = vector.shape_cast %148 : vector<16x4xbf16> to vector<1x16x4xbf16>
    %157 = vector.shape_cast %149 : vector<16x4xbf16> to vector<1x16x4xbf16>
    %158 = vector.shape_cast %150 : vector<16x4xbf16> to vector<1x16x4xbf16>
    %159 = vector.shape_cast %151 : vector<16x4xbf16> to vector<1x16x4xbf16>
    %160 = vector.shape_cast %152 : vector<16x4xbf16> to vector<1x16x4xbf16>
    %161 = vector.shape_cast %153 : vector<16x4xbf16> to vector<1x16x4xbf16>
    %162 = vector.shape_cast %154 : vector<16x4xbf16> to vector<1x16x4xbf16>
    %163 = vector.shape_cast %155 : vector<16x4xbf16> to vector<1x16x4xbf16>
    %164 = tpu.concatenate %156, %157, %158, %159, %160, %161, %162, %163 in 0 : vector<1x16x4xbf16>, vector<1x16x4xbf16>, vector<1x16x4xbf16>, vector<1x16x4xbf16>, vector<1x16x4xbf16>, vector<1x16x4xbf16>, vector<1x16x4xbf16>, vector<1x16x4xbf16> -> vector<8x16x4xbf16>
    %165 = vector.extract_strided_slice %65 {offsets = [0, 64], sizes = [16, 32], strides = [1, 1]} : vector<16x96xf32> to vector<16x32xf32>
    %166 = arith.truncf %165 : vector<16x32xf32> to vector<16x32xbf16>
    %167 = vector.extract_strided_slice %166 {offsets = [0, 0], sizes = [16, 4], strides = [1, 1]} : vector<16x32xbf16> to vector<16x4xbf16>
    %168 = vector.extract_strided_slice %166 {offsets = [0, 4], sizes = [16, 4], strides = [1, 1]} : vector<16x32xbf16> to vector<16x4xbf16>
    %169 = vector.extract_strided_slice %166 {offsets = [0, 8], sizes = [16, 4], strides = [1, 1]} : vector<16x32xbf16> to vector<16x4xbf16>
    %170 = vector.extract_strided_slice %166 {offsets = [0, 12], sizes = [16, 4], strides = [1, 1]} : vector<16x32xbf16> to vector<16x4xbf16>
    %171 = vector.extract_strided_slice %166 {offsets = [0, 16], sizes = [16, 4], strides = [1, 1]} : vector<16x32xbf16> to vector<16x4xbf16>
    %172 = vector.extract_strided_slice %166 {offsets = [0, 20], sizes = [16, 4], strides = [1, 1]} : vector<16x32xbf16> to vector<16x4xbf16>
    %173 = vector.extract_strided_slice %166 {offsets = [0, 24], sizes = [16, 4], strides = [1, 1]} : vector<16x32xbf16> to vector<16x4xbf16>
    %174 = vector.extract_strided_slice %166 {offsets = [0, 28], sizes = [16, 4], strides = [1, 1]} : vector<16x32xbf16> to vector<16x4xbf16>
    %175 = vector.shape_cast %167 : vector<16x4xbf16> to vector<1x16x4xbf16>
    %176 = vector.shape_cast %168 : vector<16x4xbf16> to vector<1x16x4xbf16>
    %177 = vector.shape_cast %169 : vector<16x4xbf16> to vector<1x16x4xbf16>
    %178 = vector.shape_cast %170 : vector<16x4xbf16> to vector<1x16x4xbf16>
    %179 = vector.shape_cast %171 : vector<16x4xbf16> to vector<1x16x4xbf16>
    %180 = vector.shape_cast %172 : vector<16x4xbf16> to vector<1x16x4xbf16>
    %181 = vector.shape_cast %173 : vector<16x4xbf16> to vector<1x16x4xbf16>
    %182 = vector.shape_cast %174 : vector<16x4xbf16> to vector<1x16x4xbf16>
    %183 = tpu.concatenate %175, %176, %177, %178, %179, %180, %181, %182 in 0 : vector<1x16x4xbf16>, vector<1x16x4xbf16>, vector<1x16x4xbf16>, vector<1x16x4xbf16>, vector<1x16x4xbf16>, vector<1x16x4xbf16>, vector<1x16x4xbf16>, vector<1x16x4xbf16> -> vector<8x16x4xbf16>
    "tpu.trace_start"() <{level = 10 : i32, message = "hqd,hkd->hqk"}> : () -> ()
    %cst_34 = arith.constant dense<0.000000e+00> : vector<8x8x16xf32>
    %184 = tpu.matmul %86, %164, %cst_34 {dimension_numbers = #tpu.dot_dimension_numbers<[2], [2], [1], [1], [0, 0, 0, 1, 1, 1], [0], [0]>} : vector<8x8x4xbf16>, vector<8x16x4xbf16>, vector<8x8x16xf32> -> vector<8x8x16xf32>
    "tpu.trace_stop"() : () -> ()
    %cst_35 = arith.constant dense<0xFF800000> : vector<8x8xf32>
    %185 = vector.multi_reduction <maximumf>, %184, %cst_35 [2] : vector<8x8x16xf32> to vector<8x8xf32>
    %186 = vector.shape_cast %185 : vector<8x8xf32> to vector<8x8x1xf32>
    %187 = vector.broadcast %186 : vector<8x8x1xf32> to vector<8x8x16xf32>
    %188 = arith.subf %184, %187 : vector<8x8x16xf32>
    %189 = math.exp %188 : vector<8x8x16xf32>
    %cst_36 = arith.constant dense<0.000000e+00> : vector<8x8xf32>
    %190 = vector.multi_reduction <add>, %189, %cst_36 [2] : vector<8x8x16xf32> to vector<8x8xf32>
    %191 = vector.shape_cast %190 : vector<8x8xf32> to vector<8x8x1xf32>
    %192 = tpu.reciprocal %191 {approx = true} : vector<8x8x1xf32> -> vector<8x8x1xf32>
    %193 = arith.truncf %189 : vector<8x8x16xf32> to vector<8x8x16xbf16>
    "tpu.trace_start"() <{level = 10 : i32, message = "hqk,hkd->hqd"}> : () -> ()
    %cst_37 = arith.constant dense<0.000000e+00> : vector<8x8x4xf32>
    %194 = tpu.matmul %193, %183, %cst_37 {dimension_numbers = #tpu.dot_dimension_numbers<[2], [1], [1], [2], [0, 0, 0, 1, 1, 2], [0], [0]>} : vector<8x8x16xbf16>, vector<8x16x4xbf16>, vector<8x8x4xf32> -> vector<8x8x4xf32>
    "tpu.trace_stop"() : () -> ()
    %195 = vector.broadcast %192 : vector<8x8x1xf32> to vector<8x8x4xf32>
    %196 = arith.mulf %194, %195 : vector<8x8x4xf32>
    %197 = vector.extract_strided_slice %196 {offsets = [0, 0, 0], sizes = [1, 8, 4], strides = [1, 1, 1]} : vector<8x8x4xf32> to vector<1x8x4xf32>
    %198 = vector.shape_cast %197 : vector<1x8x4xf32> to vector<8x4xf32>
    %199 = vector.extract_strided_slice %196 {offsets = [1, 0, 0], sizes = [1, 8, 4], strides = [1, 1, 1]} : vector<8x8x4xf32> to vector<1x8x4xf32>
    %200 = vector.shape_cast %199 : vector<1x8x4xf32> to vector<8x4xf32>
    %201 = vector.extract_strided_slice %196 {offsets = [2, 0, 0], sizes = [1, 8, 4], strides = [1, 1, 1]} : vector<8x8x4xf32> to vector<1x8x4xf32>
    %202 = vector.shape_cast %201 : vector<1x8x4xf32> to vector<8x4xf32>
    %203 = vector.extract_strided_slice %196 {offsets = [3, 0, 0], sizes = [1, 8, 4], strides = [1, 1, 1]} : vector<8x8x4xf32> to vector<1x8x4xf32>
    %204 = vector.shape_cast %203 : vector<1x8x4xf32> to vector<8x4xf32>
    %205 = vector.extract_strided_slice %196 {offsets = [4, 0, 0], sizes = [1, 8, 4], strides = [1, 1, 1]} : vector<8x8x4xf32> to vector<1x8x4xf32>
    %206 = vector.shape_cast %205 : vector<1x8x4xf32> to vector<8x4xf32>
    %207 = vector.extract_strided_slice %196 {offsets = [5, 0, 0], sizes = [1, 8, 4], strides = [1, 1, 1]} : vector<8x8x4xf32> to vector<1x8x4xf32>
    %208 = vector.shape_cast %207 : vector<1x8x4xf32> to vector<8x4xf32>
    %209 = vector.extract_strided_slice %196 {offsets = [6, 0, 0], sizes = [1, 8, 4], strides = [1, 1, 1]} : vector<8x8x4xf32> to vector<1x8x4xf32>
    %210 = vector.shape_cast %209 : vector<1x8x4xf32> to vector<8x4xf32>
    %211 = vector.extract_strided_slice %196 {offsets = [7, 0, 0], sizes = [1, 8, 4], strides = [1, 1, 1]} : vector<8x8x4xf32> to vector<1x8x4xf32>
    %212 = vector.shape_cast %211 : vector<1x8x4xf32> to vector<8x4xf32>
    %213 = tpu.concatenate %198, %200, %202, %204, %206, %208, %210, %212 in 1 : vector<8x4xf32>, vector<8x4xf32>, vector<8x4xf32>, vector<8x4xf32>, vector<8x4xf32>, vector<8x4xf32>, vector<8x4xf32>, vector<8x4xf32> -> vector<8x32xf32>
    %c0_38 = arith.constant 0 : index
    %c0_39 = arith.constant 0 : index
    %c0_40 = arith.constant 0 : index
    %214 = vector.load %arg11[%c0_38, %c0_39, %c0_40] : memref<1x8x32xf32, #tpu.memory_space<vmem>>, vector<1x8x32xf32>
    %215 = vector.shape_cast %214 : vector<1x8x32xf32> to vector<8x32xf32>
    %216 = vector.shape_cast %213 : vector<8x32xf32> to vector<1x8x32xf32>
    tpu.vector_store %arg11[%c0_38, %c0_39, %c0_40], %216 {strides = array<i32>} : memref<1x8x32xf32, #tpu.memory_space<vmem>>, vector<1x8x32xf32>,
    "tpu.trace_start"() <{level = 10 : i32, message = "hqd,hkd->hqk"}> : () -> ()
    %cst_41 = arith.constant dense<0.000000e+00> : vector<8x16x8xf32>
    %217 = tpu.matmul %145, %105, %cst_41 {dimension_numbers = #tpu.dot_dimension_numbers<[2], [2], [1], [1], [0, 0, 0, 1, 1, 1], [0], [0]>} : vector<8x16x4xbf16>, vector<8x8x4xbf16>, vector<8x16x8xf32> -> vector<8x16x8xf32>
    "tpu.trace_stop"() : () -> ()
    %cst_42 = arith.constant dense<0xFF800000> : vector<8x16xf32>
    %218 = vector.multi_reduction <maximumf>, %217, %cst_42 [2] : vector<8x16x8xf32> to vector<8x16xf32>
    %219 = vector.shape_cast %218 : vector<8x16xf32> to vector<8x16x1xf32>
    %220 = vector.broadcast %219 : vector<8x16x1xf32> to vector<8x16x8xf32>
    %221 = arith.subf %217, %220 : vector<8x16x8xf32>
    %222 = math.exp %221 : vector<8x16x8xf32>
    %cst_43 = arith.constant dense<0.000000e+00> : vector<8x16xf32>
    %223 = vector.multi_reduction <add>, %222, %cst_43 [2] : vector<8x16x8xf32> to vector<8x16xf32>
    %224 = vector.shape_cast %223 : vector<8x16xf32> to vector<8x16x1xf32>
    %225 = tpu.reciprocal %224 {approx = true} : vector<8x16x1xf32> -> vector<8x16x1xf32>
    %226 = arith.truncf %222 : vector<8x16x8xf32> to vector<8x16x8xbf16>
    "tpu.trace_start"() <{level = 10 : i32, message = "hqk,hkd->hqd"}> : () -> ()
    %cst_44 = arith.constant dense<0.000000e+00> : vector<8x16x4xf32>
    %227 = tpu.matmul %226, %124, %cst_44 {dimension_numbers = #tpu.dot_dimension_numbers<[2], [1], [1], [2], [0, 0, 0, 1, 1, 2], [0], [0]>} : vector<8x16x8xbf16>, vector<8x8x4xbf16>, vector<8x16x4xf32> -> vector<8x16x4xf32>
    "tpu.trace_stop"() : () -> ()
    %228 = vector.broadcast %225 : vector<8x16x1xf32> to vector<8x16x4xf32>
    %229 = arith.mulf %227, %228 : vector<8x16x4xf32>
    %230 = vector.extract_strided_slice %229 {offsets = [0, 0, 0], sizes = [1, 16, 4], strides = [1, 1, 1]} : vector<8x16x4xf32> to vector<1x16x4xf32>
    %231 = vector.shape_cast %230 : vector<1x16x4xf32> to vector<16x4xf32>
    %232 = vector.extract_strided_slice %229 {offsets = [1, 0, 0], sizes = [1, 16, 4], strides = [1, 1, 1]} : vector<8x16x4xf32> to vector<1x16x4xf32>
    %233 = vector.shape_cast %232 : vector<1x16x4xf32> to vector<16x4xf32>
    %234 = vector.extract_strided_slice %229 {offsets = [2, 0, 0], sizes = [1, 16, 4], strides = [1, 1, 1]} : vector<8x16x4xf32> to vector<1x16x4xf32>
    %235 = vector.shape_cast %234 : vector<1x16x4xf32> to vector<16x4xf32>
    %236 = vector.extract_strided_slice %229 {offsets = [3, 0, 0], sizes = [1, 16, 4], strides = [1, 1, 1]} : vector<8x16x4xf32> to vector<1x16x4xf32>
    %237 = vector.shape_cast %236 : vector<1x16x4xf32> to vector<16x4xf32>
    %238 = vector.extract_strided_slice %229 {offsets = [4, 0, 0], sizes = [1, 16, 4], strides = [1, 1, 1]} : vector<8x16x4xf32> to vector<1x16x4xf32>
    %239 = vector.shape_cast %238 : vector<1x16x4xf32> to vector<16x4xf32>
    %240 = vector.extract_strided_slice %229 {offsets = [5, 0, 0], sizes = [1, 16, 4], strides = [1, 1, 1]} : vector<8x16x4xf32> to vector<1x16x4xf32>
    %241 = vector.shape_cast %240 : vector<1x16x4xf32> to vector<16x4xf32>
    %242 = vector.extract_strided_slice %229 {offsets = [6, 0, 0], sizes = [1, 16, 4], strides = [1, 1, 1]} : vector<8x16x4xf32> to vector<1x16x4xf32>
    %243 = vector.shape_cast %242 : vector<1x16x4xf32> to vector<16x4xf32>
    %244 = vector.extract_strided_slice %229 {offsets = [7, 0, 0], sizes = [1, 16, 4], strides = [1, 1, 1]} : vector<8x16x4xf32> to vector<1x16x4xf32>
    %245 = vector.shape_cast %244 : vector<1x16x4xf32> to vector<16x4xf32>
    %246 = tpu.concatenate %231, %233, %235, %237, %239, %241, %243, %245 in 1 : vector<16x4xf32>, vector<16x4xf32>, vector<16x4xf32>, vector<16x4xf32>, vector<16x4xf32>, vector<16x4xf32>, vector<16x4xf32>, vector<16x4xf32> -> vector<16x32xf32>
    %c0_45 = arith.constant 0 : index
    %c0_46 = arith.constant 0 : index
    %c0_47 = arith.constant 0 : index
    %247 = vector.load %arg12[%c0_45, %c0_46, %c0_47] : memref<1x16x32xf32, #tpu.memory_space<vmem>>, vector<1x16x32xf32>
    %248 = vector.shape_cast %247 : vector<1x16x32xf32> to vector<16x32xf32>
    %249 = vector.shape_cast %246 : vector<16x32xf32> to vector<1x16x32xf32>
    tpu.vector_store %arg12[%c0_45, %c0_46, %c0_47], %249 {strides = array<i32>} : memref<1x16x32xf32, #tpu.memory_space<vmem>>, vector<1x16x32xf32>,
    return
  }
  func.func @transform_0(%arg0: i32) -> (i32, i32, i32) {
    %c0_i32 = arith.constant 0 : i32
    %c0_i32_0 = arith.constant 0 : i32
    %c0_i32_1 = arith.constant 0 : i32
    return %arg0, %c0_i32, %c0_i32_0 : i32, i32, i32
  }
  func.func @transform_1(%arg0: i32) -> (i32, i32, i32) {
    %c0_i32 = arith.constant 0 : i32
    %c0_i32_0 = arith.constant 0 : i32
    %c0_i32_1 = arith.constant 0 : i32
    return %arg0, %c0_i32, %c0_i32_0 : i32, i32, i32
  }
  func.func @transform_2(%arg0: i32) -> (i32, i32) {
    %c0_i32 = arith.constant 0 : i32
    %c0_i32_0 = arith.constant 0 : i32
    %c0_i32_1 = arith.constant 0 : i32
    return %c0_i32, %c0_i32_0 : i32, i32
  }
  func.func @transform_3(%arg0: i32) -> (i32, i32) {
    %c0_i32 = arith.constant 0 : i32
    %c0_i32_0 = arith.constant 0 : i32
    %c0_i32_1 = arith.constant 0 : i32
    return %c0_i32, %c0_i32_0 : i32, i32
  }
  func.func @transform_4(%arg0: i32) -> (i32, i32) {
    %c0_i32 = arith.constant 0 : i32
    %c0_i32_0 = arith.constant 0 : i32
    %c0_i32_1 = arith.constant 0 : i32
    return %c0_i32, %c0_i32_0 : i32, i32
  }
  func.func @transform_5(%arg0: i32) -> (i32, i32) {
    %c0_i32 = arith.constant 0 : i32
    %c0_i32_0 = arith.constant 0 : i32
    %c0_i32_1 = arith.constant 0 : i32
    return %c0_i32, %c0_i32_0 : i32, i32
  }
  func.func @transform_6(%arg0: i32) -> (i32, i32) {
    %c0_i32 = arith.constant 0 : i32
    %c0_i32_0 = arith.constant 0 : i32
    %c0_i32_1 = arith.constant 0 : i32
    return %c0_i32, %c0_i32_0 : i32, i32
  }
  func.func @transform_7(%arg0: i32) -> (i32, i32) {
    %c0_i32 = arith.constant 0 : i32
    %c0_i32_0 = arith.constant 0 : i32
    %c0_i32_1 = arith.constant 0 : i32
    return %c0_i32, %c0_i32_0 : i32, i32
  }
  func.func @transform_8(%arg0: i32) -> (i32, i32) {
    %c0_i32 = arith.constant 0 : i32
    %c0_i32_0 = arith.constant 0 : i32
    %c0_i32_1 = arith.constant 0 : i32
    return %c0_i32, %c0_i32_0 : i32, i32
  }
  func.func @transform_9(%arg0: i32) -> (i32, i32) {
    %c0_i32 = arith.constant 0 : i32
    %c0_i32_0 = arith.constant 0 : i32
    %c0_i32_1 = arith.constant 0 : i32
    return %c0_i32, %c0_i32_0 : i32, i32
  }
  func.func @transform_10(%arg0: i32) -> (i32, i32, i32) {
    %c0_i32 = arith.constant 0 : i32
    %c0_i32_0 = arith.constant 0 : i32
    %c0_i32_1 = arith.constant 0 : i32
    return %arg0, %c0_i32, %c0_i32_0 : i32, i32, i32
  }
  func.func @transform_11(%arg0: i32) -> (i32, i32, i32) {
    %c0_i32 = arith.constant 0 : i32
    %c0_i32_0 = arith.constant 0 : i32
    %c0_i32_1 = arith.constant 0 : i32
    return %arg0, %c0_i32, %c0_i32_0 : i32, i32, i32
  }
}

module attributes {stable_mosaic.version = 11 : i64} {
  func.func @_cross_attn_kernel(%arg0: i32, %arg1: memref<1x8x32xf32, #tpu.memory_space<vmem>>, %arg2: memref<1x16x32xf32, #tpu.memory_space<vmem>>, %arg3: memref<1x32xf32, #tpu.memory_space<vmem>>, %arg4: memref<1x32xf32, #tpu.memory_space<vmem>>, %arg5: memref<1x32xf32, #tpu.memory_space<vmem>>, %arg6: memref<1x32xf32, #tpu.memory_space<vmem>>, %arg7: memref<32x96xbf16, #tpu.memory_space<vmem>>, %arg8: memref<1x96xbf16, #tpu.memory_space<vmem>>, %arg9: memref<32x96xbf16, #tpu.memory_space<vmem>>, %arg10: memref<1x96xbf16, #tpu.memory_space<vmem>>, %arg11: memref<1x8x32xf32, #tpu.memory_space<vmem>>, %arg12: memref<1x16x32xf32, #tpu.memory_space<vmem>>) attributes {dimension_semantics = [#tpu.dimension_semantics<parallel>], iteration_bounds = array<i64: 2>, scalar_prefetch = 0 : i64, scratch_operands = 0 : i64, tpu.core_type = #tpu.core_type<tc>, window_params = [{transform_indices = @transform_0, window_bounds = array<i64: 1, 8, 32>}, {transform_indices = @transform_1, window_bounds = array<i64: 1, 16, 32>}, {pipeline_mode = #tpu.pipeline_mode<synchronous>, transform_indices = @transform_2, window_bounds = array<i64: 1, 32>}, {pipeline_mode = #tpu.pipeline_mode<synchronous>, transform_indices = @transform_3, window_bounds = array<i64: 1, 32>}, {pipeline_mode = #tpu.pipeline_mode<synchronous>, transform_indices = @transform_4, window_bounds = array<i64: 1, 32>}, {pipeline_mode = #tpu.pipeline_mode<synchronous>, transform_indices = @transform_5, window_bounds = array<i64: 1, 32>}, {pipeline_mode = #tpu.pipeline_mode<synchronous>, transform_indices = @transform_6, window_bounds = array<i64: 32, 96>}, {pipeline_mode = #tpu.pipeline_mode<synchronous>, transform_indices = @transform_7, window_bounds = array<i64: 1, 96>}, {pipeline_mode = #tpu.pipeline_mode<synchronous>, transform_indices = @transform_8, window_bounds = array<i64: 32, 96>}, {pipeline_mode = #tpu.pipeline_mode<synchronous>, transform_indices = @transform_9, window_bounds = array<i64: 1, 96>}, {transform_indices = @transform_10, window_bounds = array<i64: 1, 8, 32>}, {transform_indices = @transform_11, window_bounds = array<i64: 1, 16, 32>}]} {
    %c0 = arith.constant 0 : index
    %c0_0 = arith.constant 0 : index
    %c0_1 = arith.constant 0 : index
    %0 = vector.load %arg1[%c0, %c0_0, %c0_1] : memref<1x8x32xf32, #tpu.memory_space<vmem>>, vector<1x8x32xf32>
    %1 = vector.shape_cast %0 : vector<1x8x32xf32> to vector<8x32xf32>
    %c0_2 = arith.constant 0 : index
    %c0_3 = arith.constant 0 : index
    %c0_4 = arith.constant 0 : index
    %2 = vector.load %arg2[%c0_2, %c0_3, %c0_4] : memref<1x16x32xf32, #tpu.memory_space<vmem>>, vector<1x16x32xf32>
    %3 = vector.shape_cast %2 : vector<1x16x32xf32> to vector<16x32xf32>
    %cst = arith.constant dense<0.000000e+00> : vector<8xf32>
    %4 = vector.multi_reduction <add>, %1, %cst [1] : vector<8x32xf32> to vector<8xf32>
    %5 = vector.shape_cast %4 : vector<8xf32> to vector<8x1xf32>
    %cst_5 = arith.constant 3.200000e+01 : f32
    %6 = vector.broadcast %cst_5 : f32 to vector<8x1xf32>
    %7 = arith.divf %5, %6 : vector<8x1xf32>
    %8 = vector.broadcast %7 : vector<8x1xf32> to vector<8x32xf32>
    %9 = arith.subf %1, %8 : vector<8x32xf32>
    %10 = arith.mulf %9, %9 : vector<8x32xf32>
    %cst_6 = arith.constant dense<0.000000e+00> : vector<8xf32>
    %11 = vector.multi_reduction <add>, %10, %cst_6 [1] : vector<8x32xf32> to vector<8xf32>
    %12 = vector.shape_cast %11 : vector<8xf32> to vector<8x1xf32>
    %cst_7 = arith.constant 3.200000e+01 : f32
    %13 = vector.broadcast %cst_7 : f32 to vector<8x1xf32>
    %14 = arith.divf %12, %13 : vector<8x1xf32>
    %15 = vector.broadcast %7 : vector<8x1xf32> to vector<8x32xf32>
    %16 = arith.subf %1, %15 : vector<8x32xf32>
    %cst_8 = arith.constant 9.99999974E-6 : f32
    %17 = vector.broadcast %cst_8 : f32 to vector<8x1xf32>
    %18 = arith.addf %14, %17 : vector<8x1xf32>
    %19 = math.rsqrt %18 : vector<8x1xf32>
    %20 = vector.broadcast %19 : vector<8x1xf32> to vector<8x32xf32>
    %21 = arith.mulf %16, %20 : vector<8x32xf32>
    %c0_9 = arith.constant 0 : index
    %c0_10 = arith.constant 0 : index
    %22 = vector.load %arg3[%c0_9, %c0_10] : memref<1x32xf32, #tpu.memory_space<vmem>>, vector<1x32xf32>
    %23 = vector.broadcast %22 : vector<1x32xf32> to vector<8x32xf32>
    %24 = arith.mulf %21, %23 : vector<8x32xf32>
    %c0_11 = arith.constant 0 : index
    %c0_12 = arith.constant 0 : index
    %25 = vector.load %arg4[%c0_11, %c0_12] : memref<1x32xf32, #tpu.memory_space<vmem>>, vector<1x32xf32>
    %26 = vector.broadcast %25 : vector<1x32xf32> to vector<8x32xf32>
    %27 = arith.addf %24, %26 : vector<8x32xf32>
    %28 = arith.truncf %27 : vector<8x32xf32> to vector<8x32xbf16>
    %cst_13 = arith.constant dense<0.000000e+00> : vector<16xf32>
    %29 = vector.multi_reduction <add>, %3, %cst_13 [1] : vector<16x32xf32> to vector<16xf32>
    %30 = vector.shape_cast %29 : vector<16xf32> to vector<16x1xf32>
    %cst_14 = arith.constant 3.200000e+01 : f32
    %31 = vector.broadcast %cst_14 : f32 to vector<16x1xf32>
    %32 = arith.divf %30, %31 : vector<16x1xf32>
    %33 = vector.broadcast %32 : vector<16x1xf32> to vector<16x32xf32>
    %34 = arith.subf %3, %33 : vector<16x32xf32>
    %35 = arith.mulf %34, %34 : vector<16x32xf32>
    %cst_15 = arith.constant dense<0.000000e+00> : vector<16xf32>
    %36 = vector.multi_reduction <add>, %35, %cst_15 [1] : vector<16x32xf32> to vector<16xf32>
    %37 = vector.shape_cast %36 : vector<16xf32> to vector<16x1xf32>
    %cst_16 = arith.constant 3.200000e+01 : f32
    %38 = vector.broadcast %cst_16 : f32 to vector<16x1xf32>
    %39 = arith.divf %37, %38 : vector<16x1xf32>
    %40 = vector.broadcast %32 : vector<16x1xf32> to vector<16x32xf32>
    %41 = arith.subf %3, %40 : vector<16x32xf32>
    %cst_17 = arith.constant 9.99999974E-6 : f32
    %42 = vector.broadcast %cst_17 : f32 to vector<16x1xf32>
    %43 = arith.addf %39, %42 : vector<16x1xf32>
    %44 = math.rsqrt %43 : vector<16x1xf32>
    %45 = vector.broadcast %44 : vector<16x1xf32> to vector<16x32xf32>
    %46 = arith.mulf %41, %45 : vector<16x32xf32>
    %c0_18 = arith.constant 0 : index
    %c0_19 = arith.constant 0 : index
    %47 = vector.load %arg5[%c0_18, %c0_19] : memref<1x32xf32, #tpu.memory_space<vmem>>, vector<1x32xf32>
    %48 = vector.broadcast %47 : vector<1x32xf32> to vector<16x32xf32>
    %49 = arith.mulf %46, %48 : vector<16x32xf32>
    %c0_20 = arith.constant 0 : index
    %c0_21 = arith.constant 0 : index
    %50 = vector.load %arg6[%c0_20, %c0_21] : memref<1x32xf32, #tpu.memory_space<vmem>>, vector<1x32xf32>
    %51 = vector.broadcast %50 : vector<1x32xf32> to vector<16x32xf32>
    %52 = arith.addf %49, %51 : vector<16x32xf32>
    %53 = arith.truncf %52 : vector<16x32xf32> to vector<16x32xbf16>
    %c0_22 = arith.constant 0 : index
    %c0_23 = arith.constant 0 : index
    %54 = vector.load %arg7[%c0_22, %c0_23] : memref<32x96xbf16, #tpu.memory_space<vmem>>, vector<32x96xbf16>
    %cst_24 = arith.constant dense<0.000000e+00> : vector<8x96xf32>
    %55 = tpu.matmul %28, %54, %cst_24 {dimension_numbers = #tpu.dot_dimension_numbers<[1], [0], [0], [1], [0, 0, 1, 1], [], []>} : vector<8x32xbf16>, vector<32x96xbf16>, vector<8x96xf32> -> vector<8x96xf32>
    %c0_25 = arith.constant 0 : index
    %c0_26 = arith.constant 0 : index
    %56 = vector.load %arg8[%c0_25, %c0_26] : memref<1x96xbf16, #tpu.memory_space<vmem>>, vector<1x96xbf16>
    %57 = arith.extf %56 : vector<1x96xbf16> to vector<1x96xf32>
    %58 = vector.broadcast %57 : vector<1x96xf32> to vector<8x96xf32>
    %59 = arith.addf %55, %58 : vector<8x96xf32>
    %c0_27 = arith.constant 0 : index
    %c0_28 = arith.constant 0 : index
    %60 = vector.load %arg9[%c0_27, %c0_28] : memref<32x96xbf16, #tpu.memory_space<vmem>>, vector<32x96xbf16>
    %cst_29 = arith.constant dense<0.000000e+00> : vector<16x96xf32>
    %61 = tpu.matmul %53, %60, %cst_29 {dimension_numbers = #tpu.dot_dimension_numbers<[1], [0], [0], [1], [0, 0, 1, 1], [], []>} : vector<16x32xbf16>, vector<32x96xbf16>, vector<16x96xf32> -> vector<16x96xf32>
    %c0_30 = arith.constant 0 : index
    %c0_31 = arith.constant 0 : index
    %62 = vector.load %arg10[%c0_30, %c0_31] : memref<1x96xbf16, #tpu.memory_space<vmem>>, vector<1x96xbf16>
    %63 = arith.extf %62 : vector<1x96xbf16> to vector<1x96xf32>
    %64 = vector.broadcast %63 : vector<1x96xf32> to vector<16x96xf32>
    %65 = arith.addf %61, %64 : vector<16x96xf32>
    %66 = vector.extract_strided_slice %59 {offsets = [0, 0], sizes = [8, 32], strides = [1, 1]} : vector<8x96xf32> to vector<8x32xf32>
    %cst_32 = arith.constant 5.000000e-01 : f32
    %67 = vector.broadcast %cst_32 : f32 to vector<8x32xf32>
    %68 = arith.mulf %66, %67 : vector<8x32xf32>
    %69 = arith.truncf %68 : vector<8x32xf32> to vector<8x32xbf16>
    %70 = vector.extract_strided_slice %69 {offsets = [0, 0], sizes = [8, 4], strides = [1, 1]} : vector<8x32xbf16> to vector<8x4xbf16>
    %71 = vector.extract_strided_slice %69 {offsets = [0, 4], sizes = [8, 4], strides = [1, 1]} : vector<8x32xbf16> to vector<8x4xbf16>
    %72 = vector.extract_strided_slice %69 {offsets = [0, 8], sizes = [8, 4], strides = [1, 1]} : vector<8x32xbf16> to vector<8x4xbf16>
    %73 = vector.extract_strided_slice %69 {offsets = [0, 12], sizes = [8, 4], strides = [1, 1]} : vector<8x32xbf16> to vector<8x4xbf16>
    %74 = vector.extract_strided_slice %69 {offsets = [0, 16], sizes = [8, 4], strides = [1, 1]} : vector<8x32xbf16> to vector<8x4xbf16>
    %75 = vector.extract_strided_slice %69 {offsets = [0, 20], sizes = [8, 4], strides = [1, 1]} : vector<8x32xbf16> to vector<8x4xbf16>
    %76 = vector.extract_strided_slice %69 {offsets = [0, 24], sizes = [8, 4], strides = [1, 1]} : vector<8x32xbf16> to vector<8x4xbf16>
    %77 = vector.extract_strided_slice %69 {offsets = [0, 28], sizes = [8, 4], strides = [1, 1]} : vector<8x32xbf16> to vector<8x4xbf16>
    %78 = vector.shape_cast %70 : vector<8x4xbf16> to vector<1x8x4xbf16>
    %79 = vector.shape_cast %71 : vector<8x4xbf16> to vector<1x8x4xbf16>
    %80 = vector.shape_cast %72 : vector<8x4xbf16> to vector<1x8x4xbf16>
    %81 = vector.shape_cast %73 : vector<8x4xbf16> to vector<1x8x4xbf16>
    %82 = vector.shape_cast %74 : vector<8x4xbf16> to vector<1x8x4xbf16>
    %83 = vector.shape_cast %75 : vector<8x4xbf16> to vector<1x8x4xbf16>
    %84 = vector.shape_cast %76 : vector<8x4xbf16> to vector<1x8x4xbf16>
    %85 = vector.shape_cast %77 : vector<8x4xbf16> to vector<1x8x4xbf16>
    %86 = tpu.concatenate %78, %79, %80, %81, %82, %83, %84, %85 in 0 : vector<1x8x4xbf16>, vector<1x8x4xbf16>, vector<1x8x4xbf16>, vector<1x8x4xbf16>, vector<1x8x4xbf16>, vector<1x8x4xbf16>, vector<1x8x4xbf16>, vector<1x8x4xbf16> -> vector<8x8x4xbf16>
    %87 = vector.extract_strided_slice %59 {offsets = [0, 32], sizes = [8, 32], strides = [1, 1]} : vector<8x96xf32> to vector<8x32xf32>
    %88 = arith.truncf %87 : vector<8x32xf32> to vector<8x32xbf16>
    %89 = vector.extract_strided_slice %88 {offsets = [0, 0], sizes = [8, 4], strides = [1, 1]} : vector<8x32xbf16> to vector<8x4xbf16>
    %90 = vector.extract_strided_slice %88 {offsets = [0, 4], sizes = [8, 4], strides = [1, 1]} : vector<8x32xbf16> to vector<8x4xbf16>
    %91 = vector.extract_strided_slice %88 {offsets = [0, 8], sizes = [8, 4], strides = [1, 1]} : vector<8x32xbf16> to vector<8x4xbf16>
    %92 = vector.extract_strided_slice %88 {offsets = [0, 12], sizes = [8, 4], strides = [1, 1]} : vector<8x32xbf16> to vector<8x4xbf16>
    %93 = vector.extract_strided_slice %88 {offsets = [0, 16], sizes = [8, 4], strides = [1, 1]} : vector<8x32xbf16> to vector<8x4xbf16>
    %94 = vector.extract_strided_slice %88 {offsets = [0, 20], sizes = [8, 4], strides = [1, 1]} : vector<8x32xbf16> to vector<8x4xbf16>
    %95 = vector.extract_strided_slice %88 {offsets = [0, 24], sizes = [8, 4], strides = [1, 1]} : vector<8x32xbf16> to vector<8x4xbf16>
    %96 = vector.extract_strided_slice %88 {offsets = [0, 28], sizes = [8, 4], strides = [1, 1]} : vector<8x32xbf16> to vector<8x4xbf16>
    %97 = vector.shape_cast %89 : vector<8x4xbf16> to vector<1x8x4xbf16>
    %98 = vector.shape_cast %90 : vector<8x4xbf16> to vector<1x8x4xbf16>
    %99 = vector.shape_cast %91 : vector<8x4xbf16> to vector<1x8x4xbf16>
    %100 = vector.shape_cast %92 : vector<8x4xbf16> to vector<1x8x4xbf16>
    %101 = vector.shape_cast %93 : vector<8x4xbf16> to vector<1x8x4xbf16>
    %102 = vector.shape_cast %94 : vector<8x4xbf16> to vector<1x8x4xbf16>
    %103 = vector.shape_cast %95 : vector<8x4xbf16> to vector<1x8x4xbf16>
    %104 = vector.shape_cast %96 : vector<8x4xbf16> to vector<1x8x4xbf16>
    %105 = tpu.concatenate %97, %98, %99, %100, %101, %102, %103, %104 in 0 : vector<1x8x4xbf16>, vector<1x8x4xbf16>, vector<1x8x4xbf16>, vector<1x8x4xbf16>, vector<1x8x4xbf16>, vector<1x8x4xbf16>, vector<1x8x4xbf16>, vector<1x8x4xbf16> -> vector<8x8x4xbf16>
    %106 = vector.extract_strided_slice %59 {offsets = [0, 64], sizes = [8, 32], strides = [1, 1]} : vector<8x96xf32> to vector<8x32xf32>
    %107 = arith.truncf %106 : vector<8x32xf32> to vector<8x32xbf16>
    %108 = vector.extract_strided_slice %107 {offsets = [0, 0], sizes = [8, 4], strides = [1, 1]} : vector<8x32xbf16> to vector<8x4xbf16>
    %109 = vector.extract_strided_slice %107 {offsets = [0, 4], sizes = [8, 4], strides = [1, 1]} : vector<8x32xbf16> to vector<8x4xbf16>
    %110 = vector.extract_strided_slice %107 {offsets = [0, 8], sizes = [8, 4], strides = [1, 1]} : vector<8x32xbf16> to vector<8x4xbf16>
    %111 = vector.extract_strided_slice %107 {offsets = [0, 12], sizes = [8, 4], strides = [1, 1]} : vector<8x32xbf16> to vector<8x4xbf16>
    %112 = vector.extract_strided_slice %107 {offsets = [0, 16], sizes = [8, 4], strides = [1, 1]} : vector<8x32xbf16> to vector<8x4xbf16>
    %113 = vector.extract_strided_slice %107 {offsets = [0, 20], sizes = [8, 4], strides = [1, 1]} : vector<8x32xbf16> to vector<8x4xbf16>
    %114 = vector.extract_strided_slice %107 {offsets = [0, 24], sizes = [8, 4], strides = [1, 1]} : vector<8x32xbf16> to vector<8x4xbf16>
    %115 = vector.extract_strided_slice %107 {offsets = [0, 28], sizes = [8, 4], strides = [1, 1]} : vector<8x32xbf16> to vector<8x4xbf16>
    %116 = vector.shape_cast %108 : vector<8x4xbf16> to vector<1x8x4xbf16>
    %117 = vector.shape_cast %109 : vector<8x4xbf16> to vector<1x8x4xbf16>
    %118 = vector.shape_cast %110 : vector<8x4xbf16> to vector<1x8x4xbf16>
    %119 = vector.shape_cast %111 : vector<8x4xbf16> to vector<1x8x4xbf16>
    %120 = vector.shape_cast %112 : vector<8x4xbf16> to vector<1x8x4xbf16>
    %121 = vector.shape_cast %113 : vector<8x4xbf16> to vector<1x8x4xbf16>
    %122 = vector.shape_cast %114 : vector<8x4xbf16> to vector<1x8x4xbf16>
    %123 = vector.shape_cast %115 : vector<8x4xbf16> to vector<1x8x4xbf16>
    %124 = tpu.concatenate %116, %117, %118, %119, %120, %121, %122, %123 in 0 : vector<1x8x4xbf16>, vector<1x8x4xbf16>, vector<1x8x4xbf16>, vector<1x8x4xbf16>, vector<1x8x4xbf16>, vector<1x8x4xbf16>, vector<1x8x4xbf16>, vector<1x8x4xbf16> -> vector<8x8x4xbf16>
    %125 = vector.extract_strided_slice %65 {offsets = [0, 0], sizes = [16, 32], strides = [1, 1]} : vector<16x96xf32> to vector<16x32xf32>
    %cst_33 = arith.constant 5.000000e-01 : f32
    %126 = vector.broadcast %cst_33 : f32 to vector<16x32xf32>
    %127 = arith.mulf %125, %126 : vector<16x32xf32>
    %128 = arith.truncf %127 : vector<16x32xf32> to vector<16x32xbf16>
    %129 = vector.extract_strided_slice %128 {offsets = [0, 0], sizes = [16, 4], strides = [1, 1]} : vector<16x32xbf16> to vector<16x4xbf16>
    %130 = vector.extract_strided_slice %128 {offsets = [0, 4], sizes = [16, 4], strides = [1, 1]} : vector<16x32xbf16> to vector<16x4xbf16>
    %131 = vector.extract_strided_slice %128 {offsets = [0, 8], sizes = [16, 4], strides = [1, 1]} : vector<16x32xbf16> to vector<16x4xbf16>
    %132 = vector.extract_strided_slice %128 {offsets = [0, 12], sizes = [16, 4], strides = [1, 1]} : vector<16x32xbf16> to vector<16x4xbf16>
    %133 = vector.extract_strided_slice %128 {offsets = [0, 16], sizes = [16, 4], strides = [1, 1]} : vector<16x32xbf16> to vector<16x4xbf16>
    %134 = vector.extract_strided_slice %128 {offsets = [0, 20], sizes = [16, 4], strides = [1, 1]} : vector<16x32xbf16> to vector<16x4xbf16>
    %135 = vector.extract_strided_slice %128 {offsets = [0, 24], sizes = [16, 4], strides = [1, 1]} : vector<16x32xbf16> to vector<16x4xbf16>
    %136 = vector.extract_strided_slice %128 {offsets = [0, 28], sizes = [16, 4], strides = [1, 1]} : vector<16x32xbf16> to vector<16x4xbf16>
    %137 = vector.shape_cast %129 : vector<16x4xbf16> to vector<1x16x4xbf16>
    %138 = vector.shape_cast %130 : vector<16x4xbf16> to vector<1x16x4xbf16>
    %139 = vector.shape_cast %131 : vector<16x4xbf16> to vector<1x16x4xbf16>
    %140 = vector.shape_cast %132 : vector<16x4xbf16> to vector<1x16x4xbf16>
    %141 = vector.shape_cast %133 : vector<16x4xbf16> to vector<1x16x4xbf16>
    %142 = vector.shape_cast %134 : vector<16x4xbf16> to vector<1x16x4xbf16>
    %143 = vector.shape_cast %135 : vector<16x4xbf16> to vector<1x16x4xbf16>
    %144 = vector.shape_cast %136 : vector<16x4xbf16> to vector<1x16x4xbf16>
    %145 = tpu.concatenate %137, %138, %139, %140, %141, %142, %143, %144 in 0 : vector<1x16x4xbf16>, vector<1x16x4xbf16>, vector<1x16x4xbf16>, vector<1x16x4xbf16>, vector<1x16x4xbf16>, vector<1x16x4xbf16>, vector<1x16x4xbf16>, vector<1x16x4xbf16> -> vector<8x16x4xbf16>
    %146 = vector.extract_strided_slice %65 {offsets = [0, 32], sizes = [16, 32], strides = [1, 1]} : vector<16x96xf32> to vector<16x32xf32>
    %147 = arith.truncf %146 : vector<16x32xf32> to vector<16x32xbf16>
    %148 = vector.extract_strided_slice %147 {offsets = [0, 0], sizes = [16, 4], strides = [1, 1]} : vector<16x32xbf16> to vector<16x4xbf16>
    %149 = vector.extract_strided_slice %147 {offsets = [0, 4], sizes = [16, 4], strides = [1, 1]} : vector<16x32xbf16> to vector<16x4xbf16>
    %150 = vector.extract_strided_slice %147 {offsets = [0, 8], sizes = [16, 4], strides = [1, 1]} : vector<16x32xbf16> to vector<16x4xbf16>
    %151 = vector.extract_strided_slice %147 {offsets = [0, 12], sizes = [16, 4], strides = [1, 1]} : vector<16x32xbf16> to vector<16x4xbf16>
    %152 = vector.extract_strided_slice %147 {offsets = [0, 16], sizes = [16, 4], strides = [1, 1]} : vector<16x32xbf16> to vector<16x4xbf16>
    %153 = vector.extract_strided_slice %147 {offsets = [0, 20], sizes = [16, 4], strides = [1, 1]} : vector<16x32xbf16> to vector<16x4xbf16>
    %154 = vector.extract_strided_slice %147 {offsets = [0, 24], sizes = [16, 4], strides = [1, 1]} : vector<16x32xbf16> to vector<16x4xbf16>
    %155 = vector.extract_strided_slice %147 {offsets = [0, 28], sizes = [16, 4], strides = [1, 1]} : vector<16x32xbf16> to vector<16x4xbf16>
    %156 = vector.shape_cast %148 : vector<16x4xbf16> to vector<1x16x4xbf16>
    %157 = vector.shape_cast %149 : vector<16x4xbf16> to vector<1x16x4xbf16>
    %158 = vector.shape_cast %150 : vector<16x4xbf16> to vector<1x16x4xbf16>
    %159 = vector.shape_cast %151 : vector<16x4xbf16> to vector<1x16x4xbf16>
    %160 = vector.shape_cast %152 : vector<16x4xbf16> to vector<1x16x4xbf16>
    %161 = vector.shape_cast %153 : vector<16x4xbf16> to vector<1x16x4xbf16>
    %162 = vector.shape_cast %154 : vector<16x4xbf16> to vector<1x16x4xbf16>
    %163 = vector.shape_cast %155 : vector<16x4xbf16> to vector<1x16x4xbf16>
    %164 = tpu.concatenate %156, %157, %158, %159, %160, %161, %162, %163 in 0 : vector<1x16x4xbf16>, vector<1x16x4xbf16>, vector<1x16x4xbf16>, vector<1x16x4xbf16>, vector<1x16x4xbf16>, vector<1x16x4xbf16>, vector<1x16x4xbf16>, vector<1x16x4xbf16> -> vector<8x16x4xbf16>
    %165 = vector.extract_strided_slice %65 {offsets = [0, 64], sizes = [16, 32], strides = [1, 1]} : vector<16x96xf32> to vector<16x32xf32>
    %166 = arith.truncf %165 : vector<16x32xf32> to vector<16x32xbf16>
    %167 = vector.extract_strided_slice %166 {offsets = [0, 0], sizes = [16, 4], strides = [1, 1]} : vector<16x32xbf16> to vector<16x4xbf16>
    %168 = vector.extract_strided_slice %166 {offsets = [0, 4], sizes = [16, 4], strides = [1, 1]} : vector<16x32xbf16> to vector<16x4xbf16>
    %169 = vector.extract_strided_slice %166 {offsets = [0, 8], sizes = [16, 4], strides = [1, 1]} : vector<16x32xbf16> to vector<16x4xbf16>
    %170 = vector.extract_strided_slice %166 {offsets = [0, 12], sizes = [16, 4], strides = [1, 1]} : vector<16x32xbf16> to vector<16x4xbf16>
    %171 = vector.extract_strided_slice %166 {offsets = [0, 16], sizes = [16, 4], strides = [1, 1]} : vector<16x32xbf16> to vector<16x4xbf16>
    %172 = vector.extract_strided_slice %166 {offsets = [0, 20], sizes = [16, 4], strides = [1, 1]} : vector<16x32xbf16> to vector<16x4xbf16>
    %173 = vector.extract_strided_slice %166 {offsets = [0, 24], sizes = [16, 4], strides = [1, 1]} : vector<16x32xbf16> to vector<16x4xbf16>
    %174 = vector.extract_strided_slice %166 {offsets = [0, 28], sizes = [16, 4], strides = [1, 1]} : vector<16x32xbf16> to vector<16x4xbf16>
    %175 = vector.shape_cast %167 : vector<16x4xbf16> to vector<1x16x4xbf16>
    %176 = vector.shape_cast %168 : vector<16x4xbf16> to vector<1x16x4xbf16>
    %177 = vector.shape_cast %169 : vector<16x4xbf16> to vector<1x16x4xbf16>
    %178 = vector.shape_cast %170 : vector<16x4xbf16> to vector<1x16x4xbf16>
    %179 = vector.shape_cast %171 : vector<16x4xbf16> to vector<1x16x4xbf16>
    %180 = vector.shape_cast %172 : vector<16x4xbf16> to vector<1x16x4xbf16>
    %181 = vector.shape_cast %173 : vector<16x4xbf16> to vector<1x16x4xbf16>
    %182 = vector.shape_cast %174 : vector<16x4xbf16> to vector<1x16x4xbf16>
    %183 = tpu.concatenate %175, %176, %177, %178, %179, %180, %181, %182 in 0 : vector<1x16x4xbf16>, vector<1x16x4xbf16>, vector<1x16x4xbf16>, vector<1x16x4xbf16>, vector<1x16x4xbf16>, vector<1x16x4xbf16>, vector<1x16x4xbf16>, vector<1x16x4xbf16> -> vector<8x16x4xbf16>
    "tpu.trace_start"() <{level = 10 : i32, message = "hqd,hkd->hqk"}> : () -> ()
    %cst_34 = arith.constant dense<0.000000e+00> : vector<8x8x16xf32>
    %184 = tpu.matmul %86, %164, %cst_34 {dimension_numbers = #tpu.dot_dimension_numbers<[2], [2], [1], [1], [0, 0, 0, 1, 1, 1], [0], [0]>} : vector<8x8x4xbf16>, vector<8x16x4xbf16>, vector<8x8x16xf32> -> vector<8x8x16xf32>
    "tpu.trace_stop"() : () -> ()
    %cst_35 = arith.constant dense<0xFF800000> : vector<8x8xf32>
    %185 = vector.multi_reduction <maximumf>, %184, %cst_35 [2] : vector<8x8x16xf32> to vector<8x8xf32>
    %186 = vector.shape_cast %185 : vector<8x8xf32> to vector<8x8x1xf32>
    %187 = vector.broadcast %186 : vector<8x8x1xf32> to vector<8x8x16xf32>
    %188 = arith.subf %184, %187 : vector<8x8x16xf32>
    %189 = math.exp %188 : vector<8x8x16xf32>
    %cst_36 = arith.constant dense<0.000000e+00> : vector<8x8xf32>
    %190 = vector.multi_reduction <add>, %189, %cst_36 [2] : vector<8x8x16xf32> to vector<8x8xf32>
    %191 = vector.shape_cast %190 : vector<8x8xf32> to vector<8x8x1xf32>
    %192 = tpu.reciprocal %191 {approx = true} : vector<8x8x1xf32> -> vector<8x8x1xf32>
    %193 = arith.truncf %189 : vector<8x8x16xf32> to vector<8x8x16xbf16>
    "tpu.trace_start"() <{level = 10 : i32, message = "hqk,hkd->hqd"}> : () -> ()
    %cst_37 = arith.constant dense<0.000000e+00> : vector<8x8x4xf32>
    %194 = tpu.matmul %193, %183, %cst_37 {dimension_numbers = #tpu.dot_dimension_numbers<[2], [1], [1], [2], [0, 0, 0, 1, 1, 2], [0], [0]>} : vector<8x8x16xbf16>, vector<8x16x4xbf16>, vector<8x8x4xf32> -> vector<8x8x4xf32>
    "tpu.trace_stop"() : () -> ()
    %195 = vector.broadcast %192 : vector<8x8x1xf32> to vector<8x8x4xf32>
    %196 = arith.mulf %194, %195 : vector<8x8x4xf32>
    %197 = vector.extract_strided_slice %196 {offsets = [0, 0, 0], sizes = [1, 8, 4], strides = [1, 1, 1]} : vector<8x8x4xf32> to vector<1x8x4xf32>
    %198 = vector.shape_cast %197 : vector<1x8x4xf32> to vector<8x4xf32>
    %199 = vector.extract_strided_slice %196 {offsets = [1, 0, 0], sizes = [1, 8, 4], strides = [1, 1, 1]} : vector<8x8x4xf32> to vector<1x8x4xf32>
    %200 = vector.shape_cast %199 : vector<1x8x4xf32> to vector<8x4xf32>
    %201 = vector.extract_strided_slice %196 {offsets = [2, 0, 0], sizes = [1, 8, 4], strides = [1, 1, 1]} : vector<8x8x4xf32> to vector<1x8x4xf32>
    %202 = vector.shape_cast %201 : vector<1x8x4xf32> to vector<8x4xf32>
    %203 = vector.extract_strided_slice %196 {offsets = [3, 0, 0], sizes = [1, 8, 4], strides = [1, 1, 1]} : vector<8x8x4xf32> to vector<1x8x4xf32>
    %204 = vector.shape_cast %203 : vector<1x8x4xf32> to vector<8x4xf32>
    %205 = vector.extract_strided_slice %196 {offsets = [4, 0, 0], sizes = [1, 8, 4], strides = [1, 1, 1]} : vector<8x8x4xf32> to vector<1x8x4xf32>
    %206 = vector.shape_cast %205 : vector<1x8x4xf32> to vector<8x4xf32>
    %207 = vector.extract_strided_slice %196 {offsets = [5, 0, 0], sizes = [1, 8, 4], strides = [1, 1, 1]} : vector<8x8x4xf32> to vector<1x8x4xf32>
    %208 = vector.shape_cast %207 : vector<1x8x4xf32> to vector<8x4xf32>
    %209 = vector.extract_strided_slice %196 {offsets = [6, 0, 0], sizes = [1, 8, 4], strides = [1, 1, 1]} : vector<8x8x4xf32> to vector<1x8x4xf32>
    %210 = vector.shape_cast %209 : vector<1x8x4xf32> to vector<8x4xf32>
    %211 = vector.extract_strided_slice %196 {offsets = [7, 0, 0], sizes = [1, 8, 4], strides = [1, 1, 1]} : vector<8x8x4xf32> to vector<1x8x4xf32>
    %212 = vector.shape_cast %211 : vector<1x8x4xf32> to vector<8x4xf32>
    %213 = tpu.concatenate %198, %200, %202, %204, %206, %208, %210, %212 in 1 : vector<8x4xf32>, vector<8x4xf32>, vector<8x4xf32>, vector<8x4xf32>, vector<8x4xf32>, vector<8x4xf32>, vector<8x4xf32>, vector<8x4xf32> -> vector<8x32xf32>
    %c0_38 = arith.constant 0 : index
    %c0_39 = arith.constant 0 : index
    %c0_40 = arith.constant 0 : index
    %214 = vector.load %arg11[%c0_38, %c0_39, %c0_40] : memref<1x8x32xf32, #tpu.memory_space<vmem>>, vector<1x8x32xf32>
    %215 = vector.shape_cast %214 : vector<1x8x32xf32> to vector<8x32xf32>
    %216 = vector.shape_cast %213 : vector<8x32xf32> to vector<1x8x32xf32>
    tpu.vector_store %arg11[%c0_38, %c0_39, %c0_40], %216 {strides = array<i32>} : memref<1x8x32xf32, #tpu.memory_space<vmem>>, vector<1x8x32xf32>,
    "tpu.trace_start"() <{level = 10 : i32, message = "hqd,hkd->hqk"}> : () -> ()
    %cst_41 = arith.constant dense<0.000000e+00> : vector<8x16x8xf32>
    %217 = tpu.matmul %145, %105, %cst_41 {dimension_numbers = #tpu.dot_dimension_numbers<[2], [2], [1], [1], [0, 0, 0, 1, 1, 1], [0], [0]>} : vector<8x16x4xbf16>, vector<8x8x4xbf16>, vector<8x16x8xf32> -> vector<8x16x8xf32>
    "tpu.trace_stop"() : () -> ()
    %cst_42 = arith.constant dense<0xFF800000> : vector<8x16xf32>
    %218 = vector.multi_reduction <maximumf>, %217, %cst_42 [2] : vector<8x16x8xf32> to vector<8x16xf32>
    %219 = vector.shape_cast %218 : vector<8x16xf32> to vector<8x16x1xf32>
    %220 = vector.broadcast %219 : vector<8x16x1xf32> to vector<8x16x8xf32>
    %221 = arith.subf %217, %220 : vector<8x16x8xf32>
    %222 = math.exp %221 : vector<8x16x8xf32>
    %cst_43 = arith.constant dense<0.000000e+00> : vector<8x16xf32>
    %223 = vector.multi_reduction <add>, %222, %cst_43 [2] : vector<8x16x8xf32> to vector<8x16xf32>
    %224 = vector.shape_cast %223 : vector<8x16xf32> to vector<8x16x1xf32>
    %225 = tpu.reciprocal %224 {approx = true} : vector<8x16x1xf32> -> vector<8x16x1xf32>
    %226 = arith.truncf %222 : vector<8x16x8xf32> to vector<8x16x8xbf16>
    "tpu.trace_start"() <{level = 10 : i32, message = "hqk,hkd->hqd"}> : () -> ()
    %cst_44 = arith.constant dense<0.000000e+00> : vector<8x16x4xf32>
    %227 = tpu.matmul %226, %124, %cst_44 {dimension_numbers = #tpu.dot_dimension_numbers<[2], [1], [1], [2], [0, 0, 0, 1, 1, 2], [0], [0]>} : vector<8x16x8xbf16>, vector<8x8x4xbf16>, vector<8x16x4xf32> -> vector<8x16x4xf32>
    "tpu.trace_stop"() : () -> ()
    %228 = vector.broadcast %225 : vector<8x16x1xf32> to vector<8x16x4xf32>
    %229 = arith.mulf %227, %228 : vector<8x16x4xf32>
    %230 = vector.extract_strided_slice %229 {offsets = [0, 0, 0], sizes = [1, 16, 4], strides = [1, 1, 1]} : vector<8x16x4xf32> to vector<1x16x4xf32>
    %231 = vector.shape_cast %230 : vector<1x16x4xf32> to vector<16x4xf32>
    %232 = vector.extract_strided_slice %229 {offsets = [1, 0, 0], sizes = [1, 16, 4], strides = [1, 1, 1]} : vector<8x16x4xf32> to vector<1x16x4xf32>
    %233 = vector.shape_cast %232 : vector<1x16x4xf32> to vector<16x4xf32>
    %234 = vector.extract_strided_slice %229 {offsets = [2, 0, 0], sizes = [1, 16, 4], strides = [1, 1, 1]} : vector<8x16x4xf32> to vector<1x16x4xf32>
    %235 = vector.shape_cast %234 : vector<1x16x4xf32> to vector<16x4xf32>
    %236 = vector.extract_strided_slice %229 {offsets = [3, 0, 0], sizes = [1, 16, 4], strides = [1, 1, 1]} : vector<8x16x4xf32> to vector<1x16x4xf32>
    %237 = vector.shape_cast %236 : vector<1x16x4xf32> to vector<16x4xf32>
    %238 = vector.extract_strided_slice %229 {offsets = [4, 0, 0], sizes = [1, 16, 4], strides = [1, 1, 1]} : vector<8x16x4xf32> to vector<1x16x4xf32>
    %239 = vector.shape_cast %238 : vector<1x16x4xf32> to vector<16x4xf32>
    %240 = vector.extract_strided_slice %229 {offsets = [5, 0, 0], sizes = [1, 16, 4], strides = [1, 1, 1]} : vector<8x16x4xf32> to vector<1x16x4xf32>
    %241 = vector.shape_cast %240 : vector<1x16x4xf32> to vector<16x4xf32>
    %242 = vector.extract_strided_slice %229 {offsets = [6, 0, 0], sizes = [1, 16, 4], strides = [1, 1, 1]} : vector<8x16x4xf32> to vector<1x16x4xf32>
    %243 = vector.shape_cast %242 : vector<1x16x4xf32> to vector<16x4xf32>
    %244 = vector.extract_strided_slice %229 {offsets = [7, 0, 0], sizes = [1, 16, 4], strides = [1, 1, 1]} : vector<8x16x4xf32> to vector<1x16x4xf32>
    %245 = vector.shape_cast %244 : vector<1x16x4xf32> to vector<16x4xf32>
    %246 = tpu.concatenate %231, %233, %235, %237, %239, %241, %243, %245 in 1 : vector<16x4xf32>, vector<16x4xf32>, vector<16x4xf32>, vector<16x4xf32>, vector<16x4xf32>, vector<16x4xf32>, vector<16x4xf32>, vector<16x4xf32> -> vector<16x32xf32>
    %c0_45 = arith.constant 0 : index
    %c0_46 = arith.constant 0 : index
    %c0_47 = arith.constant 0 : index
    %247 = vector.load %arg12[%c0_45, %c0_46, %c0_47] : memref<1x16x32xf32, #tpu.memory_space<vmem>>, vector<1x16x32xf32>
    %248 = vector.shape_cast %247 : vector<1x16x32xf32> to vector<16x32xf32>
    %249 = vector.shape_cast %246 : vector<16x32xf32> to vector<1x16x32xf32>
    tpu.vector_store %arg12[%c0_45, %c0_46, %c0_47], %249 {strides = array<i32>} : memref<1x16x32xf32, #tpu.memory_space<vmem>>, vector<1x16x32xf32>,
    return
  }
  func.func @transform_0(%arg0: i32) -> (i32, i32, i32) {
    %c0_i32 = arith.constant 0 : i32
    %c0_i32_0 = arith.constant 0 : i32
    %c0_i32_1 = arith.constant 0 : i32
    return %arg0, %c0_i32, %c0_i32_0 : i32, i32, i32
  }
  func.func @transform_1(%arg0: i32) -> (i32, i32, i32) {
    %c0_i32 = arith.constant 0 : i32
    %c0_i32_0 = arith.constant 0 : i32
    %c0_i32_1 = arith.constant 0 : i32
    return %arg0, %c0_i32, %c0_i32_0 : i32, i32, i32
  }
  func.func @transform_2(%arg0: i32) -> (i32, i32) {
    %c0_i32 = arith.constant 0 : i32
    %c0_i32_0 = arith.constant 0 : i32
    %c0_i32_1 = arith.constant 0 : i32
    return %c0_i32, %c0_i32_0 : i32, i32
  }
  func.func @transform_3(%arg0: i32) -> (i32, i32) {
    %c0_i32 = arith.constant 0 : i32
    %c0_i32_0 = arith.constant 0 : i32
    %c0_i32_1 = arith.constant 0 : i32
    return %c0_i32, %c0_i32_0 : i32, i32
  }
  func.func @transform_4(%arg0: i32) -> (i32, i32) {
    %c0_i32 = arith.constant 0 : i32
    %c0_i32_0 = arith.constant 0 : i32
    %c0_i32_1 = arith.constant 0 : i32
    return %c0_i32, %c0_i32_0 : i32, i32
  }
  func.func @transform_5(%arg0: i32) -> (i32, i32) {
    %c0_i32 = arith.constant 0 : i32
    %c0_i32_0 = arith.constant 0 : i32
    %c0_i32_1 = arith.constant 0 : i32
    return %c0_i32, %c0_i32_0 : i32, i32
  }
  func.func @transform_6(%arg0: i32) -> (i32, i32) {
    %c0_i32 = arith.constant 0 : i32
    %c0_i32_0 = arith.constant 0 : i32
    %c0_i32_1 = arith.constant 0 : i32
    return %c0_i32, %c0_i32_0 : i32, i32
  }
  func.func @transform_7(%arg0: i32) -> (i32, i32) {
    %c0_i32 = arith.constant 0 : i32
    %c0_i32_0 = arith.constant 0 : i32
    %c0_i32_1 = arith.constant 0 : i32
    return %c0_i32, %c0_i32_0 : i32, i32
  }
  func.func @transform_8(%arg0: i32) -> (i32, i32) {
    %c0_i32 = arith.constant 0 : i32
    %c0_i32_0 = arith.constant 0 : i32
    %c0_i32_1 = arith.constant 0 : i32
    return %c0_i32, %c0_i32_0 : i32, i32
  }
  func.func @transform_9(%arg0: i32) -> (i32, i32) {
    %c0_i32 = arith.constant 0 : i32
    %c0_i32_0 = arith.constant 0 : i32
    %c0_i32_1 = arith.constant 0 : i32
    return %c0_i32, %c0_i32_0 : i32, i32
  }
  func.func @transform_10(%arg0: i32) -> (i32, i32, i32) {
    %c0_i32 = arith.constant 0 : i32
    %c0_i32_0 = arith.constant 0 : i32
    %c0_i32_1 = arith.constant 0 : i32
    return %arg0, %c0_i32, %c0_i32_0 : i32, i32, i32
  }
  func.func @transform_11(%arg0: i32) -> (i32, i32, i32) {
    %c0_i32 = arith.constant 0 : i32
    %c0_i32_0 = arith.constant 0 : i32
    %c0_i32_1 = arith.constant 0 : i32
    return %arg0, %c0_i32, %c0_i32_0 : i32, i32, i32
  }
}

</mosaic_0001>

<bundles_post_ra>
// kernel: tpu_custom_call.1
= control target key start
LH: loop header
LB: loop body
LE: loop exit
PB: predicated region body
PF: predicated region fallthrough
CT: control target
= control target key end

     0   :  { %s4558_s0 = inlined_call_operand.hbm [shape: f32[2,8,32], index: 0, kind: input, shape index: {}]   ;;  %s4559_s1 = inlined_call_operand.hbm [shape: f32[2,16,32], index: 1, kind: input, shape index: {}]   ;;  %s4560_s2 = inlined_call_operand.vmem [shape: f32[1,32], index: 2, kind: input, shape index: {}]   ;;  %s4561_s3 = inlined_call_operand.vmem [shape: f32[1,32], index: 3, kind: input, shape index: {}]   ;;  %s4562_s4 = inlined_call_operand.vmem [shape: f32[1,32], index: 4, kind: input, shape index: {}]   ;;  %s4563_s5 = inlined_call_operand.vmem [shape: f32[1,32], index: 5, kind: input, shape index: {}]   ;;  %s4564_s6 = inlined_call_operand.vmem [shape: bf16[32,96], index: 6, kind: input, shape index: {}]   ;;  %s4565_s7 = inlined_call_operand.vmem [shape: bf16[1,96], index: 7, kind: input, shape index: {}]   ;;  %s4566_s8 = inlined_call_operand.hbm [shape: bf16[32,96], index: 8, kind: input, shape index: {}]   ;;  %s4567_s9 = inlined_call_operand.vmem [shape: bf16[1,96], index: 9, kind: input, shape index: {}]   ;;  %s4568_s10 = inlined_call_operand.hbm [shape: f32[2,8,32], index: 10, kind: output, shape index: {0}]   ;;  %s4569_s11 = inlined_call_operand.hbm [shape: f32[2,16,32], index: 11, kind: output, shape index: {1}]  }
   0x1   :  { %4578 = sst [smem:[#allocation21_spill]] %s4558_s0 }
   0x2   :  { %4579 = sst [smem:[#allocation22_spill]] %s4566_s8 }
   0x3   :  { %17 = vsyncpa [#allocation3], 0 }
   0x4   :  { %19 = vsyncpa [#allocation3 + $0x1], 0 }
   0x5   :  { %20 = vsyncpa [#allocation6], 0 }
   0x6   :  { %22 = vsyncpa [#allocation6 + $0x1], 0 }
   0x7   :  { %23 = vsyncpa [#allocation4], 0 }
   0x8   :  { %25 = vsyncpa [#allocation4 + $0x1], 0 }
   0x9   :  { %26 = vsyncpa [#allocation10], 0 }
   0xa   :  { %28 = vsyncpa [#allocation10 + $0x1], 0  ;;  %s3671_s17 = smov 0   ;;  %s3673_s18 = smov 0  }
   0xb   :  { %s3675_s19 = smov 0   ;;  %s3677_s20 = smov 0  }
   0xc LB: > { %4580 = sst [smem:[#allocation16_spill]] %s3569_s17  ;;  %s3692_s21 = sadd.s32 4294967295, %s3581_s20   ;;  %s3581_s20 = sphi %s3677_s20, %s4603_s20   ;;  %s3577_s19 = sphi %s3675_s19, %s4605_s19   ;;  %s3573_s18 = sphi %s3673_s18, %s4607_s18   ;;  %s3569_s17 = sphi %s3671_s17, %s4606_s17  }
   0xd   : > { %4581 = sst [smem:[#allocation17_spill]] %s3577_s19  ;;  %s2847_s22 = sadd.s32 4294967294, %s3581_s20  }
   0xe   : > { %p54_p0 = scmp.ne.s32.totalorder %s3573_s18, %s3569_s17  ;;  %p4573_p1 = scmp.eq.s32.totalorder %s3692_s21, 0 }
   0xf   : > { %p278_p3 = scmp.eq.s32.totalorder %s2847_s22, 1  ;;  %p2848_p5 = scmp.ge.s32.totalorder %s3581_s20, 1 }
  0x10   : > { %p3701_p4 = por %p4573_p1, %p54_p0  ;;  %p311_p7 = scmp.lt.s32.totalorder %s3581_s20, 3 }
  0x11   : > { %p3706_p6 = por %p278_p3, %p54_p0  ;;  %s3583_s26 = smov [#allocation7]  }
  0x12   : > { %s4582_s23 = scalar_select %p3701_p4, 1, 0 }
  0x13   : > { %s4583_s24 = scalar_select %p3706_p6, 1, 0 }
  0x14   : > { %p3711_p8 = pnand %p2848_p5, %p311_p7  ;;  %s341_s27 = sshll.u32 %s3583_s26, 4  ;;  %s3715_s27 = int_to_ptr.vmem [resolvable:$true] %s341_s27 }
  0x15   : > { %4584 = sst [smem:[#allocation18_spill]] %s4583_s24  ;;  %s3727_s29 = sadd.s32 1, %s3581_s20  }
  0x16   : > { %s4585_s25 = scalar_select %p3711_p8, 1, 0 }
  0x17   : > { %p3203_p9 = pneg %p3711_p8  ;;  %4587 = sst [smem:[#allocation19_spill]] %s3727_s29 }
  0x18   : > { %s41_s30 = sadd.s32 1, %s3577_s19  ;;  %s38_s12 = ssub.s32 %s3581_s20, %s3727_s29 }
  0x19   : > { %p3722_p11 = pnand %p3203_p9, %p4573_p1  ;;  %s4588_s8 = sld [smem:[#allocation22_spill]] }
  0x1b   : > { %p3389_p13 = pneg %p3722_p11 }
  0x1f   : > { %s3387_s15 = scalar_lea.hbm %s4588_s8, 256 }
  0x20   : > { %p3388_p12 = scmp.ne.s32.totalorder %s4588_s8, %s3387_s15  ;;  %p3394_p5 = scmp.lt.u32.totalorder %s3387_s15, %s4588_s8 }
  0x22   : > { %p3390_p0 = pnand %p3389_p13, %p3388_p12 }
  0x24   : > { %p3391_p3 = pneg %p3390_p0 }
  0x26   : > { %p3396_p7 = pnand %p3394_p5, %p3391_p3 }
  0x28   : > { %3399 = shalt.err (!%p3396_p7)
}
  0x29   : > { %s3400_s29 = scalar_lea.vmem %s3715_s27, 256  ;;  %p3408_p2 = scmp.lt.s32.totalorder %s3715_s27, %s3715_s27 }
  0x2a   : > { %p3401_p9 = scmp.ne.s32.totalorder %s3715_s27, %s3400_s29  ;;  %p3409_p6 = scmp.lt.s32.totalorder %s3400_s29, %s3400_s29 }
  0x2c   : > { %p3403_p10 = pnand %p3401_p9, %p3389_p13  ;;  %p3410_p4 = por %p3409_p6, %p3408_p2 }
  0x2e   : > { %p3404_p1 = pneg %p3403_p10 }
  0x30   : > { %p3411_p8 = pnand %p3410_p4, %p3404_p1 }
  0x32   : > { %3414 = shalt.err (!%p3411_p8)
}
  0x33   : > { %s3584_s13 = smov 64   ;;  %s3585_s24 = smov 4  }
  0x34   : > { %3206 = dma.hbm_to_vmem [thread:$0]  (!%p3722_p11), %s4588_s8, 256, %s3715_s27, [#allocation6], %s3584_s13, %s3584_s13, %s3585_s24  }
  0x35   : > { %p39_p2 = scmp.eq.s32.totalorder %s38_s12, 0  ;;  %p48_p1 = scmp.ne.s32.totalorder %s3577_s19, %s3573_s18 }
  0x36   : > { %p49_p4 = scmp.eq.s32.totalorder %s3581_s20, 0  ;;  %p3222_p6 = scmp.lt.s32.totalorder %s3581_s20, 2 }
  0x37   : > { %s3758_s29 = scalar_select %p39_p2, %s3577_s19, %s41_s30  }
  0x38   : > { %p50_p8 = por %p49_p4, %p48_p1  ;;  %p4590_p10 = scmp.eq.s32.totalorder %s3692_s21, 1 }
  0x39   : > { %4589 = sst [smem:[#allocation20_spill]] %s3758_s29  ;;  %s3767_s22 = sand.u32 1, %s3577_s19  }
  0x3a   : > { %p3762_p12 = por %p4590_p10, %p48_p1  ;;  %s2852_s28 = sshll.u32 %s3581_s20, 7 }
  0x3b   : > { %s2851_s26 = sshll.u32 %s3767_s22, 3  ;;  %s4592_s0 = sld [smem:[#allocation21_spill]] }
  0x3c   : > { %s362_s30 = scalar_lea.vmem [#allocation2], %s2851_s26  ;;  %p3776_p11 = pnand %p3222_p6, %p50_p8 }
  0x3d   : > { %s369_s24 = sshll.u32 %s362_s30, 4  ;;  %s359_s8 = scalar_lea.sflag [#allocation3], %s3767_s22  ;;  %s3780_s24 = int_to_ptr.vmem [resolvable:$true] %s369_s24 }
  0x3e   : > { %p3417_p0 = pneg %p3776_p11 }
  0x41   : > { %s3774_s13 = scalar_lea.hbm %s4592_s0, %s2852_s28  ;;  %s3420_s27 = scalar_lea.hbm %s4592_s0, 256 }
  0x42   : > { %s3415_s29 = scalar_lea.hbm %s3774_s13, 128  ;;  %p3421_p7 = scmp.lt.u32.totalorder %s3774_s13, %s4592_s0 }
  0x43   : > { %p3416_p13 = scmp.ne.s32.totalorder %s3774_s13, %s3415_s29  ;;  %p3422_p9 = scmp.lt.u32.totalorder %s3420_s27, %s3415_s29 }
  0x44   : > { %p3424_p1 = scmp.lt.u32.totalorder %s3415_s29, %s3774_s13 }
  0x45   : > { %p3418_p3 = pnand %p3417_p0, %p3416_p13  ;;  %p3423_p2 = por %p3422_p9, %p3421_p7 }
  0x47   : > { %p3419_p5 = pneg %p3418_p3  ;;  %p3425_p4 = por %p3424_p1, %p3423_p2 }
  0x49   : > { %p3426_p6 = pnand %p3425_p4, %p3419_p5 }
  0x4b   : > { %3429 = shalt.err (!%p3426_p6)
}
  0x4c   : > { %s3430_s15 = scalar_lea.vmem %s3780_s24, 128  ;;  %s3586_s28 = smov [#allocation2]  }
  0x4d   : > { %p3431_p8 = scmp.ne.s32.totalorder %s3780_s24, %s3430_s15  ;;  %s3435_s26 = sshll.u32 %s3586_s28, 4  ;;  %s3436_s26 = int_to_ptr.vmem [resolvable:$false] %s3435_s26 }
  0x4e   : > { %s3437_s12 = scalar_lea.vmem %s3436_s26, 256  ;;  %p3438_p3 = scmp.lt.s32.totalorder %s3780_s24, %s3436_s26 }
  0x4f   : > { %p3433_p10 = pnand %p3431_p8, %p3417_p0  ;;  %p3439_p7 = scmp.lt.s32.totalorder %s3437_s12, %s3430_s15 }
  0x51   : > { %p3434_p13 = pneg %p3433_p10  ;;  %p3440_p9 = por %p3439_p7, %p3438_p3 }
  0x53   : > { %p3441_p2 = pnand %p3440_p9, %p3434_p13 }
  0x55   : > { %3444 = shalt.err (!%p3441_p2)
}
  0x56   : > { %3210 = dma.hbm_to_vmem [thread:$0]  (!%p3776_p11), %s3774_s13, 128, %s3780_s24, %s359_s8  }
  0x57   : > { %s4594_s29 = sshll.u32 %s3767_s22, 4  ;;  %s376_s28 = sand.u32 1, %s3581_s20  }
  0x58   : > { %s380_s27 = scalar_lea.vmem [#allocation5], %s4594_s29  ;;  %s2911_s26 = sshll.u32 %s3581_s20, 8 }
  0x59   : > { %s387_s30 = sshll.u32 %s380_s27, 4  ;;  %s3818_s0 = scalar_lea.hbm %s4559_s1, %s2911_s26  ;;  %s3812_s30 = int_to_ptr.vmem [resolvable:$true] %s387_s30 }
  0x5a   : > { %s3820_s19 = scalar_lea.sflag [#allocation6], %s376_s28  ;;  %s3445_s17 = scalar_lea.hbm %s3818_s0, 256 }
  0x5b   : > { %p3446_p5 = scmp.ne.s32.totalorder %s3818_s0, %s3445_s17  ;;  %s3450_s13 = scalar_lea.hbm %s4559_s1, 512 }
  0x5c   : > { %p3451_p6 = scmp.lt.u32.totalorder %s3818_s0, %s4559_s1  ;;  %p3452_p8 = scmp.lt.u32.totalorder %s3450_s13, %s3445_s17 }
  0x5d   : > { %p3448_p1 = pnand %p3446_p5, %p3417_p0  ;;  %p3454_p13 = scmp.lt.u32.totalorder %s3445_s17, %s3818_s0 }
  0x5e   : > { %p3453_p10 = por %p3452_p8, %p3451_p6 }
  0x5f   : > { %p3449_p4 = pneg %p3448_p1 }
  0x60   : > { %p3455_p3 = por %p3454_p13, %p3453_p10 }
  0x62   : > { %p3456_p7 = pnand %p3455_p3, %p3449_p4 }
  0x64   : > { %3459 = shalt.err (!%p3456_p7)
}
  0x65   : > { %s3460_s27 = scalar_lea.vmem %s3812_s30, 256  ;;  %s3587_s28 = smov [#allocation5]  }
  0x66   : > { %p3461_p9 = scmp.ne.s32.totalorder %s3812_s30, %s3460_s27  ;;  %s3465_s26 = sshll.u32 %s3587_s28, 4  ;;  %s3466_s26 = int_to_ptr.vmem [resolvable:$false] %s3465_s26 }
  0x67   : > { %s3467_s15 = scalar_lea.vmem %s3466_s26, 512  ;;  %p3468_p1 = scmp.lt.s32.totalorder %s3812_s30, %s3466_s26 }
  0x68   : > { %p3463_p2 = pnand %p3461_p9, %p3417_p0  ;;  %p3469_p6 = scmp.lt.s32.totalorder %s3467_s15, %s3460_s27 }
  0x6a   : > { %p3464_p5 = pneg %p3463_p2  ;;  %p3470_p8 = por %p3469_p6, %p3468_p1 }
  0x6c   : > { %p3471_p10 = pnand %p3470_p8, %p3464_p5 }
  0x6e   : > { %3474 = shalt.err (!%p3471_p10)
}
  0x6f   : > { %s3588_s17 = smov 128   ;;  %s3589_s12 = smov 8  }
  0x70   : > { %3213 = dma.hbm_to_vmem [thread:$0]  (!%p3776_p11), %s3818_s0, 256, %s3812_s30, %s3820_s19, %s3588_s17, %s3588_s17, %s3589_s12  }
  0x71   : > { %p4595_p0 = scmp.ne.s32.totalorder %s4585_s25, 0 }
  0x72   : > { %s3849_s8 = sand.u32 (!%p4595_p0), 1, %s3573_s18   ;;  %p4596_p4 = scmp.ne.s32.totalorder (!%p4595_p0), %s4582_s23, 0 }
  0x73   : > { %399 = sbr.rel (%p4595_p0) target bundleno = 2122 (0x84a), region = 60  ;;  %s2857_s22 = sshll.u32 (!%p4595_p0), %s3849_s8, 3 }
  0x74   : > { %s402_s13 = scalar_lea.sflag (!%p4595_p0), [#allocation3], %s3849_s8  ;;  %s405_s24 = scalar_lea.vmem (!%p4595_p0), [#allocation2], %s2857_s22 }
  0x7a   : > { %3548 = dma.done.wait (%p4596_p4), %s402_s13, 128  }
  0x7b   : > { %3550 = vsyncadd (%p4596_p4), %s402_s13, 4294967168  ;;  %s410_s0 = sand.u32 1, %s3692_s21   ;;  %s2858_s19 = sshll.u32 %s3849_s8, 4 }
  0x7c   : > { %s411_s25 = scalar_lea.sflag [#allocation6], %s410_s0  ;;  %s414_s14 = scalar_lea.vmem [#allocation5], %s2858_s19 }
  0x7d   : > { %3552 = dma.done.wait (%p4596_p4), %s411_s25, 256  }
  0x7e   : > { %3554 = vsyncadd (%p4596_p4), %s411_s25, 4294967040  ;;  %p4597_p11 = scmp.eq.s32.totalorder %s3692_s21, 0 }
  0x80   : > { %3556 = dma.done.wait (%p4597_p11), [#allocation6], 256   ;;  %p4598_p13 = pmov %p4597_p11 }
  0x81   : > { %vm471_vm0 = vcmask 261120   ;;  %v469_v0 = vld [vmem:[%s414_s14] sm:$0xff]  ;;  %v470_v1 = vld [vmem:[%s414_s14 + $0x8] sm:$0xff]  ;;  %v3590_v23 = vmov 0.0   ;;  %vm3591_vm1 = vmmov 0   ;;  %v554_v53 = vlaneseq  ;;  %s3592_s23 = smov 120  }
  0x82   : > { %3558 = vsyncadd (%p4598_p13), [#allocation6], 4294967040  ;;  %v468_v2 = vld [vmem:[%s405_s24] sm:$0xff]  ;;  %v503_v3 = vsel %vm471_vm0, %v469_v0, 0.0  ;;  %v506_v4 = vsel %vm471_vm0, %v470_v1, 0.0  ;;  %v3282_v22 = vld [vmem:[#allocation7] sm:$0xff]   ;;  %2983 = vmatprep.subr.bf16.mxu0 %v3590_v23  ;;  %2991 = vmatprep.subr.bf16.mxu1 %v3590_v23 }
  0x83   : > { %v472_v5 = vsel %vm471_vm0, %v468_v2, 0.0  ;;  %504 = vadd.xlane.f32.xlu0 %v503_v3  ;;  %v3281_v21 = vld [vmem:[%s4564_s6] sm:$0xff]   ;;  %2992 = vmatpush3.bf16.msra.mxu1 %v3282_v22  ;;  %v3283_v24 = vld [vmem:[%s4564_s6 + $0x8] sm:$0xff]   ;;  %v3284_v25 = vld [vmem:[#allocation7 + $0x8] sm:$0xff]   ;;  %v555_v54 = vshrl.u32 %v554_v53, 7  ;;  %s3593_s30 = smov 124  }
  0x84   : > { %473 = vadd.xlane.f32.xlu1 %v472_v5  ;;  %2984 = vmatpush3.bf16.msra.mxu0 %v3281_v21  ;;  %v2864_v37 = vld [vmem:[%s4562_s4] ss:$0 sm:$0xff]  ;;  %s3594_s29 = smov 116   ;;  %s3595_s27 = smov 108   ;;  %vm748_vm2 = vcmask 31744   ;;  %vm1131_vm3 = vcmask 130048  }
  0x85   : > { %2985 = vmatprep.subr.bf16.mxu0 %v3590_v23  ;;  %2993 = vmatprep.subr.bf16.mxu1 %v3590_v23  ;;  %v2862_v40 = vld [vmem:[%s4560_s2] ss:$0 sm:$0xff]  ;;  %v556_v56 = vsub.s32 0, %v555_v54  ;;  %s3596_s28 = smov 112   ;;  %s3597_s26 = smov 100   ;;  %vm2202_vm4 = vcmask 1043456  }
  0x86   : > { %2987 = vmatprep.mubr.msk.bf16.mxu0 %vm3591_vm1, %v3590_v23  ;;  %2995 = vmatprep.mubr.msk.bf16.mxu1 %vm3591_vm1, %v3590_v23  ;;  %v2865_v44 = vld [vmem:[%s4563_s5] ss:$0 sm:$0xff]  ;;  %s3598_s15 = smov 104   ;;  %s3599_s17 = smov 96   ;;  %vm1625_vm5 = vcmask 64512   ;;  %vm1627_vm6 = vcmask 97280  }
  0x87   : > { %507 = vadd.xlane.f32.xlu0 %v506_v4  ;;  %2994 = vmatpush3.bf16.msra.mxu1 %v3284_v25  ;;  %v2863_v45 = vld [vmem:[%s4561_s3] ss:$0 sm:$0xff]  ;;  %s3600_s24 = smov 64   ;;  %s3601_s0 = smov 4   ;;  %vm1630_vm7 = vcmask 162816   ;;  %vm1632_vm8 = vcmask 195584  }
  0x88   : > { %2986 = vmatpush3.bf16.msra.mxu0 %v3283_v24  ;;  %3005 = vmatprep.subr.bf16.mxu1 %v3590_v23  ;;  %v617_v55 = vld [vmem:[%s4567_s9] sm:$0x1]  ;;  %s3602_s25 = smov 8   ;;  %s3603_s14 = smov 12   ;;  %vm1634_vm9 = vcmask 228352  }
  0x89   : > { %2999 = vmatprep.subr.bf16.mxu0 %v3590_v23  ;;  %v618_v57 = vunpack.c.l.bf16 %v617_v55  ;;  %s2679_s13 = scalar_lea.sflag [#allocation4], %s3849_s8 }
  0x8b   : > { %v622_v58 = vrot.slane %v618_v57, %v556_v56 }
 0x110   : > { %v505_v6 = vpop.xlane.xlu0 %504 }
 0x111   : > { %v474_v7 = vpop.xlane.xlu1 %473  ;;  %v509_v8 = vmul.f32 0.03125, %v505_v6 }
 0x112   : > { %v476_v9 = vmul.f32 0.03125, %v474_v7 }
 0x113   : > { %v511_v10 = vsub.f32 %v469_v0, %v509_v8 }
 0x114   : > { %v477_v11 = vsub.f32 %v468_v2, %v476_v9  ;;  %v508_v12 = vpop.xlane.xlu0 %507  ;;  %v552_v9 = vld [vmem:[%s4565_s7] sm:$0x1] }
 0x115   : > { %v510_v13 = vmul.f32 0.03125, %v508_v12  ;;  %v513_v14 = vmul.f32 %v511_v10, %v511_v10 }
 0x116   : > { %v478_v15 = vmul.f32 %v477_v11, %v477_v11 }
 0x117   : > { %v512_v16 = vsub.f32 %v470_v1, %v510_v13  ;;  %v515_v17 = vsel %vm471_vm0, %v513_v14, 0.0 }
 0x118   : > { %516 = vadd.xlane.f32.xlu1 %v515_v17  ;;  %v479_v19 = vsel %vm471_vm0, %v478_v15, 0.0 }
 0x119   : > { %v514_v18 = vmul.f32 %v512_v16, %v512_v16 }
 0x11b   : > { %v518_v20 = vsel %vm471_vm0, %v514_v18, 0.0 }
 0x11c   : > { %519 = vadd.xlane.f32.xlu0 %v518_v20  ;;  %480 = vadd.xlane.f32.xlu1 %v479_v19 }
 0x1a5   : > { %v517_v26 = vpop.xlane.xlu1 %516 }
 0x1a6   : > { %v521_v27 = vmul.f32 0.03125, %v517_v26 }
 0x1a8   : > { %v523_v28 = vadd.f32 1e-05, %v521_v27 }
 0x1a9   : > { %v520_v29 = vpop.xlane.xlu0 %519  ;;  %v481_v30 = vpop.xlane.xlu1 %480 }
 0x1aa   : > { %3285 = vrsqrt.f32 %v523_v28  ;;  %v522_v31 = vmul.f32 0.03125, %v520_v29  ;;  %v482_v32 = vmul.f32 0.03125, %v481_v30 }
 0x1ac   : > { %v524_v33 = vadd.f32 1e-05, %v522_v31  ;;  %v483_v34 = vadd.f32 1e-05, %v482_v32 }
 0x1ae   : > { %3287 = vrsqrt.f32 %v524_v33 }
 0x1af   : > { %3289 = vrsqrt.f32 %v483_v34 }
 0x1b4   : > { %v3286_v35 = vpop.eup %3285 }
 0x1b5   : > { %v527_v36 = vmul.f32 %v3286_v35, %v511_v10  ;;  %v553_v10 = vunpack.c.l.bf16 %v552_v9 }
 0x1b7   : > { %v536_v42 = vmul.f32 %v2864_v37, %v527_v36 }
 0x1b8   : > { %v3288_v38 = vpop.eup %3287 }
 0x1b9   : > { %v3290_v39 = vpop.eup %3289  ;;  %v528_v41 = vmul.f32 %v3288_v38, %v512_v16  ;;  %v545_v48 = vadd.f32 %v2865_v44, %v536_v42 }
 0x1ba   : > { %v485_v43 = vmul.f32 %v3290_v39, %v477_v11  ;;  %v557_v11 = vrot.slane %v553_v10, %v556_v56 }
 0x1bb   : > { %v537_v46 = vmul.f32 %v2864_v37, %v528_v41 }
 0x1bc   : > { %v493_v47 = vmul.f32 %v2862_v40, %v485_v43 }
 0x1bd   : > { %v546_v49 = vadd.f32 %v2865_v44, %v537_v46 }
 0x1be   : > { %v501_v50 = vadd.f32 %v2863_v45, %v493_v47 }
 0x1bf   : > { %v547_v51 = vpack.c.bf16 %v546_v49, %v545_v48 }
 0x1c0   : > { %v502_v52 = vpack.c.bf16 %v501_v50, %v501_v50 }
 0x1c1   : > { %2996 = vmatmul.mubr.msk.bf16.vlgmr.msra.gmra.mrb[0].mxu1 %vm471_vm0, %v547_v51 }
 0x1c2   : > { %2988 = vmatmul.mubr.msk.bf16.vlgmr.msra.gmra.mrb[0].mxu0 %vm471_vm0, %v502_v52  ;;  %3007 = vmatprep.mubr.msk.bf16.mxu1 %vm3591_vm1, %v3590_v23 }
 0x1c3   : > { %3001 = vmatprep.mubr.msk.bf16.mxu0 %vm3591_vm1, %v3590_v23 }
 0x294   : > { %v672_v59 = vpop.f32.mrb[0].mxu1 }
 0x295   : > { %v607_v60 = vpop.f32.mrb[0].mxu0  ;;  %v673_v61 = vadd.f32 %v672_v59, %v622_v58  ;;  %v2997_v62 = vpop.f32.mrb[1].mxu1 }
 0x296   : > { %v2989_v63 = vpop.f32.mrb[1].mxu0  ;;  %v675_v0 = vpop.f32.mrb[2].mxu1  ;;  %v608_v12 = vadd.f32 %v607_v60, %v557_v11 }
 0x297   : > { %v610_v1 = vpop.f32.mrb[2].mxu0  ;;  %v676_v2 = vadd.f32 %v675_v0, %v622_v58  ;;  %v2998_v3 = vpop.f32.mrb[3].mxu1  ;;  %v712_v5 = vmul.f32 0.5, %v673_v61 }
 0x298   : > { %v2990_v4 = vpop.f32.mrb[3].mxu0  ;;  %v679_v13 = vmul.f32 0.5, %v608_v12  ;;  %v3947_v25 = vpack.c.bf16 %v608_v12, %v608_v12 }
 0x299   : > { %v713_v6 = vmul.f32 0.5, %v676_v2  ;;  %v730_v7 = vpack.c.bf16 %v676_v2, %v673_v61 }
 0x29a   : > { %v680_v16 = vpack.c.bf16 %v679_v13, %v679_v13 }
 0x29b   : > { %v3914_v8 = vpack.c.bf16 %v713_v6, %v712_v5  ;;  %734 = vrot.lane.b32.xlu1 %v730_v7, %s3592_s23  ;;  %732 = vrot.lane.b32.xlu0 %v730_v7, %s3593_s30 }
 0x29f   : > { %736 = vrot.lane.b32.xlu1 %v730_v7, %s3594_s29  ;;  %740 = vrot.lane.b32.xlu0 %v730_v7, %s3595_s27 }
 0x2a3   : > { %738 = vrot.lane.b32.xlu1 %v730_v7, %s3596_s28  ;;  %744 = vrot.lane.b32.xlu0 %v730_v7, %s3597_s26 }
 0x2a7   : > { %742 = vrot.lane.b32.xlu1 %v730_v7, %s3598_s15 }
 0x2ab   : > { %746 = vrot.lane.b32.xlu1 %v730_v7, %s3599_s17 }
 0x30d   : > { %v733_v14 = vpop.permute.xlu0 %732  ;;  %v735_v15 = vpop.permute.xlu1 %734 }
 0x30e   : > { %795 = vrot.lane.b32.xlu0 %v733_v14, %s3599_s17  ;;  %843 = vrot.lane.b32.xlu1 %v735_v15, %s3599_s17 }
 0x311   : > { %v737_v17 = vpop.permute.xlu1 %736  ;;  %v741_v19 = vpop.permute.xlu0 %740 }
 0x312   : > { %682 = vrot.lane.b32.xlu0 %v680_v16, %s3593_s30  ;;  %891 = vrot.lane.b32.xlu1 %v737_v17, %s3599_s17 }
 0x315   : > { %v739_v18 = vpop.permute.xlu1 %738  ;;  %v3939_v24 = vpop.permute.xlu0 %744 }
 0x316   : > { %684 = vrot.lane.b32.xlu0 %v680_v16, %s3592_s23  ;;  %939 = vrot.lane.b32.xlu1 %v739_v18, %s3599_s17 }
 0x319   : > { %v743_v20 = vpop.permute.xlu1 %742 }
 0x31a   : > { %686 = vrot.lane.b32.xlu0 %v680_v16, %s3594_s29  ;;  %987 = vrot.lane.b32.xlu1 %v741_v19, %s3599_s17 }
 0x31d   : > { %v747_v21 = vpop.permute.xlu1 %746 }
 0x31e   : > { %v753_v22 = vsel %vm748_vm2, %v747_v21, 0  ;;  %688 = vrot.lane.b32.xlu0 %v680_v16, %s3596_s28  ;;  %1035 = vrot.lane.b32.xlu1 %v743_v20, %s3599_s17 }
 0x31f   : > { %3000 = vmatpush3.bf16.xpose.msra.mxu0 %v753_v22 }
 0x320   : > { %3011 = vmatprep.subr.bf16.mxu0 %v3590_v23 }
 0x322   : > { %690 = vrot.lane.b32.xlu0 %v680_v16, %s3595_s27  ;;  %1083 = vrot.lane.b32.xlu1 %v3939_v24, %s3599_s17 }
 0x326   : > { %692 = vrot.lane.b32.xlu0 %v680_v16, %s3598_s15  ;;  %694 = vrot.lane.b32.xlu1 %v680_v16, %s3597_s26 }
 0x327   : > { %3002 = vmatmul.mubr.msk.bf16.vlgmr.msra.gmra.mrb[4].mxu0 %vm748_vm2, %v680_v16 }
 0x328   : > { %3013 = vmatprep.mubr.msk.bf16.mxu0 %vm3591_vm1, %v3590_v23 }
 0x32a   : > { %698 = vrot.lane.b32.xlu0 %v3947_v25, %s3593_s30  ;;  %702 = vrot.lane.b32.xlu1 %v3947_v25, %s3594_s29 }
 0x32e   : > { %700 = vrot.lane.b32.xlu0 %v3947_v25, %s3592_s23  ;;  %706 = vrot.lane.b32.xlu1 %v3947_v25, %s3595_s27 }
 0x332   : > { %704 = vrot.lane.b32.xlu0 %v3947_v25, %s3596_s28  ;;  %710 = vrot.lane.b32.xlu1 %v3947_v25, %s3597_s26 }
 0x336   : > { %708 = vrot.lane.b32.xlu0 %v3947_v25, %s3598_s15  ;;  %1266 = vrot.lane.b32.xlu1 %v733_v14, %s3600_s24 }
 0x33a   : > { %1220 = vrot.lane.b32.xlu0 %v730_v7, %s3600_s24  ;;  %1312 = vrot.lane.b32.xlu1 %v735_v15, %s3600_s24 }
 0x33e   : > { %1358 = vrot.lane.b32.xlu0 %v737_v17, %s3600_s24  ;;  %1404 = vrot.lane.b32.xlu1 %v739_v18, %s3600_s24 }
 0x342   : > { %1450 = vrot.lane.b32.xlu0 %v741_v19, %s3600_s24  ;;  %1496 = vrot.lane.b32.xlu1 %v743_v20, %s3600_s24 }
 0x380   : > { %v796_v26 = vpop.permute.xlu0 %795  ;;  %v844_v27 = vpop.permute.xlu1 %843 }
 0x381   : > { %v801_v28 = vsel %vm748_vm2, %v796_v26, 0  ;;  %v849_v29 = vsel %vm748_vm2, %v844_v27, 0 }
 0x382   : > { %3006 = vmatpush3.bf16.xpose.msra.mxu1 %v801_v28  ;;  %3012 = vmatpush3.bf16.xpose.msra.mxu0 %v849_v29 }
 0x383   : > { %3017 = vmatprep.subr.bf16.mxu1 %v3590_v23  ;;  %3023 = vmatprep.subr.bf16.mxu0 %v3590_v23 }
 0x384   : > { %v683_v30 = vpop.permute.xlu0 %682  ;;  %v892_v31 = vpop.permute.xlu1 %891 }
 0x385   : > { %v897_v34 = vsel %vm748_vm2, %v892_v31, 0 }
 0x388   : > { %v685_v32 = vpop.permute.xlu0 %684  ;;  %v940_v33 = vpop.permute.xlu1 %939 }
 0x389   : > { %v945_v35 = vsel %vm748_vm2, %v940_v33, 0  ;;  %3008 = vmatmul.mubr.msk.bf16.vlgmr.msra.gmra.mrb[4].mxu1 %vm748_vm2, %v683_v30  ;;  %3014 = vmatmul.mubr.msk.bf16.vlgmr.msra.gmra.mrb[8].mxu0 %vm748_vm2, %v685_v32 }
 0x38a   : > { %3018 = vmatpush3.bf16.xpose.msra.mxu1 %v897_v34  ;;  %3024 = vmatpush3.bf16.xpose.msra.mxu0 %v945_v35 }
 0x38b   : > { %3019 = vmatprep.mubr.msk.bf16.mxu1 %vm3591_vm1, %v3590_v23  ;;  %3025 = vmatprep.mubr.msk.bf16.mxu0 %vm3591_vm1, %v3590_v23 }
 0x38c   : > { %v687_v36 = vpop.permute.xlu0 %686  ;;  %v988_v37 = vpop.permute.xlu1 %987  ;;  %3029 = vmatprep.subr.bf16.mxu1 %v3590_v23  ;;  %3035 = vmatprep.subr.bf16.mxu0 %v3590_v23 }
 0x38d   : > { %v993_v40 = vsel %vm748_vm2, %v988_v37, 0 }
 0x390   : > { %v689_v38 = vpop.permute.xlu0 %688  ;;  %v1036_v39 = vpop.permute.xlu1 %1035 }
 0x391   : > { %v1041_v41 = vsel %vm748_vm2, %v1036_v39, 0  ;;  %3020 = vmatmul.mubr.msk.bf16.vlgmr.msra.gmra.mrb[8].mxu1 %vm748_vm2, %v687_v36  ;;  %3026 = vmatmul.mubr.msk.bf16.vlgmr.msra.gmra.mrb[12].mxu0 %vm748_vm2, %v689_v38 }
 0x392   : > { %3030 = vmatpush3.bf16.xpose.msra.mxu1 %v993_v40  ;;  %3036 = vmatpush3.bf16.xpose.msra.mxu0 %v1041_v41 }
 0x393   : > { %3031 = vmatprep.mubr.msk.bf16.mxu1 %vm3591_vm1, %v3590_v23  ;;  %3037 = vmatprep.mubr.msk.bf16.mxu0 %vm3591_vm1, %v3590_v23 }
 0x394   : > { %v691_v42 = vpop.permute.xlu0 %690  ;;  %v1084_v43 = vpop.permute.xlu1 %1083  ;;  %3041 = vmatprep.subr.bf16.mxu1 %v3590_v23  ;;  %3047 = vmatprep.subr.bf16.mxu0 %v3590_v23 }
 0x395   : > { %v1089_v46 = vsel %vm748_vm2, %v1084_v43, 0 }
 0x398   : > { %v693_v44 = vpop.permute.xlu0 %692  ;;  %v695_v45 = vpop.permute.xlu1 %694 }
 0x399   : > { %3032 = vmatmul.mubr.msk.bf16.vlgmr.msra.gmra.mrb[12].mxu1 %vm748_vm2, %v691_v42  ;;  %3038 = vmatmul.mubr.msk.bf16.vlgmr.msra.gmra.mrb[16].mxu0 %vm748_vm2, %v693_v44 }
 0x39a   : > { %3042 = vmatpush3.bf16.xpose.msra.mxu1 %v1089_v46  ;;  %3043 = vmatprep.mubr.msk.bf16.mxu1 %vm3591_vm1, %v3590_v23 }
 0x39b   : > { %3053 = vmatprep.subr.bf16.mxu1 %v3590_v23  ;;  %3049 = vmatprep.mubr.msk.bf16.mxu0 %vm3591_vm1, %v3590_v23 }
 0x39c   : > { %v4004_v47 = vpop.permute.xlu0 %698  ;;  %v4006_v48 = vpop.permute.xlu1 %702 }
 0x3a0   : > { %v4008_v49 = vpop.permute.xlu0 %700  ;;  %v4010_v50 = vpop.permute.xlu1 %706 }
 0x3a1   : > { %3044 = vmatmul.mubr.msk.bf16.vlgmr.msra.gmra.mrb[16].mxu1 %vm748_vm2, %v695_v45 }
 0x3a2   : > { %3055 = vmatprep.mubr.msk.bf16.mxu1 %vm3591_vm1, %v3590_v23 }
 0x3a4   : > { %v4015_v51 = vpop.permute.xlu0 %704  ;;  %v4017_v52 = vpop.permute.xlu1 %710 }
 0x3a8   : > { %v4019_v53 = vpop.permute.xlu0 %708  ;;  %v1267_v54 = vpop.permute.xlu1 %1266 }
 0x3a9   : > { %3054 = vmatpush3.bf16.msra.mxu1 %v1267_v54 }
 0x3aa   : > { %3065 = vmatprep.subr.bf16.mxu1 %v3590_v23 }
 0x3ac   : > { %v1221_v55 = vpop.permute.xlu0 %1220  ;;  %v1313_v34 = vpop.permute.xlu1 %1312 }
 0x3ad   : > { %3048 = vmatpush3.bf16.msra.mxu0 %v1221_v55 }
 0x3ae   : > { %3059 = vmatprep.subr.bf16.mxu0 %v3590_v23 }
 0x3b0   : > { %v4050_v35 = vpop.permute.xlu1 %1404  ;;  %v1359_v43 = vpop.permute.xlu0 %1358 }
 0x3b4   : > { %v4054_v36 = vpop.permute.xlu1 %1496  ;;  %v1451_v44 = vpop.permute.xlu0 %1450 }
 0x3fa   : > { %v789_v56 = vpop.f32.mrb[4].mxu0 }
 0x3fb   : > { %v3003_v57 = vpop.f32.mrb[5].mxu0  ;;  %v1132_v58 = vsel %vm1131_vm3, %v789_v56, -inf }
 0x3fc   : > { %1133 = vmax.xlane.f32.xlu1 %v1132_v58  ;;  %v792_v59 = vpop.f32.mrb[6].mxu0 }
 0x3fd   : > { %v3004_v60 = vpop.f32.mrb[7].mxu0 }
 0x45c   : > { %v4024_v61 = vpop.f32.mrb[4].mxu1  ;;  %v4026_v62 = vpop.f32.mrb[8].mxu0 }
 0x45d   : > { %v3009_v63 = vpop.f32.mrb[5].mxu1  ;;  %v3015_v0 = vpop.f32.mrb[9].mxu0  ;;  %v1135_v1 = vsel %vm1131_vm3, %v4024_v61, -inf  ;;  %v1138_v2 = vsel %vm1131_vm3, %v4026_v62, -inf }
 0x45e   : > { %v840_v3 = vpop.f32.mrb[6].mxu1  ;;  %1136 = vmax.xlane.f32.xlu0 %v1135_v1  ;;  %1139 = vmax.xlane.f32.xlu1 %v1138_v2  ;;  %v888_v4 = vpop.f32.mrb[10].mxu0 }
 0x45f   : > { %v3010_v5 = vpop.f32.mrb[7].mxu1  ;;  %v3016_v6 = vpop.f32.mrb[11].mxu0 }
 0x464   : > { %v4032_v7 = vpop.f32.mrb[8].mxu1  ;;  %v4034_v9 = vpop.f32.mrb[12].mxu0 }
 0x465   : > { %v3021_v10 = vpop.f32.mrb[9].mxu1  ;;  %v3027_v11 = vpop.f32.mrb[13].mxu0  ;;  %v1141_v12 = vsel %vm1131_vm3, %v4032_v7, -inf  ;;  %v1144_v13 = vsel %vm1131_vm3, %v4034_v9, -inf }
 0x466   : > { %1142 = vmax.xlane.f32.xlu0 %v1141_v12  ;;  %v936_v14 = vpop.f32.mrb[10].mxu1  ;;  %1145 = vmax.xlane.f32.xlu1 %v1144_v13  ;;  %v984_v15 = vpop.f32.mrb[14].mxu0 }
 0x467   : > { %v3022_v16 = vpop.f32.mrb[11].mxu1  ;;  %v3028_v17 = vpop.f32.mrb[15].mxu0 }
 0x46c   : > { %v4040_v18 = vpop.f32.mrb[12].mxu1  ;;  %v4042_v19 = vpop.f32.mrb[16].mxu0 }
 0x46d   : > { %v3033_v20 = vpop.f32.mrb[13].mxu1  ;;  %v3039_v21 = vpop.f32.mrb[17].mxu0  ;;  %v1147_v22 = vsel %vm1131_vm3, %v4040_v18, -inf  ;;  %v1150_v42 = vsel %vm1131_vm3, %v4042_v19, -inf }
 0x46e   : > { %1148 = vmax.xlane.f32.xlu0 %v1147_v22  ;;  %v1032_v26 = vpop.f32.mrb[14].mxu1  ;;  %v1080_v27 = vpop.f32.mrb[18].mxu0 }
 0x46f   : > { %v3034_v28 = vpop.f32.mrb[15].mxu1  ;;  %v3040_v29 = vpop.f32.mrb[19].mxu0 }
 0x474   : > { %v4046_v30 = vpop.f32.mrb[16].mxu1 }
 0x475   : > { %v3045_v31 = vpop.f32.mrb[17].mxu1 }
 0x476   : > { %v1128_v32 = vpop.f32.mrb[18].mxu1 }
 0x477   : > { %1637 = vrot.lane.b32.xlu1 %v3947_v25, %s3599_s17  ;;  %v3046_v33 = vpop.f32.mrb[19].mxu1 }
 0x484   : > { %1542 = vrot.lane.b32.xlu0 %v3939_v24, %s3600_s24  ;;  %v1153_v24 = vsel %vm1131_vm3, %v4046_v30, -inf }
 0x489   : > { %v1134_v37 = vpop.xlane.xlu1 %1133 }
 0x48a   : > { %v1156_v38 = vsub.f32 %v789_v56, %v1134_v37 }
 0x48c   : > { %v1164_v39 = vmul.f32 1.442695, %v1156_v38 }
 0x48e   : > { %3291 = vpow2.f32 %v1164_v39 }
 0x498   : > { %v4056_v40 = vpop.eup %3291 }
 0x499   : > { %v1212_v41 = vpack.c.bf16 %v4056_v40, %v4056_v40 }
 0x49b   : > { %3050 = vmatmul.mubr.msk.bf16.vlgmr.msra.gmra.mrb[20].mxu0 %vm1131_vm3, %v1212_v41  ;;  %1151 = vmax.xlane.f32.xlu1 %v1150_v42 }
 0x49c   : > { %3060 = vmatpush3.bf16.msra.mxu0 %v1313_v34  ;;  %3061 = vmatprep.mubr.msk.bf16.mxu0 %vm3591_vm1, %v3590_v23 }
 0x49d   : > { %3071 = vmatprep.subr.bf16.mxu0 %v3590_v23 }
 0x4a3   : > { %1154 = vmax.xlane.f32.xlu0 %v1153_v24 }
 0x4ac   : > { %1735 = vrot.lane.b32.xlu1 %v4008_v49, %s3599_s17 }
 0x4b0   : > { %1784 = vrot.lane.b32.xlu1 %v4006_v48, %s3599_s17 }
 0x4b4   : > { %1833 = vrot.lane.b32.xlu1 %v4015_v51, %s3599_s17 }
 0x4b8   : > { %1882 = vrot.lane.b32.xlu1 %v4010_v50, %s3599_s17 }
 0x4b9   : > { %1686 = vrot.lane.b32.xlu0 %v4004_v47, %s3599_s17 }
 0x4bc   : > { %1931 = vrot.lane.b32.xlu1 %v4019_v53, %s3599_s17 }
 0x4bd   : > { %716 = vrot.lane.b32.xlu0 %v3914_v8, %s3593_s30  ;;  %s3605_s30 = smov 20  }
 0x4c0   : > { %1980 = vrot.lane.b32.xlu1 %v4017_v52, %s3599_s17 }
 0x4c1   : > { %718 = vrot.lane.b32.xlu0 %v3914_v8, %s3592_s23  ;;  %s3604_s23 = smov 16  }
 0x4c4   : > { %728 = vrot.lane.b32.xlu1 %v3914_v8, %s3597_s26 }
 0x4c5   : > { %720 = vrot.lane.b32.xlu0 %v3914_v8, %s3594_s29  ;;  %s3606_s29 = smov 24  }
 0x4c8   : > { %2247 = vrot.lane.b32.xlu1 %v4004_v47, %s3600_s24 }
 0x4c9   : > { %722 = vrot.lane.b32.xlu0 %v3914_v8, %s3596_s28  ;;  %s4437_s28 = scalar_lea.vmem [#allocation8], %s2857_s22  ;;  %s2906_s22 = sshll.u32 %s3692_s21, 7 }
 0x4ca   : > { %s4461_s17 = scalar_lea.hbm %s4568_s10, %s2906_s22  ;;  %s2697_s12 = sshll.u32 %s4437_s28, 4  ;;  %s2698_s12 = int_to_ptr.vmem [resolvable:$true] %s2697_s12 }
 0x4cc   : > { %2296 = vrot.lane.b32.xlu1 %v4008_v49, %s3600_s24 }
 0x4cd   : > { %724 = vrot.lane.b32.xlu0 %v3914_v8, %s3595_s27  ;;  %s3607_s27 = smov 28  }
 0x4d0   : > { %2345 = vrot.lane.b32.xlu1 %v4006_v48, %s3600_s24 }
 0x4d1   : > { %726 = vrot.lane.b32.xlu0 %v3914_v8, %s3598_s15 }
 0x4d4   : > { %2443 = vrot.lane.b32.xlu1 %v4010_v50, %s3600_s24 }
 0x4d5   : > { %2197 = vrot.lane.b32.xlu0 %v3947_v25, %s3600_s24 }
 0x4d9   : > { %2394 = vrot.lane.b32.xlu0 %v4015_v51, %s3600_s24 }
 0x4eb   : > { %v1137_v45 = vpop.xlane.xlu0 %1136  ;;  %v1140_v46 = vpop.xlane.xlu1 %1139 }
 0x4ec   : > { %v1157_v47 = vsub.f32 %v4024_v61, %v1137_v45  ;;  %v1158_v48 = vsub.f32 %v4026_v62, %v1140_v46 }
 0x4ee   : > { %v1166_v49 = vmul.f32 1.442695, %v1157_v47  ;;  %v1168_v54 = vmul.f32 1.442695, %v1158_v48 }
 0x4f0   : > { %3293 = vpow2.f32 %v1166_v49 }
 0x4f1   : > { %3295 = vpow2.f32 %v1168_v54 }
 0x4f3   : > { %v1143_v55 = vpop.xlane.xlu0 %1142  ;;  %v1146_v50 = vpop.xlane.xlu1 %1145 }
 0x4f4   : > { %v1159_v56 = vsub.f32 %v4032_v7, %v1143_v55  ;;  %v1160_v25 = vsub.f32 %v4034_v9, %v1146_v50 }
 0x4f6   : > { %v1170_v57 = vmul.f32 1.442695, %v1159_v56  ;;  %v1172_v51 = vmul.f32 1.442695, %v1160_v25 }
 0x4f7   : > { %v1638_v9 = vpop.permute.xlu1 %1637 }
 0x4f8   : > { %3297 = vpow2.f32 %v1170_v57  ;;  %v1643_v22 = vsel %vm748_vm2, %v1638_v9, 0 }
 0x4f9   : > { %3299 = vpow2.f32 %v1172_v51 }
 0x4fa   : > { %v4112_v58 = vpop.eup %3293 }
 0x4fb   : > { %v4114_v59 = vpop.eup %3295  ;;  %v1149_v60 = vpop.xlane.xlu0 %1148  ;;  %v1213_v61 = vpack.c.bf16 %v4112_v58, %v4112_v58 }
 0x4fc   : > { %v1161_v62 = vsub.f32 %v4040_v18, %v1149_v60  ;;  %v1214_v63 = vpack.c.bf16 %v4114_v59, %v4114_v59 }
 0x4fd   : > { %3056 = vmatmul.mubr.msk.bf16.vlgmr.msra.gmra.mrb[20].mxu1 %vm1131_vm3, %v1213_v61 }
 0x4fe   : > { %v1174_v0 = vmul.f32 1.442695, %v1161_v62  ;;  %3062 = vmatmul.mubr.msk.bf16.vlgmr.msra.gmra.mrb[24].mxu0 %vm1131_vm3, %v1214_v63  ;;  %3066 = vmatpush3.bf16.msra.mxu1 %v1359_v43 }
 0x4ff   : > { %3072 = vmatpush3.bf16.msra.mxu0 %v4050_v35  ;;  %3067 = vmatprep.mubr.msk.bf16.mxu1 %vm3591_vm1, %v3590_v23  ;;  %v1543_v7 = vpop.permute.xlu0 %1542 }
 0x500   : > { %3301 = vpow2.f32 %v1174_v0  ;;  %3073 = vmatprep.mubr.msk.bf16.mxu0 %vm3591_vm1, %v3590_v23  ;;  %3077 = vmatprep.subr.bf16.mxu1 %v3590_v23 }
 0x501   : > { %3083 = vmatprep.subr.bf16.mxu0 %v3590_v23 }
 0x502   : > { %v4130_v1 = vpop.eup %3297 }
 0x503   : > { %v4132_v2 = vpop.eup %3299  ;;  %v1215_v3 = vpack.c.bf16 %v4130_v1, %v4130_v1 }
 0x504   : > { %v1216_v4 = vpack.c.bf16 %v4132_v2, %v4132_v2 }
 0x505   : > { %3068 = vmatmul.mubr.msk.bf16.vlgmr.msra.gmra.mrb[24].mxu1 %vm1131_vm3, %v1215_v3 }
 0x506   : > { %3074 = vmatmul.mubr.msk.bf16.vlgmr.msra.gmra.mrb[28].mxu0 %vm1131_vm3, %v1216_v4  ;;  %3078 = vmatpush3.bf16.msra.mxu1 %v1451_v44 }
 0x507   : > { %3084 = vmatpush3.bf16.msra.mxu0 %v4054_v36  ;;  %3079 = vmatprep.mubr.msk.bf16.mxu1 %vm3591_vm1, %v3590_v23 }
 0x508   : > { %3089 = vmatprep.subr.bf16.mxu1 %v3590_v23  ;;  %3085 = vmatprep.mubr.msk.bf16.mxu0 %vm3591_vm1, %v3590_v23 }
 0x509   : > { %3095 = vmatprep.subr.bf16.mxu0 %v3590_v23 }
 0x50a   : > { %v4147_v5 = vpop.eup %3301 }
 0x50b   : > { %v1217_v6 = vpack.c.bf16 %v4147_v5, %v4147_v5 }
 0x50d   : > { %3080 = vmatmul.mubr.msk.bf16.vlgmr.msra.gmra.mrb[28].mxu1 %vm1131_vm3, %v1217_v6 }
 0x50e   : > { %3090 = vmatpush3.bf16.msra.mxu1 %v1543_v7  ;;  %3091 = vmatprep.mubr.msk.bf16.mxu1 %vm3591_vm1, %v3590_v23 }
 0x50f   : > { %3101 = vmatprep.subr.bf16.mxu1 %v3590_v23 }
 0x528   : > { %v1152_v10 = vpop.xlane.xlu1 %1151 }
 0x529   : > { %v1162_v11 = vsub.f32 %v4042_v19, %v1152_v10 }
 0x52b   : > { %v1176_v12 = vmul.f32 1.442695, %v1162_v11 }
 0x52c   : > { %v1736_v17 = vpop.permute.xlu1 %1735 }
 0x52d   : > { %3303 = vpow2.f32 %v1176_v12  ;;  %v1741_v31 = vsel %vm748_vm2, %v1736_v17, 0 }
 0x530   : > { %v1155_v13 = vpop.xlane.xlu0 %1154  ;;  %v1785_v19 = vpop.permute.xlu1 %1784 }
 0x531   : > { %v1163_v14 = vsub.f32 %v4046_v30, %v1155_v13  ;;  %v1790_v35 = vsel %vm748_vm2, %v1785_v19, 0 }
 0x533   : > { %v1178_v15 = vmul.f32 1.442695, %v1163_v14 }
 0x534   : > { %v1687_v16 = vpop.permute.xlu0 %1686  ;;  %v1834_v30 = vpop.permute.xlu1 %1833 }
 0x535   : > { %3305 = vpow2.f32 %v1178_v15  ;;  %v1692_v32 = vsel %vm748_vm2, %v1687_v16, 0  ;;  %v1839_v36 = vsel %vm748_vm2, %v1834_v30, 0 }
 0x537   : > { %v4157_v18 = vpop.eup %3303 }
 0x538   : > { %v717_v20 = vpop.permute.xlu0 %716  ;;  %v1218_v21 = vpack.c.bf16 %v4157_v18, %v4157_v18  ;;  %v1883_v34 = vpop.permute.xlu1 %1882 }
 0x539   : > { %v1888_v39 = vsel %vm748_vm2, %v1883_v34, 0 }
 0x53a   : > { %3086 = vmatmul.mubr.msk.bf16.vlgmr.msra.gmra.mrb[32].mxu0 %vm1131_vm3, %v1218_v21 }
 0x53b   : > { %3096 = vmatpush3.bf16.xpose.msra.mxu0 %v1643_v22  ;;  %3097 = vmatprep.mubr.msk.bf16.mxu0 %vm3591_vm1, %v3590_v23 }
 0x53c   : > { %v719_v26 = vpop.permute.xlu0 %718  ;;  %3107 = vmatprep.subr.bf16.mxu0 %v3590_v23  ;;  %v1932_v37 = vpop.permute.xlu1 %1931 }
 0x53d   : > { %v1937_v41 = vsel %vm748_vm2, %v1932_v37, 0 }
 0x53f   : > { %v4166_v27 = vpop.eup %3305 }
 0x540   : > { %v721_v28 = vpop.permute.xlu0 %720  ;;  %v1219_v29 = vpack.c.bf16 %v4166_v27, %v4166_v27  ;;  %v1981_v42 = vpop.permute.xlu1 %1980 }
 0x541   : > { %v1986_v44 = vsel %vm748_vm2, %v1981_v42, 0 }
 0x542   : > { %3092 = vmatmul.mubr.msk.bf16.vlgmr.msra.gmra.mrb[32].mxu1 %vm1131_vm3, %v1219_v29  ;;  %3098 = vmatmul.mubr.msk.bf16.vlgmr.msra.gmra.mrb[36].mxu0 %vm748_vm2, %v3914_v8 }
 0x543   : > { %3102 = vmatpush3.bf16.xpose.msra.mxu1 %v1692_v32  ;;  %3108 = vmatpush3.bf16.xpose.msra.mxu0 %v1741_v31 }
 0x544   : > { %3103 = vmatprep.mubr.msk.bf16.mxu1 %vm3591_vm1, %v3590_v23  ;;  %3109 = vmatprep.mubr.msk.bf16.mxu0 %vm3591_vm1, %v3590_v23  ;;  %v723_v33 = vpop.permute.xlu0 %722  ;;  %v729_v43 = vpop.permute.xlu1 %728 }
 0x545   : > { %3113 = vmatprep.subr.bf16.mxu1 %v3590_v23  ;;  %3119 = vmatprep.subr.bf16.mxu0 %v3590_v23 }
 0x548   : > { %v725_v8 = vpop.permute.xlu0 %724  ;;  %v2248_v46 = vpop.permute.xlu1 %2247 }
 0x549   : > { %v2253_v47 = vsel %vm2202_vm4, %v2248_v46, 0 }
 0x54a   : > { %3104 = vmatmul.mubr.msk.bf16.vlgmr.msra.gmra.mrb[36].mxu1 %vm748_vm2, %v717_v20  ;;  %3110 = vmatmul.mubr.msk.bf16.vlgmr.msra.gmra.mrb[40].mxu0 %vm748_vm2, %v719_v26 }
 0x54b   : > { %3114 = vmatpush3.bf16.xpose.msra.mxu1 %v1790_v35  ;;  %3120 = vmatpush3.bf16.xpose.msra.mxu0 %v1839_v36 }
 0x54c   : > { %3115 = vmatprep.mubr.msk.bf16.mxu1 %vm3591_vm1, %v3590_v23  ;;  %3121 = vmatprep.mubr.msk.bf16.mxu0 %vm3591_vm1, %v3590_v23  ;;  %v727_v38 = vpop.permute.xlu0 %726 }
 0x54d   : > { %3125 = vmatprep.subr.bf16.mxu1 %v3590_v23  ;;  %3131 = vmatprep.subr.bf16.mxu0 %v3590_v23 }
 0x550   : > { %v2198_v24 = vpop.permute.xlu0 %2197 }
 0x551   : > { %v2204_v45 = vsel %vm2202_vm4, %v2198_v24, 0 }
 0x552   : > { %3116 = vmatmul.mubr.msk.bf16.vlgmr.msra.gmra.mrb[40].mxu1 %vm748_vm2, %v721_v28  ;;  %3122 = vmatmul.mubr.msk.bf16.vlgmr.msra.gmra.mrb[44].mxu0 %vm748_vm2, %v723_v33 }
 0x553   : > { %3126 = vmatpush3.bf16.xpose.msra.mxu1 %v1888_v39  ;;  %3132 = vmatpush3.bf16.xpose.msra.mxu0 %v1937_v41 }
 0x554   : > { %3127 = vmatprep.mubr.msk.bf16.mxu1 %vm3591_vm1, %v3590_v23  ;;  %3133 = vmatprep.mubr.msk.bf16.mxu0 %vm3591_vm1, %v3590_v23 }
 0x555   : > { %3137 = vmatprep.subr.bf16.mxu1 %v3590_v23  ;;  %3143 = vmatprep.subr.bf16.mxu0 %v3590_v23 }
 0x55a   : > { %3128 = vmatmul.mubr.msk.bf16.vlgmr.msra.gmra.mrb[44].mxu1 %vm748_vm2, %v725_v8  ;;  %3134 = vmatmul.mubr.msk.bf16.vlgmr.msra.gmra.mrb[48].mxu0 %vm748_vm2, %v727_v38 }
 0x55b   : > { %3138 = vmatpush3.bf16.xpose.msra.mxu1 %v1986_v44  ;;  %3144 = vmatpush3.bf16.msra.mxu0 %v2204_v45 }
 0x55c   : > { %3139 = vmatprep.mubr.msk.bf16.mxu1 %vm3591_vm1, %v3590_v23  ;;  %3149 = vmatprep.subr.bf16.mxu1 %v3590_v23 }
 0x55d   : > { %3145 = vmatprep.mubr.msk.bf16.mxu0 %vm3591_vm1, %v3590_v23  ;;  %3155 = vmatprep.subr.bf16.mxu0 %v3590_v23 }
 0x562   : > { %3140 = vmatmul.mubr.msk.bf16.vlgmr.msra.gmra.mrb[48].mxu1 %vm748_vm2, %v729_v43 }
 0x563   : > { %3150 = vmatpush3.bf16.msra.mxu1 %v2253_v47  ;;  %3151 = vmatprep.mubr.msk.bf16.mxu1 %vm3591_vm1, %v3590_v23 }
 0x564   : > { %3161 = vmatprep.subr.bf16.mxu1 %v3590_v23 }
 0x56e   : > { %v4216_v48 = vpop.f32.mrb[20].mxu0 }
 0x56f   : > { %v3051_v49 = vpop.f32.mrb[21].mxu0 }
 0x570   : > { %v1263_v54 = vpop.f32.mrb[22].mxu0 }
 0x571   : > { %v3052_v55 = vpop.f32.mrb[23].mxu0 }
 0x5d0   : > { %v4218_v50 = vpop.f32.mrb[20].mxu1 }
 0x5d1   : > { %v4220_v56 = vpop.f32.mrb[24].mxu0  ;;  %v3057_v25 = vpop.f32.mrb[21].mxu1 }
 0x5d2   : > { %v3063_v57 = vpop.f32.mrb[25].mxu0  ;;  %v1309_v51 = vpop.f32.mrb[22].mxu1 }
 0x5d3   : > { %v1355_v60 = vpop.f32.mrb[26].mxu0  ;;  %v3058_v61 = vpop.f32.mrb[23].mxu1 }
 0x5d4   : > { %v3064_v62 = vpop.f32.mrb[27].mxu0 }
 0x5d8   : > { %v4222_v63 = vpop.f32.mrb[24].mxu1 }
 0x5d9   : > { %v4224_v0 = vpop.f32.mrb[28].mxu0  ;;  %v3069_v3 = vpop.f32.mrb[25].mxu1 }
 0x5da   : > { %v3075_v4 = vpop.f32.mrb[29].mxu0  ;;  %v1401_v6 = vpop.f32.mrb[26].mxu1 }
 0x5db   : > { %v1447_v7 = vpop.f32.mrb[30].mxu0  ;;  %v3070_v9 = vpop.f32.mrb[27].mxu1 }
 0x5dc   : > { %v3076_v10 = vpop.f32.mrb[31].mxu0 }
 0x5e0   : > { %v4226_v11 = vpop.f32.mrb[28].mxu1 }
 0x5e1   : > { %v3081_v12 = vpop.f32.mrb[29].mxu1 }
 0x5e2   : > { %v1493_v13 = vpop.f32.mrb[30].mxu1 }
 0x5e3   : > { %v3082_v14 = vpop.f32.mrb[31].mxu1 }
 0x60d   : > { %v4228_v15 = vpop.f32.mrb[32].mxu0 }
 0x60e   : > { %v3087_v16 = vpop.f32.mrb[33].mxu0 }
 0x60f   : > { %v1539_v17 = vpop.f32.mrb[34].mxu0 }
 0x610   : > { %v3088_v20 = vpop.f32.mrb[35].mxu0 }
 0x615   : > { %v4230_v21 = vpop.f32.mrb[32].mxu1  ;;  %v4232_v22 = vpop.f32.mrb[36].mxu0 }
 0x616   : > { %v3093_v19 = vpop.f32.mrb[33].mxu1  ;;  %v3099_v26 = vpop.f32.mrb[37].mxu0  ;;  %v2029_v28 = vsel %vm1625_vm5, %v4232_v22, -inf }
 0x617   : > { %v1585_v29 = vpop.f32.mrb[34].mxu1  ;;  %2030 = vmax.xlane.f32.xlu0 %v2029_v28  ;;  %v4236_v30 = vpop.f32.mrb[38].mxu0 }
 0x618   : > { %v3094_v31 = vpop.f32.mrb[35].mxu1  ;;  %v3100_v32 = vpop.f32.mrb[39].mxu0  ;;  %v2032_v33 = vsel %vm1625_vm5, %v4236_v30, -inf }
 0x619   : > { %2033 = vmax.xlane.f32.xlu1 %v2032_v33  ;;  %v1192_v33 = vsel %vm1131_vm3, %v4132_v2, 0.0  ;;  %v2297_v2 = vpop.permute.xlu1 %2296 }
 0x61d   : > { %v4240_v34 = vpop.f32.mrb[36].mxu1  ;;  %v4242_v35 = vpop.f32.mrb[40].mxu0 }
 0x61e   : > { %v3105_v36 = vpop.f32.mrb[37].mxu1  ;;  %v3111_v8 = vpop.f32.mrb[41].mxu0  ;;  %v2035_v37 = vsel %vm1625_vm5, %v4240_v34, -inf  ;;  %v2041_v43 = vsel %vm1625_vm5, %v4242_v35, -inf }
 0x61f   : > { %v4246_v38 = vpop.f32.mrb[38].mxu1  ;;  %2036 = vmax.xlane.f32.xlu0 %v2035_v37  ;;  %v4248_v39 = vpop.f32.mrb[42].mxu0  ;;  %v1183_v36 = vsel %vm1131_vm3, %v4112_v58, 0.0  ;;  %v1198_v8 = vsel %vm1131_vm3, %v4157_v18, 0.0  ;;  %v1186_v37 = vsel %vm1131_vm3, %v4114_v59, 0.0  ;;  %v1201_v58 = vsel %vm1131_vm3, %v4166_v27, 0.0 }
 0x620   : > { %v3106_v41 = vpop.f32.mrb[39].mxu1  ;;  %v3112_v42 = vpop.f32.mrb[43].mxu0  ;;  %v2044_v24 = vsel %vm1625_vm5, %v4248_v39, -inf  ;;  %v2038_v49 = vsel %vm1625_vm5, %v4246_v38, -inf }
 0x621   : > { %2045 = vmax.xlane.f32.xlu1 %v2044_v24  ;;  %v4314_v41 = vpop.permute.xlu1 %2345  ;;  %v4316_v18 = vpop.permute.xlu0 %2394 }
 0x623   : > { %2042 = vmax.xlane.f32.xlu0 %v2041_v43 }
 0x625   : > { %v4254_v44 = vpop.f32.mrb[40].mxu1  ;;  %v4256_v45 = vpop.f32.mrb[44].mxu0 }
 0x626   : > { %v3117_v46 = vpop.f32.mrb[41].mxu1  ;;  %v3123_v47 = vpop.f32.mrb[45].mxu0  ;;  %v2047_v60 = vsel %vm1625_vm5, %v4254_v44, -inf  ;;  %v2053_v7 = vsel %vm1625_vm5, %v4256_v45, -inf }
 0x627   : > { %2039 = vmax.xlane.f32.xlu0 %v2038_v49  ;;  %v4260_v54 = vpop.f32.mrb[42].mxu1  ;;  %v4262_v55 = vpop.f32.mrb[46].mxu0 }
 0x628   : > { %v3118_v25 = vpop.f32.mrb[43].mxu1  ;;  %v3124_v57 = vpop.f32.mrb[47].mxu0  ;;  %v2050_v51 = vsel %vm1625_vm5, %v4260_v54, -inf  ;;  %v2056_v61 = vsel %vm1625_vm5, %v4262_v55, -inf }
 0x629   : > { %2051 = vmax.xlane.f32.xlu1 %v2050_v51  ;;  %v4318_v42 = vpop.permute.xlu1 %2443 }
 0x62b   : > { %2048 = vmax.xlane.f32.xlu0 %v2047_v60 }
 0x62d   : > { %2057 = vmax.xlane.f32.xlu1 %v2056_v61  ;;  %v4270_v62 = vpop.f32.mrb[44].mxu1  ;;  %v4272_v3 = vpop.f32.mrb[48].mxu0 }
 0x62e   : > { %v3129_v4 = vpop.f32.mrb[45].mxu1  ;;  %v3135_v6 = vpop.f32.mrb[49].mxu0  ;;  %v2059_v16 = vsel %vm1625_vm5, %v4270_v62, -inf  ;;  %v2065_v26 = vsel %vm1625_vm5, %v4272_v3, -inf }
 0x62f   : > { %2054 = vmax.xlane.f32.xlu0 %v2053_v7  ;;  %v4276_v9 = vpop.f32.mrb[46].mxu1  ;;  %v4278_v10 = vpop.f32.mrb[50].mxu0 }
 0x630   : > { %v3130_v12 = vpop.f32.mrb[47].mxu1  ;;  %v3136_v13 = vpop.f32.mrb[51].mxu0  ;;  %v2062_v14 = vsel %vm1625_vm5, %v4276_v9, -inf  ;;  %v2068_v17 = vsel %vm1625_vm5, %v4278_v10, -inf }
 0x631   : > { %2063 = vmax.xlane.f32.xlu1 %v2062_v14  ;;  %v2302_v14 = vsel %vm2202_vm4, %v2297_v2, 0 }
 0x633   : > { %2060 = vmax.xlane.f32.xlu0 %v2059_v16 }
 0x635   : > { %2069 = vmax.xlane.f32.xlu1 %v2068_v17  ;;  %v4286_v20 = vpop.f32.mrb[48].mxu1 }
 0x636   : > { %v3141_v19 = vpop.f32.mrb[49].mxu1  ;;  %v2071_v32 = vsel %vm1625_vm5, %v4286_v20, -inf }
 0x637   : > { %2066 = vmax.xlane.f32.xlu0 %v2065_v26  ;;  %v4290_v28 = vpop.f32.mrb[50].mxu1 }
 0x638   : > { %v3142_v29 = vpop.f32.mrb[51].mxu1  ;;  %v2074_v31 = vsel %vm1625_vm5, %v4290_v28, -inf }
 0x639   : > { %2075 = vmax.xlane.f32.xlu1 %v2074_v31 }
 0x63b   : > { %2072 = vmax.xlane.f32.xlu0 %v2071_v32 }
 0x64a   : > { %2541 = vrot.lane.b32.xlu1 %v4017_v52, %s3600_s24  ;;  %v1189_v52 = vsel %vm1131_vm3, %v4130_v1, 0.0 }
 0x651   : > { %2492 = vrot.lane.b32.xlu0 %v4019_v53, %s3600_s24  ;;  %v1195_v53 = vsel %vm1131_vm3, %v4147_v5, 0.0  ;;  %s3475_s24 = scalar_lea.vmem %s2698_s12, 128 }
 0x652   : > { %p3476_p3 = scmp.ne.s32.totalorder %s2698_s12, %s3475_s24 }
 0x654   : > { %p3477_p7 = pnand %p3476_p3, %p3762_p12 }
 0x656   : > { %p3478_p9 = pneg %p3477_p7 }
 0x66e   : > { %1193 = vadd.xlane.f32.xlu1 %v1192_v33 }
 0x670   : > { %1184 = vadd.xlane.f32.xlu0 %v1183_v36 }
 0x672   : > { %1199 = vadd.xlane.f32.xlu1 %v1198_v8 }
 0x674   : > { %1187 = vadd.xlane.f32.xlu0 %v1186_v37 }
 0x678   : > { %1190 = vadd.xlane.f32.xlu0 %v1189_v52 }
 0x67c   : > { %1196 = vadd.xlane.f32.xlu0 %v1195_v53 }
 0x680   : > { %1202 = vadd.xlane.f32.xlu0 %v1201_v58 }
 0x6a4   : > { %v2031_v59 = vpop.xlane.xlu0 %2030 }
 0x6a5   : > { %v2077_v24 = vsub.f32 %v4232_v22, %v2031_v59 }
 0x6a6   : > { %v2034_v1 = vpop.xlane.xlu1 %2033 }
 0x6a7   : > { %v2093_v43 = vmul.f32 1.442695, %v2077_v24  ;;  %v2078_v46 = vsub.f32 %v4236_v30, %v2034_v1 }
 0x6a9   : > { %v2095_v5 = vmul.f32 1.442695, %v2078_v46  ;;  %3307 = vpow2.f32 %v2093_v43 }
 0x6ab   : > { %3309 = vpow2.f32 %v2095_v5 }
 0x6ac   : > { %v2037_v47 = vpop.xlane.xlu0 %2036 }
 0x6ad   : > { %v2079_v27 = vsub.f32 %v4240_v34, %v2037_v47 }
 0x6ae   : > { %v2046_v49 = vpop.xlane.xlu1 %2045 }
 0x6af   : > { %v2097_v25 = vmul.f32 1.442695, %v2079_v27  ;;  %v2082_v57 = vsub.f32 %v4248_v39, %v2046_v49 }
 0x6b0   : > { %v2043_v51 = vpop.xlane.xlu0 %2042 }
 0x6b1   : > { %3311 = vpow2.f32 %v2097_v25  ;;  %v2103_v60 = vmul.f32 1.442695, %v2082_v57  ;;  %v2081_v61 = vsub.f32 %v4242_v35, %v2043_v51  ;;  %v2351_v25 = vsel %vm2202_vm4, %v4314_v41, 0 }
 0x6b3   : > { %3313 = vpow2.f32 %v2103_v60  ;;  %v2101_v22 = vmul.f32 1.442695, %v2081_v61  ;;  %v4325_v4 = vpop.eup %3307 }
 0x6b4   : > { %v2040_v30 = vpop.xlane.xlu0 %2039 }
 0x6b5   : > { %v4327_v6 = vpop.eup %3309  ;;  %3315 = vpow2.f32 %v2101_v22  ;;  %v2080_v7 = vsub.f32 %v4246_v38, %v2040_v30 }
 0x6b6   : > { %v2052_v34 = vpop.xlane.xlu1 %2051  ;;  %v2189_v12 = vpack.c.bf16 %v4327_v6, %v4325_v4 }
 0x6b7   : > { %v2099_v39 = vmul.f32 1.442695, %v2080_v7  ;;  %v2084_v13 = vsub.f32 %v4260_v54, %v2052_v34 }
 0x6b8   : > { %v2049_v35 = vpop.xlane.xlu0 %2048  ;;  %3146 = vmatmul.mubr.msk.bf16.vlgmr.msra.gmra.mrb[52].mxu0 %vm1625_vm5, %v2189_v12 }
 0x6b9   : > { %3317 = vpow2.f32 %v2099_v39  ;;  %v2107_v16 = vmul.f32 1.442695, %v2084_v13  ;;  %v2083_v17 = vsub.f32 %v4254_v44, %v2049_v35  ;;  %3156 = vmatpush3.bf16.msra.mxu0 %v2302_v14  ;;  %3157 = vmatprep.mubr.msk.bf16.mxu0 %vm3591_vm1, %v3590_v23 }
 0x6ba   : > { %v2058_v38 = vpop.xlane.xlu1 %2057  ;;  %3167 = vmatprep.subr.bf16.mxu0 %v3590_v23 }
 0x6bb   : > { %v3312_v19 = vpop.eup %3311  ;;  %v2105_v26 = vmul.f32 1.442695, %v2083_v17  ;;  %v2086_v54 = vsub.f32 %v4262_v55, %v2058_v38  ;;  %3319 = vpow2.f32 %v2107_v16  ;;  %v2449_v17 = vsel %vm2202_vm4, %v4318_v42, 0 }
 0x6bc   : > { %v2055_v29 = vpop.xlane.xlu0 %2054  ;;  %v2131_v31 = vsel %vm1625_vm5, %v3312_v19, 0.0 }
 0x6bd   : > { %v3314_v32 = vpop.eup %3313  ;;  %3321 = vpow2.f32 %v2105_v26  ;;  %v2111_v33 = vmul.f32 1.442695, %v2086_v54  ;;  %v2085_v44 = vsub.f32 %v4256_v45, %v2055_v29  ;;  %2132 = vadd.xlane.f32.xlu1 %v2131_v31  ;;  %v2400_v45 = vsel %vm2202_vm4, %v4316_v18, 0 }
 0x6be   : > { %v2064_v36 = vpop.xlane.xlu1 %2063  ;;  %v2140_v55 = vsel %vm1625_vm5, %v3314_v32, 0.0 }
 0x6bf   : > { %v3316_v8 = vpop.eup %3315  ;;  %3323 = vpow2.f32 %v2111_v33  ;;  %v2109_v37 = vmul.f32 1.442695, %v2085_v44  ;;  %v2088_v52 = vsub.f32 %v4276_v9, %v2064_v36 }
 0x6c0   : > { %v2061_v53 = vpop.xlane.xlu0 %2060  ;;  %v2137_v58 = vsel %vm1625_vm5, %v3316_v8, 0.0  ;;  %v2191_v2 = vpack.c.bf16 %v3314_v32, %v3316_v8 }
 0x6c1   : > { %3325 = vpow2.f32 %v2109_v37  ;;  %v2115_v59 = vmul.f32 1.442695, %v2088_v52  ;;  %v2087_v24 = vsub.f32 %v4270_v62, %v2061_v53  ;;  %2138 = vadd.xlane.f32.xlu0 %v2137_v58  ;;  %2141 = vadd.xlane.f32.xlu1 %v2140_v55  ;;  %v1180_v58 = vsel %vm1131_vm3, %v4056_v40, 0.0 }
 0x6c2   : > { %3158 = vmatmul.mubr.msk.bf16.vlgmr.msra.gmra.mrb[56].mxu0 %vm1625_vm5, %v2191_v2  ;;  %v2070_v1 = vpop.xlane.xlu1 %2069  ;;  %v2128_v2 = vsel %vm1625_vm5, %v4327_v6, 0.0 }
 0x6c3   : > { %v3318_v43 = vpop.eup %3317  ;;  %v2113_v9 = vmul.f32 1.442695, %v2087_v24  ;;  %3168 = vmatpush3.bf16.msra.mxu0 %v2400_v45  ;;  %v2090_v46 = vsub.f32 %v4278_v10, %v2070_v1  ;;  %3169 = vmatprep.mubr.msk.bf16.mxu0 %vm3591_vm1, %v3590_v23  ;;  %3327 = vpow2.f32 %v2115_v59 }
 0x6c4   : > { %v2067_v5 = vpop.xlane.xlu0 %2066  ;;  %v2134_v62 = vsel %vm1625_vm5, %v3318_v43, 0.0  ;;  %v2190_v47 = vpack.c.bf16 %v3318_v43, %v3312_v19  ;;  %3179 = vmatprep.subr.bf16.mxu0 %v3590_v23 }
 0x6c5   : > { %3329 = vpow2.f32 %v2113_v9  ;;  %v2119_v18 = vmul.f32 1.442695, %v2090_v46  ;;  %v2089_v27 = vsub.f32 %v4272_v3, %v2067_v5  ;;  %2135 = vadd.xlane.f32.xlu0 %v2134_v62  ;;  %v3320_v49 = vpop.eup %3319 }
 0x6c6   : > { %3152 = vmatmul.mubr.msk.bf16.vlgmr.msra.gmra.mrb[52].mxu1 %vm1625_vm5, %v2190_v47  ;;  %v2076_v10 = vpop.xlane.xlu1 %2075  ;;  %v2146_v38 = vsel %vm1625_vm5, %v3320_v49, 0.0 }
 0x6c7   : > { %v3322_v57 = vpop.eup %3321  ;;  %3331 = vpow2.f32 %v2119_v18  ;;  %v2117_v51 = vmul.f32 1.442695, %v2089_v27  ;;  %3162 = vmatpush3.bf16.msra.mxu1 %v2351_v25  ;;  %v2092_v60 = vsub.f32 %v4290_v28, %v2076_v10  ;;  %3163 = vmatprep.mubr.msk.bf16.mxu1 %vm3591_vm1, %v3590_v23 }
 0x6c8   : > { %v2073_v61 = vpop.xlane.xlu0 %2072  ;;  %v2143_v3 = vsel %vm1625_vm5, %v3322_v57, 0.0  ;;  %3173 = vmatprep.subr.bf16.mxu1 %v3590_v23  ;;  %v2192_v22 = vpack.c.bf16 %v3320_v49, %v3322_v57 }
 0x6c9   : > { %v3324_v30 = vpop.eup %3323  ;;  %3333 = vpow2.f32 %v2117_v51  ;;  %v2123_v41 = vmul.f32 1.442695, %v2092_v60  ;;  %v2091_v7 = vsub.f32 %v4286_v20, %v2073_v61  ;;  %2144 = vadd.xlane.f32.xlu1 %v2143_v3 }
 0x6ca   : > { %v2152_v13 = vsel %vm1625_vm5, %v3324_v30, 0.0  ;;  %v2542_v29 = vpop.permute.xlu1 %2541 }
 0x6cb   : > { %v3326_v34 = vpop.eup %3325  ;;  %v2121_v12 = vmul.f32 1.442695, %v2091_v7  ;;  %3335 = vpow2.f32 %v2123_v41  ;;  %v2547_v36 = vsel %vm2202_vm4, %v2542_v29, 0 }
 0x6cc   : > { %v2493_v39 = vpop.permute.xlu0 %2492  ;;  %v2149_v28 = vsel %vm1625_vm5, %v3326_v34, 0.0  ;;  %v2193_v14 = vpack.c.bf16 %v3324_v30, %v3326_v34 }
 0x6cd   : > { %3337 = vpow2.f32 %v2121_v12  ;;  %v2498_v35 = vsel %vm2202_vm4, %v2493_v39, 0  ;;  %2150 = vadd.xlane.f32.xlu0 %v2149_v28  ;;  %2153 = vadd.xlane.f32.xlu1 %v2152_v13  ;;  %v3328_v16 = vpop.eup %3327 }
 0x6ce   : > { %3164 = vmatmul.mubr.msk.bf16.vlgmr.msra.gmra.mrb[56].mxu1 %vm1625_vm5, %v2192_v22  ;;  %3170 = vmatmul.mubr.msk.bf16.vlgmr.msra.gmra.mrb[60].mxu0 %vm1625_vm5, %v2193_v14  ;;  %v2158_v37 = vsel %vm1625_vm5, %v3328_v16, 0.0 }
 0x6cf   : > { %v3330_v20 = vpop.eup %3329  ;;  %3174 = vmatpush3.bf16.msra.mxu1 %v2449_v17  ;;  %3180 = vmatpush3.bf16.msra.mxu0 %v2498_v35 }
 0x6d0   : > { %v2155_v19 = vsel %vm1625_vm5, %v3330_v20, 0.0  ;;  %3175 = vmatprep.mubr.msk.bf16.mxu1 %vm3591_vm1, %v3590_v23  ;;  %3185 = vmatprep.subr.bf16.mxu1 %v3590_v23  ;;  %v2194_v26 = vpack.c.bf16 %v3328_v16, %v3330_v20 }
 0x6d1   : > { %v3332_v54 = vpop.eup %3331  ;;  %2147 = vadd.xlane.f32.xlu0 %v2146_v38  ;;  %2156 = vadd.xlane.f32.xlu1 %v2155_v19 }
 0x6d2   : > { %3181 = vmatprep.mubr.msk.bf16.mxu0 %vm3591_vm1, %v3590_v23  ;;  %v2164_v32 = vsel %vm1625_vm5, %v3332_v54, 0.0 }
 0x6d3   : > { %v3334_v42 = vpop.eup %3333 }
 0x6d4   : > { %v2161_v31 = vsel %vm1625_vm5, %v3334_v42, 0.0  ;;  %v2195_v33 = vpack.c.bf16 %v3332_v54, %v3334_v42 }
 0x6d5   : > { %2162 = vadd.xlane.f32.xlu0 %v2161_v31  ;;  %2165 = vadd.xlane.f32.xlu1 %v2164_v32  ;;  %v3336_v44 = vpop.eup %3335 }
 0x6d6   : > { %3176 = vmatmul.mubr.msk.bf16.vlgmr.msra.gmra.mrb[60].mxu1 %vm1625_vm5, %v2194_v26  ;;  %3182 = vmatmul.mubr.msk.bf16.vlgmr.msra.gmra.mrb[64].mxu0 %vm1625_vm5, %v2195_v33  ;;  %v2170_v55 = vsel %vm1625_vm5, %v3336_v44, 0.0 }
 0x6d7   : > { %v3338_v8 = vpop.eup %3337  ;;  %3186 = vmatpush3.bf16.msra.mxu1 %v2547_v36  ;;  %3187 = vmatprep.mubr.msk.bf16.mxu1 %vm3591_vm1, %v3590_v23  ;;  %v2125_v23 = vsel %vm1625_vm5, %v4325_v4, 0.0 }
 0x6d8   : > { %v2167_v52 = vsel %vm1625_vm5, %v3338_v8, 0.0  ;;  %v2196_v53 = vpack.c.bf16 %v3336_v44, %v3338_v8 }
 0x6d9   : > { %2159 = vadd.xlane.f32.xlu0 %v2158_v37  ;;  %2168 = vadd.xlane.f32.xlu1 %v2167_v52 }
 0x6dd   : > { %1181 = vadd.xlane.f32.xlu1 %v1180_v58  ;;  %2171 = vadd.xlane.f32.xlu0 %v2170_v55 }
 0x6de   : > { %3188 = vmatmul.mubr.msk.bf16.vlgmr.msra.gmra.mrb[64].mxu1 %vm1625_vm5, %v2196_v53 }
 0x6e1   : > { %2129 = vadd.xlane.f32.xlu1 %v2128_v2  ;;  %2126 = vadd.xlane.f32.xlu0 %v2125_v23 }
 0x6fb   : > { %v1194_v24 = vpop.xlane.xlu1 %1193 }
 0x6fd   : > { %v1185_v59 = vpop.xlane.xlu0 %1184 }
 0x6fe   : > { %3339 = vrcp.f32 %v1185_v59 }
 0x6ff   : > { %v1200_v40 = vpop.xlane.xlu1 %1199 }
 0x701   : > { %v1188_v45 = vpop.xlane.xlu0 %1187 }
 0x702   : > { %3341 = vrcp.f32 %v1188_v45 }
 0x703   : > { %3343 = vrcp.f32 %v1194_v24 }
 0x705   : > { %v1191_v1 = vpop.xlane.xlu0 %1190 }
 0x706   : > { %3345 = vrcp.f32 %v1191_v1 }
 0x707   : > { %3347 = vrcp.f32 %v1200_v40 }
 0x708   : > { %v3340_v43 = vpop.eup %3339 }
 0x709   : > { %v1197_v9 = vpop.xlane.xlu0 %1196  ;;  %v1589_v46 = vmul.f32 %v3340_v43, %v4218_v50 }
 0x70a   : > { %3349 = vrcp.f32 %v1197_v9 }
 0x70b   : > { %1597 = vrot.lane.b32.xlu0 %v1589_v46, %s3601_s0 }
 0x70c   : > { %v3342_v4 = vpop.eup %3341 }
 0x70d   : > { %v1203_v6 = vpop.xlane.xlu0 %1202  ;;  %v1590_v5 = vmul.f32 %v3342_v4, %v4220_v56  ;;  %v3344_v62 = vpop.eup %3343 }
 0x70e   : > { %3351 = vrcp.f32 %v1203_v6  ;;  %v1592_v27 = vmul.f32 %v3344_v62, %v4224_v0 }
 0x70f   : > { %1601 = vrot.lane.b32.xlu1 %v1590_v5, %s3602_s25 }
 0x710   : > { %v3346_v47 = vpop.eup %3345 }
 0x711   : > { %v1591_v18 = vmul.f32 %v3346_v47, %v4222_v63  ;;  %v3348_v49 = vpop.eup %3347 }
 0x712   : > { %v1594_v25 = vmul.f32 %v3348_v49, %v4228_v15 }
 0x713   : > { %1605 = vrot.lane.b32.xlu0 %v1591_v18, %s3603_s14  ;;  %1609 = vrot.lane.b32.xlu1 %v1592_v27, %s3604_s23 }
 0x714   : > { %v3350_v50 = vpop.eup %3349 }
 0x715   : > { %v1593_v56 = vmul.f32 %v3350_v50, %v4226_v11 }
 0x717   : > { %1613 = vrot.lane.b32.xlu0 %v1593_v56, %s3605_s30  ;;  %1617 = vrot.lane.b32.xlu1 %v1594_v25, %s3606_s29 }
 0x718   : > { %v3352_v63 = vpop.eup %3351 }
 0x719   : > { %v1595_v0 = vmul.f32 %v3352_v63, %v4230_v21 }
 0x71b   : > { %1621 = vrot.lane.b32.xlu0 %v1595_v0, %s3607_s27 }
 0x74a   : > { %v2133_v10 = vpop.xlane.xlu1 %2132 }
 0x74e   : > { %v2142_v57 = vpop.xlane.xlu1 %2141  ;;  %v2139_v51 = vpop.xlane.xlu0 %2138 }
 0x752   : > { %v2136_v11 = vpop.xlane.xlu0 %2135 }
 0x756   : > { %v2145_v60 = vpop.xlane.xlu1 %2144 }
 0x75a   : > { %v4409_v61 = vpop.xlane.xlu1 %2153  ;;  %v2151_v15 = vpop.xlane.xlu0 %2150 }
 0x75e   : > { %v4411_v3 = vpop.xlane.xlu1 %2156  ;;  %v2148_v22 = vpop.xlane.xlu0 %2147 }
 0x762   : > { %v4413_v30 = vpop.xlane.xlu1 %2165  ;;  %v4415_v41 = vpop.xlane.xlu0 %2162 }
 0x766   : > { %v4417_v7 = vpop.xlane.xlu1 %2168  ;;  %v4419_v21 = vpop.xlane.xlu0 %2159 }
 0x76a   : > { %v1182_v34 = vpop.xlane.xlu1 %1181  ;;  %v4421_v12 = vpop.xlane.xlu0 %2171 }
 0x76b   : > { %3353 = vrcp.f32 %v1182_v34 }
 0x76e   : > { %v2127_v39 = vpop.xlane.xlu0 %2126  ;;  %v2130_v28 = vpop.xlane.xlu1 %2129 }
 0x76f   : > { %3355 = vrcp.f32 %v2127_v39 }
 0x770   : > { %3357 = vrcp.f32 %v2130_v28 }
 0x771   : > { %3359 = vrcp.f32 %v2139_v51 }
 0x772   : > { %3361 = vrcp.f32 %v2133_v10 }
 0x773   : > { %3363 = vrcp.f32 %v2136_v11 }
 0x774   : > { %3365 = vrcp.f32 %v2142_v57 }
 0x775   : > { %v3354_v13 = vpop.eup %3353  ;;  %3367 = vrcp.f32 %v2151_v15 }
 0x776   : > { %v1588_v16 = vmul.f32 %v3354_v13, %v4216_v48  ;;  %3369 = vrcp.f32 %v2145_v60 }
 0x777   : > { %3371 = vrcp.f32 %v2148_v22 }
 0x778   : > { %3373 = vrcp.f32 %v4409_v61 }
 0x779   : > { %v3356_v48 = vpop.eup %3355  ;;  %3375 = vrcp.f32 %v4415_v41 }
 0x77a   : > { %v3358_v36 = vpop.eup %3357  ;;  %3377 = vrcp.f32 %v4411_v3 }
 0x77b   : > { %v3360_v2 = vpop.eup %3359  ;;  %3379 = vrcp.f32 %v4419_v21 }
 0x77c   : > { %v3362_v1 = vpop.eup %3361  ;;  %3381 = vrcp.f32 %v4413_v30 }
 0x77d   : > { %v1598_v14 = vpop.permute.xlu0 %1597  ;;  %v3364_v5 = vpop.eup %3363  ;;  %3383 = vrcp.f32 %v4421_v12 }
 0x77e   : > { %v1624_v17 = vsel %vm748_vm2, %v1588_v16, %v1598_v14  ;;  %v3366_v47 = vpop.eup %3365  ;;  %3385 = vrcp.f32 %v4417_v7 }
 0x77f   : > { %v3368_v18 = vpop.eup %3367 }
 0x780   : > { %v3370_v57 = vpop.eup %3369 }
 0x781   : > { %v1602_v35 = vpop.permute.xlu1 %1601  ;;  %v3372_v61 = vpop.eup %3371 }
 0x782   : > { %v1626_v20 = vsel %vm1625_vm5, %v1624_v17, %v1602_v35  ;;  %v3374_v3 = vpop.eup %3373 }
 0x783   : > { %v3376_v22 = vpop.eup %3375 }
 0x784   : > { %v3378_v35 = vpop.eup %3377 }
 0x785   : > { %v1606_v38 = vpop.permute.xlu0 %1605  ;;  %v1610_v19 = vpop.permute.xlu1 %1609 }
 0x786   : > { %v1628_v26 = vsel %vm1627_vm6, %v1626_v20, %v1606_v38  ;;  %v3380_v12 = vpop.eup %3379 }
 0x787   : > { %v1629_v54 = vsel %vm1131_vm3, %v1628_v26, %v1610_v19 }
 0x789   : > { %v1614_v42 = vpop.permute.xlu0 %1613  ;;  %v1618_v31 = vpop.permute.xlu1 %1617 }
 0x78a   : > { %v1631_v29 = vsel %vm1630_vm7, %v1629_v54, %v1614_v42 }
 0x78b   : > { %v2240_v32 = vpop.f32.mrb[52].mxu0  ;;  %v1633_v8 = vsel %vm1632_vm8, %v1631_v29, %v1618_v31 }
 0x78c   : > { %v4429_v33 = vmul.f32 %v3356_v48, %v2240_v32  ;;  %v3147_v44 = vpop.f32.mrb[53].mxu0 }
 0x78d   : > { %v2243_v37 = vpop.f32.mrb[54].mxu0  ;;  %v1622_v52 = vpop.permute.xlu0 %1621 }
 0x78e   : > { %v4432_v53 = vmul.f32 %v3358_v36, %v2243_v37  ;;  %v1635_v58 = vsel %vm1634_vm9, %v1633_v8, %v1622_v52  ;;  %v3148_v55 = vpop.f32.mrb[55].mxu0 }
 0x78f   : > { %1636 = vst.msk [vmem:[%s4437_s28] sm:$0xff] %vm471_vm0, %v1635_v58 }
 0x795   : > { %v2338_v23 = vpop.f32.mrb[56].mxu0 }
 0x796   : > { %v2594_v59 = vmul.f32 %v3360_v2, %v2338_v23  ;;  %v3159_v24 = vpop.f32.mrb[57].mxu0 }
 0x797   : > { %v2341_v45 = vpop.f32.mrb[58].mxu0 }
 0x798   : > { %v3160_v40 = vpop.f32.mrb[59].mxu0  ;;  %2616 = vrot.lane.b32.xlu0 %v2594_v59, %s3602_s25  ;;  %v2595_v50 = vmul.f32 %v3366_v47, %v2341_v45 }
 0x799   : > { %v2289_v43 = vpop.f32.mrb[52].mxu1 }
 0x79a   : > { %v2592_v9 = vmul.f32 %v3362_v1, %v2289_v43  ;;  %v3153_v46 = vpop.f32.mrb[53].mxu1 }
 0x79b   : > { %v2292_v4 = vpop.f32.mrb[54].mxu1 }
 0x79c   : > { %v3154_v6 = vpop.f32.mrb[55].mxu1  ;;  %2608 = vrot.lane.b32.xlu1 %v2592_v9, %s3601_s0  ;;  %v2593_v62 = vmul.f32 %v3364_v5, %v2292_v4 }
 0x7a0   : > { %2610 = vrot.lane.b32.xlu1 %v2593_v62, %s3601_s0  ;;  %s3608_s0 = smov [#allocation8]  }
 0x7a1   : > { %v2387_v27 = vpop.f32.mrb[56].mxu1  ;;  %v2436_v49 = vpop.f32.mrb[60].mxu0 }
 0x7a2   : > { %v2598_v56 = vmul.f32 %v3368_v18, %v2436_v49  ;;  %v3165_v25 = vpop.f32.mrb[57].mxu1  ;;  %v3171_v63 = vpop.f32.mrb[61].mxu0  ;;  %v2596_v11 = vmul.f32 %v3370_v57, %v2387_v27 }
 0x7a3   : > { %v2390_v0 = vpop.f32.mrb[58].mxu1  ;;  %v2439_v10 = vpop.f32.mrb[62].mxu0 }
 0x7a4   : > { %v3166_v51 = vpop.f32.mrb[59].mxu1  ;;  %v3172_v60 = vpop.f32.mrb[63].mxu0  ;;  %2632 = vrot.lane.b32.xlu0 %v2598_v56, %s3604_s23  ;;  %2618 = vrot.lane.b32.xlu1 %v2595_v50, %s3602_s25  ;;  %v2597_v15 = vmul.f32 %v3372_v61, %v2390_v0  ;;  %v2599_v34 = vmul.f32 %v3374_v3, %v2439_v10 }
 0x7a8   : > { %2626 = vrot.lane.b32.xlu0 %v2597_v15, %s3603_s14  ;;  %2624 = vrot.lane.b32.xlu1 %v2596_v11, %s3603_s14  ;;  %s3479_s14 = sshll.u32 %s3608_s0, 4  ;;  %s3480_s14 = int_to_ptr.vmem [resolvable:$false] %s3479_s14 }
 0x7a9   : > { %v2485_v41 = vpop.f32.mrb[60].mxu1  ;;  %v2534_v21 = vpop.f32.mrb[64].mxu0  ;;  %p3482_p2 = scmp.lt.s32.totalorder %s2698_s12, %s3480_s14 }
 0x7aa   : > { %v2602_v39 = vmul.f32 %v3376_v22, %v2534_v21  ;;  %v3177_v28 = vpop.f32.mrb[61].mxu1  ;;  %v3183_v13 = vpop.f32.mrb[65].mxu0  ;;  %v2600_v20 = vmul.f32 %v3378_v35, %v2485_v41 }
 0x7ab   : > { %v2488_v30 = vpop.f32.mrb[62].mxu1  ;;  %v2537_v14 = vpop.f32.mrb[66].mxu0 }
 0x7ac   : > { %v3178_v16 = vpop.f32.mrb[63].mxu1  ;;  %v3184_v17 = vpop.f32.mrb[67].mxu0  ;;  %2648 = vrot.lane.b32.xlu0 %v2602_v39, %s3606_s29  ;;  %2634 = vrot.lane.b32.xlu1 %v2599_v34, %s3604_s23  ;;  %v2601_v7 = vmul.f32 %v3380_v12, %v2488_v30  ;;  %s3481_s23 = scalar_lea.vmem %s3480_s14, 256 }
 0x7ad   : > { %p3483_p5 = scmp.lt.s32.totalorder %s3481_s23, %s3475_s24 }
 0x7af   : > { %p3484_p1 = por %p3483_p5, %p3482_p2 }
 0x7b1   : > { %p3485_p6 = pnand %p3484_p1, %p3478_p9 }
 0x7b3   : > { %3488 = shalt.err (!%p3485_p6)
}
 0x7b4   : > { %s3489_s28 = scalar_lea.hbm %s4461_s17, 128  ;;  %s3493_s15 = scalar_lea.hbm %s4568_s10, 256 }
 0x7b5   : > { %p3490_p8 = scmp.ne.s32.totalorder %s4461_s17, %s3489_s28  ;;  %p3494_p4 = scmp.lt.u32.totalorder %s4461_s17, %s4568_s10 }
 0x7b6   : > { %p3495_p11 = scmp.lt.u32.totalorder %s3493_s15, %s3489_s28  ;;  %p3497_p3 = scmp.lt.u32.totalorder %s3489_s28, %s4461_s17 }
 0x7b7   : > { %p3491_p10 = pnand %p3490_p8, %p3762_p12 }
 0x7b8   : > { %p3496_p13 = por %p3495_p11, %p3494_p4 }
 0x7b9   : > { %p3492_p0 = pneg %p3491_p10 }
 0x7ba   : > { %p3498_p7 = por %p3497_p3, %p3496_p13 }
 0x7bc   : > { %p3499_p9 = pnand %p3498_p7, %p3492_p0 }
 0x7be   : > { %3502 = shalt.err (!%p3499_p9)
}
 0x7bf   : > { %3199 = dma.vmem_to_hbm [thread:$0]  (%p3762_p12), %s2698_s12, 128, %s4461_s17, %s2679_s13   ;;  %2642 = vrot.lane.b32.xlu0 %v2601_v7, %s3605_s30  ;;  %2640 = vrot.lane.b32.xlu1 %v2600_v20, %s3605_s30  ;;  %v3382_v38 = vpop.eup %3381  ;;  %v2583_v19 = vpop.f32.mrb[64].mxu1 }
 0x7c0   : > { %v2603_v26 = vmul.f32 %v3382_v38, %v2537_v14  ;;  %v3189_v54 = vpop.f32.mrb[65].mxu1  ;;  %v3384_v42 = vpop.eup %3383  ;;  %s466_s30 = scalar_lea.vmem [#allocation9], %s2858_s19  ;;  %s3609_s24 = smov [#allocation9]  }
 0x7c1   : > { %v2586_v29 = vpop.f32.mrb[66].mxu1  ;;  %v3386_v32 = vpop.eup %3385  ;;  %s3507_s23 = sshll.u32 %s3609_s24, 4  ;;  %s3508_s23 = int_to_ptr.vmem [resolvable:$false] %s3507_s23 }
 0x7c2   : > { %v2605_v31 = vmul.f32 %v3384_v42, %v2586_v29  ;;  %v3190_v48 = vpop.f32.mrb[67].mxu1  ;;  %v2604_v44 = vmul.f32 %v3386_v32, %v2583_v19  ;;  %s3509_s28 = scalar_lea.vmem %s3508_s23, 512 }
 0x7c3   : > { %2650 = vrot.lane.b32.xlu1 %v2603_v26, %s3606_s29  ;;  %s2710_s29 = sshll.u32 %s466_s30, 4  ;;  %s4503_s29 = int_to_ptr.vmem [resolvable:$true] %s2710_s29 }
 0x7c4   : > { %2658 = vrot.lane.b32.xlu0 %v2605_v31, %s3607_s27  ;;  %s3503_s13 = scalar_lea.vmem %s4503_s29, 256  ;;  %p3510_p6 = scmp.lt.s32.totalorder %s4503_s29, %s3508_s23 }
 0x7c5   : > { %p3504_p2 = scmp.ne.s32.totalorder %s4503_s29, %s3503_s13  ;;  %p3511_p8 = scmp.lt.s32.totalorder %s3509_s28, %s3503_s13 }
 0x7c7   : > { %2656 = vrot.lane.b32.xlu1 %v2604_v44, %s3607_s27  ;;  %s2912_s27 = sshll.u32 %s3692_s21, 8  ;;  %s2684_s21 = scalar_lea.sflag [#allocation10], %s3849_s8 }
 0x7c8   : > { %s4511_s12 = scalar_lea.hbm %s4569_s11, %s2912_s27  ;;  %p3505_p5 = pnand %p3504_p2, %p3762_p12 }
 0x7c9   : > { %p3512_p10 = por %p3511_p8, %p3510_p6 }
 0x7ca   : > { %p3506_p1 = pneg %p3505_p5 }
 0x7cc   : > { %p3513_p0 = pnand %p3512_p10, %p3506_p1 }
 0x80a   : > { %v2617_v8 = vpop.permute.xlu0 %2616 }
 0x80e   : > { %v2609_v36 = vpop.permute.xlu1 %2608 }
 0x80f   : > { %v2662_v24 = vsel %vm748_vm2, %v4429_v33, %v2609_v36 }
 0x810   : > { %v2664_v40 = vsel %vm1625_vm5, %v2662_v24, %v2617_v8 }
 0x812   : > { %v2611_v37 = vpop.permute.xlu1 %2610 }
 0x813   : > { %v2663_v45 = vsel %vm748_vm2, %v4432_v53, %v2611_v37 }
 0x816   : > { %v2633_v52 = vpop.permute.xlu0 %2632  ;;  %v2619_v58 = vpop.permute.xlu1 %2618 }
 0x817   : > { %v2665_v43 = vsel %vm1625_vm5, %v2663_v45, %v2619_v58 }
 0x81a   : > { %v2627_v55 = vpop.permute.xlu0 %2626  ;;  %v2625_v2 = vpop.permute.xlu1 %2624 }
 0x81b   : > { %v2666_v9 = vsel %vm1627_vm6, %v2664_v40, %v2625_v2  ;;  %v2667_v4 = vsel %vm1627_vm6, %v2665_v43, %v2627_v55 }
 0x81c   : > { %v2668_v33 = vsel %vm1131_vm3, %v2666_v9, %v2633_v52 }
 0x81e   : > { %v2649_v23 = vpop.permute.xlu0 %2648  ;;  %v2635_v59 = vpop.permute.xlu1 %2634 }
 0x81f   : > { %v2669_v6 = vsel %vm1131_vm3, %v2667_v4, %v2635_v59 }
 0x831   : > { %v2641_v1 = vpop.permute.xlu1 %2640  ;;  %v2643_v46 = vpop.permute.xlu0 %2642 }
 0x832   : > { %v2671_v5 = vsel %vm1630_vm7, %v2669_v6, %v2643_v46  ;;  %v2670_v53 = vsel %vm1630_vm7, %v2668_v33, %v2641_v1 }
 0x833   : > { %v2672_v49 = vsel %vm1632_vm8, %v2670_v53, %v2649_v23 }
 0x835   : > { %v2651_v62 = vpop.permute.xlu1 %2650 }
 0x836   : > { %v2673_v47 = vsel %vm1632_vm8, %v2671_v5, %v2651_v62  ;;  %v2659_v18 = vpop.permute.xlu0 %2658 }
 0x837   : > { %v2675_v27 = vsel %vm1634_vm9, %v2673_v47, %v2659_v18 }
 0x838   : > { %2677 = vst.msk [vmem:[%s466_s30 + $0x8] sm:$0xff] %vm471_vm0, %v2675_v27 }
 0x839   : > { %v2657_v50 = vpop.permute.xlu1 %2656 }
 0x83a   : > { %v2674_v56 = vsel %vm1634_vm9, %v2672_v49, %v2657_v50 }
 0x83b   : > { %2676 = vst.msk [vmem:[%s466_s30] sm:$0xff] %vm471_vm0, %v2674_v56 }
 0x83c   : > { %3516 = shalt.err (!%p3513_p0)
}
 0x83d   : > { %s3517_s22 = scalar_lea.hbm %s4511_s12, 256  ;;  %s3521_s0 = scalar_lea.hbm %s4569_s11, 512 }
 0x83e   : > { %p3518_p4 = scmp.ne.s32.totalorder %s4511_s12, %s3517_s22  ;;  %p3522_p3 = scmp.lt.u32.totalorder %s4511_s12, %s4569_s11 }
 0x83f   : > { %p3523_p7 = scmp.lt.u32.totalorder %s3521_s0, %s3517_s22  ;;  %p3525_p2 = scmp.lt.u32.totalorder %s3517_s22, %s4511_s12 }
 0x840   : > { %p3519_p11 = pnand %p3518_p4, %p3762_p12 }
 0x841   : > { %p3524_p9 = por %p3523_p7, %p3522_p3 }
 0x842   : > { %p3520_p13 = pneg %p3519_p11 }
 0x843   : > { %p3526_p5 = por %p3525_p2, %p3524_p9 }
 0x845   : > { %p3527_p1 = pnand %p3526_p5, %p3520_p13 }
 0x847   : > { %3530 = shalt.err (!%p3527_p1)
}
 0x848   : > { %s3610_s27 = smov 128  }
 0x849   : > { %3200 = dma.vmem_to_hbm [thread:$0]  (%p3762_p12), %s4503_s29, 256, %s4511_s12, %s2684_s21, %s3610_s27, %s3610_s27, %s3602_s25  }
 0x84a PF: > { %s4599_s19 = sld [smem:[#allocation16_spill]]  ;;  %s4600_s17 = sld [smem:[#allocation18_spill]] }
 0x84b   : > { %p4602_p8 = scmp.ge.s32.totalorder %s3581_s20, 2 }
 0x850   : > { %s2725_s13 = sand.u32 1, %s4599_s19   ;;  %p4601_p6 = scmp.ne.s32.totalorder %s4600_s17, 0 }
 0x851   : > { %s2726_s24 = scalar_lea.sflag [#allocation4], %s2725_s13 }
 0x852   : > { %p3215_p10 = pnand %p4602_p8, %p4601_p6 }
 0x854   : > { %3560 = dma.done.wait (!%p3215_p10), %s2726_s24, 128  }
 0x855   : > { %3562 = vsyncadd (!%p3215_p10), %s2726_s24, 4294967168  ;;  %s2735_s23 = scalar_lea.sflag [#allocation10], %s2725_s13 }
 0x856   : > { %3564 = dma.done.wait (!%p3215_p10), %s2735_s23, 256  }
 0x857   : > { %3566 = vsyncadd (!%p3215_p10), %s2735_s23, 4294967040  ;;  %s4603_s20 = sld [smem:[#allocation19_spill]]  ;;  %s4604_s16 = sld [smem:[#allocation17_spill]] }
 0x858   : > { %s4605_s19 = sld [smem:[#allocation20_spill]]  ;;  %s4606_s17 = smov %s3573_s18 }
 0x85d   : > { %p31_p12 = scmp.ge.s32.totalorder %s4603_s20, 4   ;;  %s4607_s18 = smov %s4604_s16 }
 0x85f   :  { %33 = sbr.rel (!%p31_p12) target bundleno = 12 (0xc), region = 139 }
 0x866   :  { %2740 = vsyncpa [#allocation3], 1 }
 0x867   :  { %2742 = vsyncpa [#allocation3 + $0x1], 1 }
 0x868   :  { %2743 = vsyncpa [#allocation6], 1 }
 0x869   :  { %2745 = vsyncpa [#allocation6 + $0x1], 1 }
 0x86a   :  { %2746 = vsyncpa [#allocation4], 1 }
 0x86b   :  { %2748 = vsyncpa [#allocation4 + $0x1], 1 }
 0x86c   :  { %2749 = vsyncpa [#allocation10], 1 }
 0x86d   :  { %2751 = vsyncpa [#allocation10 + $0x1], 1 }

// kernel: tpu_custom_call.1
= control target key start
LH: loop header
LB: loop body
LE: loop exit
PB: predicated region body
PF: predicated region fallthrough
CT: control target
= control target key end

     0   :  { %s4558_s0 = inlined_call_operand.hbm [shape: f32[2,8,32], index: 0, kind: input, shape index: {}]   ;;  %s4559_s1 = inlined_call_operand.hbm [shape: f32[2,16,32], index: 1, kind: input, shape index: {}]   ;;  %s4560_s2 = inlined_call_operand.vmem [shape: f32[1,32], index: 2, kind: input, shape index: {}]   ;;  %s4561_s3 = inlined_call_operand.vmem [shape: f32[1,32], index: 3, kind: input, shape index: {}]   ;;  %s4562_s4 = inlined_call_operand.vmem [shape: f32[1,32], index: 4, kind: input, shape index: {}]   ;;  %s4563_s5 = inlined_call_operand.vmem [shape: f32[1,32], index: 5, kind: input, shape index: {}]   ;;  %s4564_s6 = inlined_call_operand.vmem [shape: bf16[32,96], index: 6, kind: input, shape index: {}]   ;;  %s4565_s7 = inlined_call_operand.vmem [shape: bf16[1,96], index: 7, kind: input, shape index: {}]   ;;  %s4566_s8 = inlined_call_operand.hbm [shape: bf16[32,96], index: 8, kind: input, shape index: {}]   ;;  %s4567_s9 = inlined_call_operand.vmem [shape: bf16[1,96], index: 9, kind: input, shape index: {}]   ;;  %s4568_s10 = inlined_call_operand.hbm [shape: f32[2,8,32], index: 10, kind: output, shape index: {0}]   ;;  %s4569_s11 = inlined_call_operand.hbm [shape: f32[2,16,32], index: 11, kind: output, shape index: {1}]  }
   0x1   :  { %4578 = sst [smem:[#allocation21_spill]] %s4558_s0 }
   0x2   :  { %4579 = sst [smem:[#allocation22_spill]] %s4566_s8 }
   0x3   :  { %17 = vsyncpa [#allocation3], 0 }
   0x4   :  { %19 = vsyncpa [#allocation3 + $0x1], 0 }
   0x5   :  { %20 = vsyncpa [#allocation6], 0 }
   0x6   :  { %22 = vsyncpa [#allocation6 + $0x1], 0 }
   0x7   :  { %23 = vsyncpa [#allocation4], 0 }
   0x8   :  { %25 = vsyncpa [#allocation4 + $0x1], 0 }
   0x9   :  { %26 = vsyncpa [#allocation10], 0 }
   0xa   :  { %28 = vsyncpa [#allocation10 + $0x1], 0  ;;  %s3671_s17 = smov 0   ;;  %s3673_s18 = smov 0  }
   0xb   :  { %s3675_s19 = smov 0   ;;  %s3677_s20 = smov 0  }
   0xc LB: > { %4580 = sst [smem:[#allocation16_spill]] %s3569_s17  ;;  %s3692_s21 = sadd.s32 4294967295, %s3581_s20   ;;  %s3581_s20 = sphi %s3677_s20, %s4603_s20   ;;  %s3577_s19 = sphi %s3675_s19, %s4605_s19   ;;  %s3573_s18 = sphi %s3673_s18, %s4607_s18   ;;  %s3569_s17 = sphi %s3671_s17, %s4606_s17  }
   0xd   : > { %4581 = sst [smem:[#allocation17_spill]] %s3577_s19  ;;  %s2847_s22 = sadd.s32 4294967294, %s3581_s20  }
   0xe   : > { %p54_p0 = scmp.ne.s32.totalorder %s3573_s18, %s3569_s17  ;;  %p4573_p1 = scmp.eq.s32.totalorder %s3692_s21, 0 }
   0xf   : > { %p278_p3 = scmp.eq.s32.totalorder %s2847_s22, 1  ;;  %p2848_p5 = scmp.ge.s32.totalorder %s3581_s20, 1 }
  0x10   : > { %p3701_p4 = por %p4573_p1, %p54_p0  ;;  %p311_p7 = scmp.lt.s32.totalorder %s3581_s20, 3 }
  0x11   : > { %p3706_p6 = por %p278_p3, %p54_p0  ;;  %s3583_s26 = smov [#allocation7]  }
  0x12   : > { %s4582_s23 = scalar_select %p3701_p4, 1, 0 }
  0x13   : > { %s4583_s24 = scalar_select %p3706_p6, 1, 0 }
  0x14   : > { %p3711_p8 = pnand %p2848_p5, %p311_p7  ;;  %s341_s27 = sshll.u32 %s3583_s26, 4  ;;  %s3715_s27 = int_to_ptr.vmem [resolvable:$true] %s341_s27 }
  0x15   : > { %4584 = sst [smem:[#allocation18_spill]] %s4583_s24  ;;  %s3727_s29 = sadd.s32 1, %s3581_s20  }
  0x16   : > { %s4585_s25 = scalar_select %p3711_p8, 1, 0 }
  0x17   : > { %p3203_p9 = pneg %p3711_p8  ;;  %4587 = sst [smem:[#allocation19_spill]] %s3727_s29 }
  0x18   : > { %s41_s30 = sadd.s32 1, %s3577_s19  ;;  %s38_s12 = ssub.s32 %s3581_s20, %s3727_s29 }
  0x19   : > { %p3722_p11 = pnand %p3203_p9, %p4573_p1  ;;  %s4588_s8 = sld [smem:[#allocation22_spill]] }
  0x1b   : > { %p3389_p13 = pneg %p3722_p11 }
  0x1f   : > { %s3387_s15 = scalar_lea.hbm %s4588_s8, 256 }
  0x20   : > { %p3388_p12 = scmp.ne.s32.totalorder %s4588_s8, %s3387_s15  ;;  %p3394_p5 = scmp.lt.u32.totalorder %s3387_s15, %s4588_s8 }
  0x22   : > { %p3390_p0 = pnand %p3389_p13, %p3388_p12 }
  0x24   : > { %p3391_p3 = pneg %p3390_p0 }
  0x26   : > { %p3396_p7 = pnand %p3394_p5, %p3391_p3 }
  0x28   : > { %3399 = shalt.err (!%p3396_p7)
}
  0x29   : > { %s3400_s29 = scalar_lea.vmem %s3715_s27, 256  ;;  %p3408_p2 = scmp.lt.s32.totalorder %s3715_s27, %s3715_s27 }
  0x2a   : > { %p3401_p9 = scmp.ne.s32.totalorder %s3715_s27, %s3400_s29  ;;  %p3409_p6 = scmp.lt.s32.totalorder %s3400_s29, %s3400_s29 }
  0x2c   : > { %p3403_p10 = pnand %p3401_p9, %p3389_p13  ;;  %p3410_p4 = por %p3409_p6, %p3408_p2 }
  0x2e   : > { %p3404_p1 = pneg %p3403_p10 }
  0x30   : > { %p3411_p8 = pnand %p3410_p4, %p3404_p1 }
  0x32   : > { %3414 = shalt.err (!%p3411_p8)
}
  0x33   : > { %s3584_s13 = smov 64   ;;  %s3585_s24 = smov 4  }
  0x34   : > { %3206 = dma.hbm_to_vmem [thread:$0]  (!%p3722_p11), %s4588_s8, 256, %s3715_s27, [#allocation6], %s3584_s13, %s3584_s13, %s3585_s24  }
  0x35   : > { %p39_p2 = scmp.eq.s32.totalorder %s38_s12, 0  ;;  %p48_p1 = scmp.ne.s32.totalorder %s3577_s19, %s3573_s18 }
  0x36   : > { %p49_p4 = scmp.eq.s32.totalorder %s3581_s20, 0  ;;  %p3222_p6 = scmp.lt.s32.totalorder %s3581_s20, 2 }
  0x37   : > { %s3758_s29 = scalar_select %p39_p2, %s3577_s19, %s41_s30  }
  0x38   : > { %p50_p8 = por %p49_p4, %p48_p1  ;;  %p4590_p10 = scmp.eq.s32.totalorder %s3692_s21, 1 }
  0x39   : > { %4589 = sst [smem:[#allocation20_spill]] %s3758_s29  ;;  %s3767_s22 = sand.u32 1, %s3577_s19  }
  0x3a   : > { %p3762_p12 = por %p4590_p10, %p48_p1  ;;  %s2852_s28 = sshll.u32 %s3581_s20, 7 }
  0x3b   : > { %s2851_s26 = sshll.u32 %s3767_s22, 3  ;;  %s4592_s0 = sld [smem:[#allocation21_spill]] }
  0x3c   : > { %s362_s30 = scalar_lea.vmem [#allocation2], %s2851_s26  ;;  %p3776_p11 = pnand %p3222_p6, %p50_p8 }
  0x3d   : > { %s369_s24 = sshll.u32 %s362_s30, 4  ;;  %s359_s8 = scalar_lea.sflag [#allocation3], %s3767_s22  ;;  %s3780_s24 = int_to_ptr.vmem [resolvable:$true] %s369_s24 }
  0x3e   : > { %p3417_p0 = pneg %p3776_p11 }
  0x41   : > { %s3774_s13 = scalar_lea.hbm %s4592_s0, %s2852_s28  ;;  %s3420_s27 = scalar_lea.hbm %s4592_s0, 256 }
  0x42   : > { %s3415_s29 = scalar_lea.hbm %s3774_s13, 128  ;;  %p3421_p7 = scmp.lt.u32.totalorder %s3774_s13, %s4592_s0 }
  0x43   : > { %p3416_p13 = scmp.ne.s32.totalorder %s3774_s13, %s3415_s29  ;;  %p3422_p9 = scmp.lt.u32.totalorder %s3420_s27, %s3415_s29 }
  0x44   : > { %p3424_p1 = scmp.lt.u32.totalorder %s3415_s29, %s3774_s13 }
  0x45   : > { %p3418_p3 = pnand %p3417_p0, %p3416_p13  ;;  %p3423_p2 = por %p3422_p9, %p3421_p7 }
  0x47   : > { %p3419_p5 = pneg %p3418_p3  ;;  %p3425_p4 = por %p3424_p1, %p3423_p2 }
  0x49   : > { %p3426_p6 = pnand %p3425_p4, %p3419_p5 }
  0x4b   : > { %3429 = shalt.err (!%p3426_p6)
}
  0x4c   : > { %s3430_s15 = scalar_lea.vmem %s3780_s24, 128  ;;  %s3586_s28 = smov [#allocation2]  }
  0x4d   : > { %p3431_p8 = scmp.ne.s32.totalorder %s3780_s24, %s3430_s15  ;;  %s3435_s26 = sshll.u32 %s3586_s28, 4  ;;  %s3436_s26 = int_to_ptr.vmem [resolvable:$false] %s3435_s26 }
  0x4e   : > { %s3437_s12 = scalar_lea.vmem %s3436_s26, 256  ;;  %p3438_p3 = scmp.lt.s32.totalorder %s3780_s24, %s3436_s26 }
  0x4f   : > { %p3433_p10 = pnand %p3431_p8, %p3417_p0  ;;  %p3439_p7 = scmp.lt.s32.totalorder %s3437_s12, %s3430_s15 }
  0x51   : > { %p3434_p13 = pneg %p3433_p10  ;;  %p3440_p9 = por %p3439_p7, %p3438_p3 }
  0x53   : > { %p3441_p2 = pnand %p3440_p9, %p3434_p13 }
  0x55   : > { %3444 = shalt.err (!%p3441_p2)
}
  0x56   : > { %3210 = dma.hbm_to_vmem [thread:$0]  (!%p3776_p11), %s3774_s13, 128, %s3780_s24, %s359_s8  }
  0x57   : > { %s4594_s29 = sshll.u32 %s3767_s22, 4  ;;  %s376_s28 = sand.u32 1, %s3581_s20  }
  0x58   : > { %s380_s27 = scalar_lea.vmem [#allocation5], %s4594_s29  ;;  %s2911_s26 = sshll.u32 %s3581_s20, 8 }
  0x59   : > { %s387_s30 = sshll.u32 %s380_s27, 4  ;;  %s3818_s0 = scalar_lea.hbm %s4559_s1, %s2911_s26  ;;  %s3812_s30 = int_to_ptr.vmem [resolvable:$true] %s387_s30 }
  0x5a   : > { %s3820_s19 = scalar_lea.sflag [#allocation6], %s376_s28  ;;  %s3445_s17 = scalar_lea.hbm %s3818_s0, 256 }
  0x5b   : > { %p3446_p5 = scmp.ne.s32.totalorder %s3818_s0, %s3445_s17  ;;  %s3450_s13 = scalar_lea.hbm %s4559_s1, 512 }
  0x5c   : > { %p3451_p6 = scmp.lt.u32.totalorder %s3818_s0, %s4559_s1  ;;  %p3452_p8 = scmp.lt.u32.totalorder %s3450_s13, %s3445_s17 }
  0x5d   : > { %p3448_p1 = pnand %p3446_p5, %p3417_p0  ;;  %p3454_p13 = scmp.lt.u32.totalorder %s3445_s17, %s3818_s0 }
  0x5e   : > { %p3453_p10 = por %p3452_p8, %p3451_p6 }
  0x5f   : > { %p3449_p4 = pneg %p3448_p1 }
  0x60   : > { %p3455_p3 = por %p3454_p13, %p3453_p10 }
  0x62   : > { %p3456_p7 = pnand %p3455_p3, %p3449_p4 }
  0x64   : > { %3459 = shalt.err (!%p3456_p7)
}
  0x65   : > { %s3460_s27 = scalar_lea.vmem %s3812_s30, 256  ;;  %s3587_s28 = smov [#allocation5]  }
  0x66   : > { %p3461_p9 = scmp.ne.s32.totalorder %s3812_s30, %s3460_s27  ;;  %s3465_s26 = sshll.u32 %s3587_s28, 4  ;;  %s3466_s26 = int_to_ptr.vmem [resolvable:$false] %s3465_s26 }
  0x67   : > { %s3467_s15 = scalar_lea.vmem %s3466_s26, 512  ;;  %p3468_p1 = scmp.lt.s32.totalorder %s3812_s30, %s3466_s26 }
  0x68   : > { %p3463_p2 = pnand %p3461_p9, %p3417_p0  ;;  %p3469_p6 = scmp.lt.s32.totalorder %s3467_s15, %s3460_s27 }
  0x6a   : > { %p3464_p5 = pneg %p3463_p2  ;;  %p3470_p8 = por %p3469_p6, %p3468_p1 }
  0x6c   : > { %p3471_p10 = pnand %p3470_p8, %p3464_p5 }
  0x6e   : > { %3474 = shalt.err (!%p3471_p10)
}
  0x6f   : > { %s3588_s17 = smov 128   ;;  %s3589_s12 = smov 8  }
  0x70   : > { %3213 = dma.hbm_to_vmem [thread:$0]  (!%p3776_p11), %s3818_s0, 256, %s3812_s30, %s3820_s19, %s3588_s17, %s3588_s17, %s3589_s12  }
  0x71   : > { %p4595_p0 = scmp.ne.s32.totalorder %s4585_s25, 0 }
  0x72   : > { %s3849_s8 = sand.u32 (!%p4595_p0), 1, %s3573_s18   ;;  %p4596_p4 = scmp.ne.s32.totalorder (!%p4595_p0), %s4582_s23, 0 }
  0x73   : > { %399 = sbr.rel (%p4595_p0) target bundleno = 2122 (0x84a), region = 60  ;;  %s2857_s22 = sshll.u32 (!%p4595_p0), %s3849_s8, 3 }
  0x74   : > { %s402_s13 = scalar_lea.sflag (!%p4595_p0), [#allocation3], %s3849_s8  ;;  %s405_s24 = scalar_lea.vmem (!%p4595_p0), [#allocation2], %s2857_s22 }
  0x7a   : > { %3548 = dma.done.wait (%p4596_p4), %s402_s13, 128  }
  0x7b   : > { %3550 = vsyncadd (%p4596_p4), %s402_s13, 4294967168  ;;  %s410_s0 = sand.u32 1, %s3692_s21   ;;  %s2858_s19 = sshll.u32 %s3849_s8, 4 }
  0x7c   : > { %s411_s25 = scalar_lea.sflag [#allocation6], %s410_s0  ;;  %s414_s14 = scalar_lea.vmem [#allocation5], %s2858_s19 }
  0x7d   : > { %3552 = dma.done.wait (%p4596_p4), %s411_s25, 256  }
  0x7e   : > { %3554 = vsyncadd (%p4596_p4), %s411_s25, 4294967040  ;;  %p4597_p11 = scmp.eq.s32.totalorder %s3692_s21, 0 }
  0x80   : > { %3556 = dma.done.wait (%p4597_p11), [#allocation6], 256   ;;  %p4598_p13 = pmov %p4597_p11 }
  0x81   : > { %vm471_vm0 = vcmask 261120   ;;  %v469_v0 = vld [vmem:[%s414_s14] sm:$0xff]  ;;  %v470_v1 = vld [vmem:[%s414_s14 + $0x8] sm:$0xff]  ;;  %v3590_v23 = vmov 0.0   ;;  %vm3591_vm1 = vmmov 0   ;;  %v554_v53 = vlaneseq  ;;  %s3592_s23 = smov 120  }
  0x82   : > { %3558 = vsyncadd (%p4598_p13), [#allocation6], 4294967040  ;;  %v468_v2 = vld [vmem:[%s405_s24] sm:$0xff]  ;;  %v503_v3 = vsel %vm471_vm0, %v469_v0, 0.0  ;;  %v506_v4 = vsel %vm471_vm0, %v470_v1, 0.0  ;;  %v3282_v22 = vld [vmem:[#allocation7] sm:$0xff]   ;;  %2983 = vmatprep.subr.bf16.mxu0 %v3590_v23  ;;  %2991 = vmatprep.subr.bf16.mxu1 %v3590_v23 }
  0x83   : > { %v472_v5 = vsel %vm471_vm0, %v468_v2, 0.0  ;;  %504 = vadd.xlane.f32.xlu0 %v503_v3  ;;  %v3281_v21 = vld [vmem:[%s4564_s6] sm:$0xff]   ;;  %2992 = vmatpush3.bf16.msra.mxu1 %v3282_v22  ;;  %v3283_v24 = vld [vmem:[%s4564_s6 + $0x8] sm:$0xff]   ;;  %v3284_v25 = vld [vmem:[#allocation7 + $0x8] sm:$0xff]   ;;  %v555_v54 = vshrl.u32 %v554_v53, 7  ;;  %s3593_s30 = smov 124  }
  0x84   : > { %473 = vadd.xlane.f32.xlu1 %v472_v5  ;;  %2984 = vmatpush3.bf16.msra.mxu0 %v3281_v21  ;;  %v2864_v37 = vld [vmem:[%s4562_s4] ss:$0 sm:$0xff]  ;;  %s3594_s29 = smov 116   ;;  %s3595_s27 = smov 108   ;;  %vm748_vm2 = vcmask 31744   ;;  %vm1131_vm3 = vcmask 130048  }
  0x85   : > { %2985 = vmatprep.subr.bf16.mxu0 %v3590_v23  ;;  %2993 = vmatprep.subr.bf16.mxu1 %v3590_v23  ;;  %v2862_v40 = vld [vmem:[%s4560_s2] ss:$0 sm:$0xff]  ;;  %v556_v56 = vsub.s32 0, %v555_v54  ;;  %s3596_s28 = smov 112   ;;  %s3597_s26 = smov 100   ;;  %vm2202_vm4 = vcmask 1043456  }
  0x86   : > { %2987 = vmatprep.mubr.msk.bf16.mxu0 %vm3591_vm1, %v3590_v23  ;;  %2995 = vmatprep.mubr.msk.bf16.mxu1 %vm3591_vm1, %v3590_v23  ;;  %v2865_v44 = vld [vmem:[%s4563_s5] ss:$0 sm:$0xff]  ;;  %s3598_s15 = smov 104   ;;  %s3599_s17 = smov 96   ;;  %vm1625_vm5 = vcmask 64512   ;;  %vm1627_vm6 = vcmask 97280  }
  0x87   : > { %507 = vadd.xlane.f32.xlu0 %v506_v4  ;;  %2994 = vmatpush3.bf16.msra.mxu1 %v3284_v25  ;;  %v2863_v45 = vld [vmem:[%s4561_s3] ss:$0 sm:$0xff]  ;;  %s3600_s24 = smov 64   ;;  %s3601_s0 = smov 4   ;;  %vm1630_vm7 = vcmask 162816   ;;  %vm1632_vm8 = vcmask 195584  }
  0x88   : > { %2986 = vmatpush3.bf16.msra.mxu0 %v3283_v24  ;;  %3005 = vmatprep.subr.bf16.mxu1 %v3590_v23  ;;  %v617_v55 = vld [vmem:[%s4567_s9] sm:$0x1]  ;;  %s3602_s25 = smov 8   ;;  %s3603_s14 = smov 12   ;;  %vm1634_vm9 = vcmask 228352  }
  0x89   : > { %2999 = vmatprep.subr.bf16.mxu0 %v3590_v23  ;;  %v618_v57 = vunpack.c.l.bf16 %v617_v55  ;;  %s2679_s13 = scalar_lea.sflag [#allocation4], %s3849_s8 }
  0x8b   : > { %v622_v58 = vrot.slane %v618_v57, %v556_v56 }
 0x110   : > { %v505_v6 = vpop.xlane.xlu0 %504 }
 0x111   : > { %v474_v7 = vpop.xlane.xlu1 %473  ;;  %v509_v8 = vmul.f32 0.03125, %v505_v6 }
 0x112   : > { %v476_v9 = vmul.f32 0.03125, %v474_v7 }
 0x113   : > { %v511_v10 = vsub.f32 %v469_v0, %v509_v8 }
 0x114   : > { %v477_v11 = vsub.f32 %v468_v2, %v476_v9  ;;  %v508_v12 = vpop.xlane.xlu0 %507  ;;  %v552_v9 = vld [vmem:[%s4565_s7] sm:$0x1] }
 0x115   : > { %v510_v13 = vmul.f32 0.03125, %v508_v12  ;;  %v513_v14 = vmul.f32 %v511_v10, %v511_v10 }
 0x116   : > { %v478_v15 = vmul.f32 %v477_v11, %v477_v11 }
 0x117   : > { %v512_v16 = vsub.f32 %v470_v1, %v510_v13  ;;  %v515_v17 = vsel %vm471_vm0, %v513_v14, 0.0 }
 0x118   : > { %516 = vadd.xlane.f32.xlu1 %v515_v17  ;;  %v479_v19 = vsel %vm471_vm0, %v478_v15, 0.0 }
 0x119   : > { %v514_v18 = vmul.f32 %v512_v16, %v512_v16 }
 0x11b   : > { %v518_v20 = vsel %vm471_vm0, %v514_v18, 0.0 }
 0x11c   : > { %519 = vadd.xlane.f32.xlu0 %v518_v20  ;;  %480 = vadd.xlane.f32.xlu1 %v479_v19 }
 0x1a5   : > { %v517_v26 = vpop.xlane.xlu1 %516 }
 0x1a6   : > { %v521_v27 = vmul.f32 0.03125, %v517_v26 }
 0x1a8   : > { %v523_v28 = vadd.f32 1e-05, %v521_v27 }
 0x1a9   : > { %v520_v29 = vpop.xlane.xlu0 %519  ;;  %v481_v30 = vpop.xlane.xlu1 %480 }
 0x1aa   : > { %3285 = vrsqrt.f32 %v523_v28  ;;  %v522_v31 = vmul.f32 0.03125, %v520_v29  ;;  %v482_v32 = vmul.f32 0.03125, %v481_v30 }
 0x1ac   : > { %v524_v33 = vadd.f32 1e-05, %v522_v31  ;;  %v483_v34 = vadd.f32 1e-05, %v482_v32 }
 0x1ae   : > { %3287 = vrsqrt.f32 %v524_v33 }
 0x1af   : > { %3289 = vrsqrt.f32 %v483_v34 }
 0x1b4   : > { %v3286_v35 = vpop.eup %3285 }
 0x1b5   : > { %v527_v36 = vmul.f32 %v3286_v35, %v511_v10  ;;  %v553_v10 = vunpack.c.l.bf16 %v552_v9 }
 0x1b7   : > { %v536_v42 = vmul.f32 %v2864_v37, %v527_v36 }
 0x1b8   : > { %v3288_v38 = vpop.eup %3287 }
 0x1b9   : > { %v3290_v39 = vpop.eup %3289  ;;  %v528_v41 = vmul.f32 %v3288_v38, %v512_v16  ;;  %v545_v48 = vadd.f32 %v2865_v44, %v536_v42 }
 0x1ba   : > { %v485_v43 = vmul.f32 %v3290_v39, %v477_v11  ;;  %v557_v11 = vrot.slane %v553_v10, %v556_v56 }
 0x1bb   : > { %v537_v46 = vmul.f32 %v2864_v37, %v528_v41 }
 0x1bc   : > { %v493_v47 = vmul.f32 %v2862_v40, %v485_v43 }
 0x1bd   : > { %v546_v49 = vadd.f32 %v2865_v44, %v537_v46 }
 0x1be   : > { %v501_v50 = vadd.f32 %v2863_v45, %v493_v47 }
 0x1bf   : > { %v547_v51 = vpack.c.bf16 %v546_v49, %v545_v48 }
 0x1c0   : > { %v502_v52 = vpack.c.bf16 %v501_v50, %v501_v50 }
 0x1c1   : > { %2996 = vmatmul.mubr.msk.bf16.vlgmr.msra.gmra.mrb[0].mxu1 %vm471_vm0, %v547_v51 }
 0x1c2   : > { %2988 = vmatmul.mubr.msk.bf16.vlgmr.msra.gmra.mrb[0].mxu0 %vm471_vm0, %v502_v52  ;;  %3007 = vmatprep.mubr.msk.bf16.mxu1 %vm3591_vm1, %v3590_v23 }
 0x1c3   : > { %3001 = vmatprep.mubr.msk.bf16.mxu0 %vm3591_vm1, %v3590_v23 }
 0x294   : > { %v672_v59 = vpop.f32.mrb[0].mxu1 }
 0x295   : > { %v607_v60 = vpop.f32.mrb[0].mxu0  ;;  %v673_v61 = vadd.f32 %v672_v59, %v622_v58  ;;  %v2997_v62 = vpop.f32.mrb[1].mxu1 }
 0x296   : > { %v2989_v63 = vpop.f32.mrb[1].mxu0  ;;  %v675_v0 = vpop.f32.mrb[2].mxu1  ;;  %v608_v12 = vadd.f32 %v607_v60, %v557_v11 }
 0x297   : > { %v610_v1 = vpop.f32.mrb[2].mxu0  ;;  %v676_v2 = vadd.f32 %v675_v0, %v622_v58  ;;  %v2998_v3 = vpop.f32.mrb[3].mxu1  ;;  %v712_v5 = vmul.f32 0.5, %v673_v61 }
 0x298   : > { %v2990_v4 = vpop.f32.mrb[3].mxu0  ;;  %v679_v13 = vmul.f32 0.5, %v608_v12  ;;  %v3947_v25 = vpack.c.bf16 %v608_v12, %v608_v12 }
 0x299   : > { %v713_v6 = vmul.f32 0.5, %v676_v2  ;;  %v730_v7 = vpack.c.bf16 %v676_v2, %v673_v61 }
 0x29a   : > { %v680_v16 = vpack.c.bf16 %v679_v13, %v679_v13 }
 0x29b   : > { %v3914_v8 = vpack.c.bf16 %v713_v6, %v712_v5  ;;  %734 = vrot.lane.b32.xlu1 %v730_v7, %s3592_s23  ;;  %732 = vrot.lane.b32.xlu0 %v730_v7, %s3593_s30 }
 0x29f   : > { %736 = vrot.lane.b32.xlu1 %v730_v7, %s3594_s29  ;;  %740 = vrot.lane.b32.xlu0 %v730_v7, %s3595_s27 }
 0x2a3   : > { %738 = vrot.lane.b32.xlu1 %v730_v7, %s3596_s28  ;;  %744 = vrot.lane.b32.xlu0 %v730_v7, %s3597_s26 }
 0x2a7   : > { %742 = vrot.lane.b32.xlu1 %v730_v7, %s3598_s15 }
 0x2ab   : > { %746 = vrot.lane.b32.xlu1 %v730_v7, %s3599_s17 }
 0x30d   : > { %v733_v14 = vpop.permute.xlu0 %732  ;;  %v735_v15 = vpop.permute.xlu1 %734 }
 0x30e   : > { %795 = vrot.lane.b32.xlu0 %v733_v14, %s3599_s17  ;;  %843 = vrot.lane.b32.xlu1 %v735_v15, %s3599_s17 }
 0x311   : > { %v737_v17 = vpop.permute.xlu1 %736  ;;  %v741_v19 = vpop.permute.xlu0 %740 }
 0x312   : > { %682 = vrot.lane.b32.xlu0 %v680_v16, %s3593_s30  ;;  %891 = vrot.lane.b32.xlu1 %v737_v17, %s3599_s17 }
 0x315   : > { %v739_v18 = vpop.permute.xlu1 %738  ;;  %v3939_v24 = vpop.permute.xlu0 %744 }
 0x316   : > { %684 = vrot.lane.b32.xlu0 %v680_v16, %s3592_s23  ;;  %939 = vrot.lane.b32.xlu1 %v739_v18, %s3599_s17 }
 0x319   : > { %v743_v20 = vpop.permute.xlu1 %742 }
 0x31a   : > { %686 = vrot.lane.b32.xlu0 %v680_v16, %s3594_s29  ;;  %987 = vrot.lane.b32.xlu1 %v741_v19, %s3599_s17 }
 0x31d   : > { %v747_v21 = vpop.permute.xlu1 %746 }
 0x31e   : > { %v753_v22 = vsel %vm748_vm2, %v747_v21, 0  ;;  %688 = vrot.lane.b32.xlu0 %v680_v16, %s3596_s28  ;;  %1035 = vrot.lane.b32.xlu1 %v743_v20, %s3599_s17 }
 0x31f   : > { %3000 = vmatpush3.bf16.xpose.msra.mxu0 %v753_v22 }
 0x320   : > { %3011 = vmatprep.subr.bf16.mxu0 %v3590_v23 }
 0x322   : > { %690 = vrot.lane.b32.xlu0 %v680_v16, %s3595_s27  ;;  %1083 = vrot.lane.b32.xlu1 %v3939_v24, %s3599_s17 }
 0x326   : > { %692 = vrot.lane.b32.xlu0 %v680_v16, %s3598_s15  ;;  %694 = vrot.lane.b32.xlu1 %v680_v16, %s3597_s26 }
 0x327   : > { %3002 = vmatmul.mubr.msk.bf16.vlgmr.msra.gmra.mrb[4].mxu0 %vm748_vm2, %v680_v16 }
 0x328   : > { %3013 = vmatprep.mubr.msk.bf16.mxu0 %vm3591_vm1, %v3590_v23 }
 0x32a   : > { %698 = vrot.lane.b32.xlu0 %v3947_v25, %s3593_s30  ;;  %702 = vrot.lane.b32.xlu1 %v3947_v25, %s3594_s29 }
 0x32e   : > { %700 = vrot.lane.b32.xlu0 %v3947_v25, %s3592_s23  ;;  %706 = vrot.lane.b32.xlu1 %v3947_v25, %s3595_s27 }
 0x332   : > { %704 = vrot.lane.b32.xlu0 %v3947_v25, %s3596_s28  ;;  %710 = vrot.lane.b32.xlu1 %v3947_v25, %s3597_s26 }
 0x336   : > { %708 = vrot.lane.b32.xlu0 %v3947_v25, %s3598_s15  ;;  %1266 = vrot.lane.b32.xlu1 %v733_v14, %s3600_s24 }
 0x33a   : > { %1220 = vrot.lane.b32.xlu0 %v730_v7, %s3600_s24  ;;  %1312 = vrot.lane.b32.xlu1 %v735_v15, %s3600_s24 }
 0x33e   : > { %1358 = vrot.lane.b32.xlu0 %v737_v17, %s3600_s24  ;;  %1404 = vrot.lane.b32.xlu1 %v739_v18, %s3600_s24 }
 0x342   : > { %1450 = vrot.lane.b32.xlu0 %v741_v19, %s3600_s24  ;;  %1496 = vrot.lane.b32.xlu1 %v743_v20, %s3600_s24 }
 0x380   : > { %v796_v26 = vpop.permute.xlu0 %795  ;;  %v844_v27 = vpop.permute.xlu1 %843 }
 0x381   : > { %v801_v28 = vsel %vm748_vm2, %v796_v26, 0  ;;  %v849_v29 = vsel %vm748_vm2, %v844_v27, 0 }
 0x382   : > { %3006 = vmatpush3.bf16.xpose.msra.mxu1 %v801_v28  ;;  %3012 = vmatpush3.bf16.xpose.msra.mxu0 %v849_v29 }
 0x383   : > { %3017 = vmatprep.subr.bf16.mxu1 %v3590_v23  ;;  %3023 = vmatprep.subr.bf16.mxu0 %v3590_v23 }
 0x384   : > { %v683_v30 = vpop.permute.xlu0 %682  ;;  %v892_v31 = vpop.permute.xlu1 %891 }
 0x385   : > { %v897_v34 = vsel %vm748_vm2, %v892_v31, 0 }
 0x388   : > { %v685_v32 = vpop.permute.xlu0 %684  ;;  %v940_v33 = vpop.permute.xlu1 %939 }
 0x389   : > { %v945_v35 = vsel %vm748_vm2, %v940_v33, 0  ;;  %3008 = vmatmul.mubr.msk.bf16.vlgmr.msra.gmra.mrb[4].mxu1 %vm748_vm2, %v683_v30  ;;  %3014 = vmatmul.mubr.msk.bf16.vlgmr.msra.gmra.mrb[8].mxu0 %vm748_vm2, %v685_v32 }
 0x38a   : > { %3018 = vmatpush3.bf16.xpose.msra.mxu1 %v897_v34  ;;  %3024 = vmatpush3.bf16.xpose.msra.mxu0 %v945_v35 }
 0x38b   : > { %3019 = vmatprep.mubr.msk.bf16.mxu1 %vm3591_vm1, %v3590_v23  ;;  %3025 = vmatprep.mubr.msk.bf16.mxu0 %vm3591_vm1, %v3590_v23 }
 0x38c   : > { %v687_v36 = vpop.permute.xlu0 %686  ;;  %v988_v37 = vpop.permute.xlu1 %987  ;;  %3029 = vmatprep.subr.bf16.mxu1 %v3590_v23  ;;  %3035 = vmatprep.subr.bf16.mxu0 %v3590_v23 }
 0x38d   : > { %v993_v40 = vsel %vm748_vm2, %v988_v37, 0 }
 0x390   : > { %v689_v38 = vpop.permute.xlu0 %688  ;;  %v1036_v39 = vpop.permute.xlu1 %1035 }
 0x391   : > { %v1041_v41 = vsel %vm748_vm2, %v1036_v39, 0  ;;  %3020 = vmatmul.mubr.msk.bf16.vlgmr.msra.gmra.mrb[8].mxu1 %vm748_vm2, %v687_v36  ;;  %3026 = vmatmul.mubr.msk.bf16.vlgmr.msra.gmra.mrb[12].mxu0 %vm748_vm2, %v689_v38 }
 0x392   : > { %3030 = vmatpush3.bf16.xpose.msra.mxu1 %v993_v40  ;;  %3036 = vmatpush3.bf16.xpose.msra.mxu0 %v1041_v41 }
 0x393   : > { %3031 = vmatprep.mubr.msk.bf16.mxu1 %vm3591_vm1, %v3590_v23  ;;  %3037 = vmatprep.mubr.msk.bf16.mxu0 %vm3591_vm1, %v3590_v23 }
 0x394   : > { %v691_v42 = vpop.permute.xlu0 %690  ;;  %v1084_v43 = vpop.permute.xlu1 %1083  ;;  %3041 = vmatprep.subr.bf16.mxu1 %v3590_v23  ;;  %3047 = vmatprep.subr.bf16.mxu0 %v3590_v23 }
 0x395   : > { %v1089_v46 = vsel %vm748_vm2, %v1084_v43, 0 }
 0x398   : > { %v693_v44 = vpop.permute.xlu0 %692  ;;  %v695_v45 = vpop.permute.xlu1 %694 }
 0x399   : > { %3032 = vmatmul.mubr.msk.bf16.vlgmr.msra.gmra.mrb[12].mxu1 %vm748_vm2, %v691_v42  ;;  %3038 = vmatmul.mubr.msk.bf16.vlgmr.msra.gmra.mrb[16].mxu0 %vm748_vm2, %v693_v44 }
 0x39a   : > { %3042 = vmatpush3.bf16.xpose.msra.mxu1 %v1089_v46  ;;  %3043 = vmatprep.mubr.msk.bf16.mxu1 %vm3591_vm1, %v3590_v23 }
 0x39b   : > { %3053 = vmatprep.subr.bf16.mxu1 %v3590_v23  ;;  %3049 = vmatprep.mubr.msk.bf16.mxu0 %vm3591_vm1, %v3590_v23 }
 0x39c   : > { %v4004_v47 = vpop.permute.xlu0 %698  ;;  %v4006_v48 = vpop.permute.xlu1 %702 }
 0x3a0   : > { %v4008_v49 = vpop.permute.xlu0 %700  ;;  %v4010_v50 = vpop.permute.xlu1 %706 }
 0x3a1   : > { %3044 = vmatmul.mubr.msk.bf16.vlgmr.msra.gmra.mrb[16].mxu1 %vm748_vm2, %v695_v45 }
 0x3a2   : > { %3055 = vmatprep.mubr.msk.bf16.mxu1 %vm3591_vm1, %v3590_v23 }
 0x3a4   : > { %v4015_v51 = vpop.permute.xlu0 %704  ;;  %v4017_v52 = vpop.permute.xlu1 %710 }
 0x3a8   : > { %v4019_v53 = vpop.permute.xlu0 %708  ;;  %v1267_v54 = vpop.permute.xlu1 %1266 }
 0x3a9   : > { %3054 = vmatpush3.bf16.msra.mxu1 %v1267_v54 }
 0x3aa   : > { %3065 = vmatprep.subr.bf16.mxu1 %v3590_v23 }
 0x3ac   : > { %v1221_v55 = vpop.permute.xlu0 %1220  ;;  %v1313_v34 = vpop.permute.xlu1 %1312 }
 0x3ad   : > { %3048 = vmatpush3.bf16.msra.mxu0 %v1221_v55 }
 0x3ae   : > { %3059 = vmatprep.subr.bf16.mxu0 %v3590_v23 }
 0x3b0   : > { %v4050_v35 = vpop.permute.xlu1 %1404  ;;  %v1359_v43 = vpop.permute.xlu0 %1358 }
 0x3b4   : > { %v4054_v36 = vpop.permute.xlu1 %1496  ;;  %v1451_v44 = vpop.permute.xlu0 %1450 }
 0x3fa   : > { %v789_v56 = vpop.f32.mrb[4].mxu0 }
 0x3fb   : > { %v3003_v57 = vpop.f32.mrb[5].mxu0  ;;  %v1132_v58 = vsel %vm1131_vm3, %v789_v56, -inf }
 0x3fc   : > { %1133 = vmax.xlane.f32.xlu1 %v1132_v58  ;;  %v792_v59 = vpop.f32.mrb[6].mxu0 }
 0x3fd   : > { %v3004_v60 = vpop.f32.mrb[7].mxu0 }
 0x45c   : > { %v4024_v61 = vpop.f32.mrb[4].mxu1  ;;  %v4026_v62 = vpop.f32.mrb[8].mxu0 }
 0x45d   : > { %v3009_v63 = vpop.f32.mrb[5].mxu1  ;;  %v3015_v0 = vpop.f32.mrb[9].mxu0  ;;  %v1135_v1 = vsel %vm1131_vm3, %v4024_v61, -inf  ;;  %v1138_v2 = vsel %vm1131_vm3, %v4026_v62, -inf }
 0x45e   : > { %v840_v3 = vpop.f32.mrb[6].mxu1  ;;  %1136 = vmax.xlane.f32.xlu0 %v1135_v1  ;;  %1139 = vmax.xlane.f32.xlu1 %v1138_v2  ;;  %v888_v4 = vpop.f32.mrb[10].mxu0 }
 0x45f   : > { %v3010_v5 = vpop.f32.mrb[7].mxu1  ;;  %v3016_v6 = vpop.f32.mrb[11].mxu0 }
 0x464   : > { %v4032_v7 = vpop.f32.mrb[8].mxu1  ;;  %v4034_v9 = vpop.f32.mrb[12].mxu0 }
 0x465   : > { %v3021_v10 = vpop.f32.mrb[9].mxu1  ;;  %v3027_v11 = vpop.f32.mrb[13].mxu0  ;;  %v1141_v12 = vsel %vm1131_vm3, %v4032_v7, -inf  ;;  %v1144_v13 = vsel %vm1131_vm3, %v4034_v9, -inf }
 0x466   : > { %1142 = vmax.xlane.f32.xlu0 %v1141_v12  ;;  %v936_v14 = vpop.f32.mrb[10].mxu1  ;;  %1145 = vmax.xlane.f32.xlu1 %v1144_v13  ;;  %v984_v15 = vpop.f32.mrb[14].mxu0 }
 0x467   : > { %v3022_v16 = vpop.f32.mrb[11].mxu1  ;;  %v3028_v17 = vpop.f32.mrb[15].mxu0 }
 0x46c   : > { %v4040_v18 = vpop.f32.mrb[12].mxu1  ;;  %v4042_v19 = vpop.f32.mrb[16].mxu0 }
 0x46d   : > { %v3033_v20 = vpop.f32.mrb[13].mxu1  ;;  %v3039_v21 = vpop.f32.mrb[17].mxu0  ;;  %v1147_v22 = vsel %vm1131_vm3, %v4040_v18, -inf  ;;  %v1150_v42 = vsel %vm1131_vm3, %v4042_v19, -inf }
 0x46e   : > { %1148 = vmax.xlane.f32.xlu0 %v1147_v22  ;;  %v1032_v26 = vpop.f32.mrb[14].mxu1  ;;  %v1080_v27 = vpop.f32.mrb[18].mxu0 }
 0x46f   : > { %v3034_v28 = vpop.f32.mrb[15].mxu1  ;;  %v3040_v29 = vpop.f32.mrb[19].mxu0 }
 0x474   : > { %v4046_v30 = vpop.f32.mrb[16].mxu1 }
 0x475   : > { %v3045_v31 = vpop.f32.mrb[17].mxu1 }
 0x476   : > { %v1128_v32 = vpop.f32.mrb[18].mxu1 }
 0x477   : > { %1637 = vrot.lane.b32.xlu1 %v3947_v25, %s3599_s17  ;;  %v3046_v33 = vpop.f32.mrb[19].mxu1 }
 0x484   : > { %1542 = vrot.lane.b32.xlu0 %v3939_v24, %s3600_s24  ;;  %v1153_v24 = vsel %vm1131_vm3, %v4046_v30, -inf }
 0x489   : > { %v1134_v37 = vpop.xlane.xlu1 %1133 }
 0x48a   : > { %v1156_v38 = vsub.f32 %v789_v56, %v1134_v37 }
 0x48c   : > { %v1164_v39 = vmul.f32 1.442695, %v1156_v38 }
 0x48e   : > { %3291 = vpow2.f32 %v1164_v39 }
 0x498   : > { %v4056_v40 = vpop.eup %3291 }
 0x499   : > { %v1212_v41 = vpack.c.bf16 %v4056_v40, %v4056_v40 }
 0x49b   : > { %3050 = vmatmul.mubr.msk.bf16.vlgmr.msra.gmra.mrb[20].mxu0 %vm1131_vm3, %v1212_v41  ;;  %1151 = vmax.xlane.f32.xlu1 %v1150_v42 }
 0x49c   : > { %3060 = vmatpush3.bf16.msra.mxu0 %v1313_v34  ;;  %3061 = vmatprep.mubr.msk.bf16.mxu0 %vm3591_vm1, %v3590_v23 }
 0x49d   : > { %3071 = vmatprep.subr.bf16.mxu0 %v3590_v23 }
 0x4a3   : > { %1154 = vmax.xlane.f32.xlu0 %v1153_v24 }
 0x4ac   : > { %1735 = vrot.lane.b32.xlu1 %v4008_v49, %s3599_s17 }
 0x4b0   : > { %1784 = vrot.lane.b32.xlu1 %v4006_v48, %s3599_s17 }
 0x4b4   : > { %1833 = vrot.lane.b32.xlu1 %v4015_v51, %s3599_s17 }
 0x4b8   : > { %1882 = vrot.lane.b32.xlu1 %v4010_v50, %s3599_s17 }
 0x4b9   : > { %1686 = vrot.lane.b32.xlu0 %v4004_v47, %s3599_s17 }
 0x4bc   : > { %1931 = vrot.lane.b32.xlu1 %v4019_v53, %s3599_s17 }
 0x4bd   : > { %716 = vrot.lane.b32.xlu0 %v3914_v8, %s3593_s30  ;;  %s3605_s30 = smov 20  }
 0x4c0   : > { %1980 = vrot.lane.b32.xlu1 %v4017_v52, %s3599_s17 }
 0x4c1   : > { %718 = vrot.lane.b32.xlu0 %v3914_v8, %s3592_s23  ;;  %s3604_s23 = smov 16  }
 0x4c4   : > { %728 = vrot.lane.b32.xlu1 %v3914_v8, %s3597_s26 }
 0x4c5   : > { %720 = vrot.lane.b32.xlu0 %v3914_v8, %s3594_s29  ;;  %s3606_s29 = smov 24  }
 0x4c8   : > { %2247 = vrot.lane.b32.xlu1 %v4004_v47, %s3600_s24 }
 0x4c9   : > { %722 = vrot.lane.b32.xlu0 %v3914_v8, %s3596_s28  ;;  %s4437_s28 = scalar_lea.vmem [#allocation8], %s2857_s22  ;;  %s2906_s22 = sshll.u32 %s3692_s21, 7 }
 0x4ca   : > { %s4461_s17 = scalar_lea.hbm %s4568_s10, %s2906_s22  ;;  %s2697_s12 = sshll.u32 %s4437_s28, 4  ;;  %s2698_s12 = int_to_ptr.vmem [resolvable:$true] %s2697_s12 }
 0x4cc   : > { %2296 = vrot.lane.b32.xlu1 %v4008_v49, %s3600_s24 }
 0x4cd   : > { %724 = vrot.lane.b32.xlu0 %v3914_v8, %s3595_s27  ;;  %s3607_s27 = smov 28  }
 0x4d0   : > { %2345 = vrot.lane.b32.xlu1 %v4006_v48, %s3600_s24 }
 0x4d1   : > { %726 = vrot.lane.b32.xlu0 %v3914_v8, %s3598_s15 }
 0x4d4   : > { %2443 = vrot.lane.b32.xlu1 %v4010_v50, %s3600_s24 }
 0x4d5   : > { %2197 = vrot.lane.b32.xlu0 %v3947_v25, %s3600_s24 }
 0x4d9   : > { %2394 = vrot.lane.b32.xlu0 %v4015_v51, %s3600_s24 }
 0x4eb   : > { %v1137_v45 = vpop.xlane.xlu0 %1136  ;;  %v1140_v46 = vpop.xlane.xlu1 %1139 }
 0x4ec   : > { %v1157_v47 = vsub.f32 %v4024_v61, %v1137_v45  ;;  %v1158_v48 = vsub.f32 %v4026_v62, %v1140_v46 }
 0x4ee   : > { %v1166_v49 = vmul.f32 1.442695, %v1157_v47  ;;  %v1168_v54 = vmul.f32 1.442695, %v1158_v48 }
 0x4f0   : > { %3293 = vpow2.f32 %v1166_v49 }
 0x4f1   : > { %3295 = vpow2.f32 %v1168_v54 }
 0x4f3   : > { %v1143_v55 = vpop.xlane.xlu0 %1142  ;;  %v1146_v50 = vpop.xlane.xlu1 %1145 }
 0x4f4   : > { %v1159_v56 = vsub.f32 %v4032_v7, %v1143_v55  ;;  %v1160_v25 = vsub.f32 %v4034_v9, %v1146_v50 }
 0x4f6   : > { %v1170_v57 = vmul.f32 1.442695, %v1159_v56  ;;  %v1172_v51 = vmul.f32 1.442695, %v1160_v25 }
 0x4f7   : > { %v1638_v9 = vpop.permute.xlu1 %1637 }
 0x4f8   : > { %3297 = vpow2.f32 %v1170_v57  ;;  %v1643_v22 = vsel %vm748_vm2, %v1638_v9, 0 }
 0x4f9   : > { %3299 = vpow2.f32 %v1172_v51 }
 0x4fa   : > { %v4112_v58 = vpop.eup %3293 }
 0x4fb   : > { %v4114_v59 = vpop.eup %3295  ;;  %v1149_v60 = vpop.xlane.xlu0 %1148  ;;  %v1213_v61 = vpack.c.bf16 %v4112_v58, %v4112_v58 }
 0x4fc   : > { %v1161_v62 = vsub.f32 %v4040_v18, %v1149_v60  ;;  %v1214_v63 = vpack.c.bf16 %v4114_v59, %v4114_v59 }
 0x4fd   : > { %3056 = vmatmul.mubr.msk.bf16.vlgmr.msra.gmra.mrb[20].mxu1 %vm1131_vm3, %v1213_v61 }
 0x4fe   : > { %v1174_v0 = vmul.f32 1.442695, %v1161_v62  ;;  %3062 = vmatmul.mubr.msk.bf16.vlgmr.msra.gmra.mrb[24].mxu0 %vm1131_vm3, %v1214_v63  ;;  %3066 = vmatpush3.bf16.msra.mxu1 %v1359_v43 }
 0x4ff   : > { %3072 = vmatpush3.bf16.msra.mxu0 %v4050_v35  ;;  %3067 = vmatprep.mubr.msk.bf16.mxu1 %vm3591_vm1, %v3590_v23  ;;  %v1543_v7 = vpop.permute.xlu0 %1542 }
 0x500   : > { %3301 = vpow2.f32 %v1174_v0  ;;  %3073 = vmatprep.mubr.msk.bf16.mxu0 %vm3591_vm1, %v3590_v23  ;;  %3077 = vmatprep.subr.bf16.mxu1 %v3590_v23 }
 0x501   : > { %3083 = vmatprep.subr.bf16.mxu0 %v3590_v23 }
 0x502   : > { %v4130_v1 = vpop.eup %3297 }
 0x503   : > { %v4132_v2 = vpop.eup %3299  ;;  %v1215_v3 = vpack.c.bf16 %v4130_v1, %v4130_v1 }
 0x504   : > { %v1216_v4 = vpack.c.bf16 %v4132_v2, %v4132_v2 }
 0x505   : > { %3068 = vmatmul.mubr.msk.bf16.vlgmr.msra.gmra.mrb[24].mxu1 %vm1131_vm3, %v1215_v3 }
 0x506   : > { %3074 = vmatmul.mubr.msk.bf16.vlgmr.msra.gmra.mrb[28].mxu0 %vm1131_vm3, %v1216_v4  ;;  %3078 = vmatpush3.bf16.msra.mxu1 %v1451_v44 }
 0x507   : > { %3084 = vmatpush3.bf16.msra.mxu0 %v4054_v36  ;;  %3079 = vmatprep.mubr.msk.bf16.mxu1 %vm3591_vm1, %v3590_v23 }
 0x508   : > { %3089 = vmatprep.subr.bf16.mxu1 %v3590_v23  ;;  %3085 = vmatprep.mubr.msk.bf16.mxu0 %vm3591_vm1, %v3590_v23 }
 0x509   : > { %3095 = vmatprep.subr.bf16.mxu0 %v3590_v23 }
 0x50a   : > { %v4147_v5 = vpop.eup %3301 }
 0x50b   : > { %v1217_v6 = vpack.c.bf16 %v4147_v5, %v4147_v5 }
 0x50d   : > { %3080 = vmatmul.mubr.msk.bf16.vlgmr.msra.gmra.mrb[28].mxu1 %vm1131_vm3, %v1217_v6 }
 0x50e   : > { %3090 = vmatpush3.bf16.msra.mxu1 %v1543_v7  ;;  %3091 = vmatprep.mubr.msk.bf16.mxu1 %vm3591_vm1, %v3590_v23 }
 0x50f   : > { %3101 = vmatprep.subr.bf16.mxu1 %v3590_v23 }
 0x528   : > { %v1152_v10 = vpop.xlane.xlu1 %1151 }
 0x529   : > { %v1162_v11 = vsub.f32 %v4042_v19, %v1152_v10 }
 0x52b   : > { %v1176_v12 = vmul.f32 1.442695, %v1162_v11 }
 0x52c   : > { %v1736_v17 = vpop.permute.xlu1 %1735 }
 0x52d   : > { %3303 = vpow2.f32 %v1176_v12  ;;  %v1741_v31 = vsel %vm748_vm2, %v1736_v17, 0 }
 0x530   : > { %v1155_v13 = vpop.xlane.xlu0 %1154  ;;  %v1785_v19 = vpop.permute.xlu1 %1784 }
 0x531   : > { %v1163_v14 = vsub.f32 %v4046_v30, %v1155_v13  ;;  %v1790_v35 = vsel %vm748_vm2, %v1785_v19, 0 }
 0x533   : > { %v1178_v15 = vmul.f32 1.442695, %v1163_v14 }
 0x534   : > { %v1687_v16 = vpop.permute.xlu0 %1686  ;;  %v1834_v30 = vpop.permute.xlu1 %1833 }
 0x535   : > { %3305 = vpow2.f32 %v1178_v15  ;;  %v1692_v32 = vsel %vm748_vm2, %v1687_v16, 0  ;;  %v1839_v36 = vsel %vm748_vm2, %v1834_v30, 0 }
 0x537   : > { %v4157_v18 = vpop.eup %3303 }
 0x538   : > { %v717_v20 = vpop.permute.xlu0 %716  ;;  %v1218_v21 = vpack.c.bf16 %v4157_v18, %v4157_v18  ;;  %v1883_v34 = vpop.permute.xlu1 %1882 }
 0x539   : > { %v1888_v39 = vsel %vm748_vm2, %v1883_v34, 0 }
 0x53a   : > { %3086 = vmatmul.mubr.msk.bf16.vlgmr.msra.gmra.mrb[32].mxu0 %vm1131_vm3, %v1218_v21 }
 0x53b   : > { %3096 = vmatpush3.bf16.xpose.msra.mxu0 %v1643_v22  ;;  %3097 = vmatprep.mubr.msk.bf16.mxu0 %vm3591_vm1, %v3590_v23 }
 0x53c   : > { %v719_v26 = vpop.permute.xlu0 %718  ;;  %3107 = vmatprep.subr.bf16.mxu0 %v3590_v23  ;;  %v1932_v37 = vpop.permute.xlu1 %1931 }
 0x53d   : > { %v1937_v41 = vsel %vm748_vm2, %v1932_v37, 0 }
 0x53f   : > { %v4166_v27 = vpop.eup %3305 }
 0x540   : > { %v721_v28 = vpop.permute.xlu0 %720  ;;  %v1219_v29 = vpack.c.bf16 %v4166_v27, %v4166_v27  ;;  %v1981_v42 = vpop.permute.xlu1 %1980 }
 0x541   : > { %v1986_v44 = vsel %vm748_vm2, %v1981_v42, 0 }
 0x542   : > { %3092 = vmatmul.mubr.msk.bf16.vlgmr.msra.gmra.mrb[32].mxu1 %vm1131_vm3, %v1219_v29  ;;  %3098 = vmatmul.mubr.msk.bf16.vlgmr.msra.gmra.mrb[36].mxu0 %vm748_vm2, %v3914_v8 }
 0x543   : > { %3102 = vmatpush3.bf16.xpose.msra.mxu1 %v1692_v32  ;;  %3108 = vmatpush3.bf16.xpose.msra.mxu0 %v1741_v31 }
 0x544   : > { %3103 = vmatprep.mubr.msk.bf16.mxu1 %vm3591_vm1, %v3590_v23  ;;  %3109 = vmatprep.mubr.msk.bf16.mxu0 %vm3591_vm1, %v3590_v23  ;;  %v723_v33 = vpop.permute.xlu0 %722  ;;  %v729_v43 = vpop.permute.xlu1 %728 }
 0x545   : > { %3113 = vmatprep.subr.bf16.mxu1 %v3590_v23  ;;  %3119 = vmatprep.subr.bf16.mxu0 %v3590_v23 }
 0x548   : > { %v725_v8 = vpop.permute.xlu0 %724  ;;  %v2248_v46 = vpop.permute.xlu1 %2247 }
 0x549   : > { %v2253_v47 = vsel %vm2202_vm4, %v2248_v46, 0 }
 0x54a   : > { %3104 = vmatmul.mubr.msk.bf16.vlgmr.msra.gmra.mrb[36].mxu1 %vm748_vm2, %v717_v20  ;;  %3110 = vmatmul.mubr.msk.bf16.vlgmr.msra.gmra.mrb[40].mxu0 %vm748_vm2, %v719_v26 }
 0x54b   : > { %3114 = vmatpush3.bf16.xpose.msra.mxu1 %v1790_v35  ;;  %3120 = vmatpush3.bf16.xpose.msra.mxu0 %v1839_v36 }
 0x54c   : > { %3115 = vmatprep.mubr.msk.bf16.mxu1 %vm3591_vm1, %v3590_v23  ;;  %3121 = vmatprep.mubr.msk.bf16.mxu0 %vm3591_vm1, %v3590_v23  ;;  %v727_v38 = vpop.permute.xlu0 %726 }
 0x54d   : > { %3125 = vmatprep.subr.bf16.mxu1 %v3590_v23  ;;  %3131 = vmatprep.subr.bf16.mxu0 %v3590_v23 }
 0x550   : > { %v2198_v24 = vpop.permute.xlu0 %2197 }
 0x551   : > { %v2204_v45 = vsel %vm2202_vm4, %v2198_v24, 0 }
 0x552   : > { %3116 = vmatmul.mubr.msk.bf16.vlgmr.msra.gmra.mrb[40].mxu1 %vm748_vm2, %v721_v28  ;;  %3122 = vmatmul.mubr.msk.bf16.vlgmr.msra.gmra.mrb[44].mxu0 %vm748_vm2, %v723_v33 }
 0x553   : > { %3126 = vmatpush3.bf16.xpose.msra.mxu1 %v1888_v39  ;;  %3132 = vmatpush3.bf16.xpose.msra.mxu0 %v1937_v41 }
 0x554   : > { %3127 = vmatprep.mubr.msk.bf16.mxu1 %vm3591_vm1, %v3590_v23  ;;  %3133 = vmatprep.mubr.msk.bf16.mxu0 %vm3591_vm1, %v3590_v23 }
 0x555   : > { %3137 = vmatprep.subr.bf16.mxu1 %v3590_v23  ;;  %3143 = vmatprep.subr.bf16.mxu0 %v3590_v23 }
 0x55a   : > { %3128 = vmatmul.mubr.msk.bf16.vlgmr.msra.gmra.mrb[44].mxu1 %vm748_vm2, %v725_v8  ;;  %3134 = vmatmul.mubr.msk.bf16.vlgmr.msra.gmra.mrb[48].mxu0 %vm748_vm2, %v727_v38 }
 0x55b   : > { %3138 = vmatpush3.bf16.xpose.msra.mxu1 %v1986_v44  ;;  %3144 = vmatpush3.bf16.msra.mxu0 %v2204_v45 }
 0x55c   : > { %3139 = vmatprep.mubr.msk.bf16.mxu1 %vm3591_vm1, %v3590_v23  ;;  %3149 = vmatprep.subr.bf16.mxu1 %v3590_v23 }
 0x55d   : > { %3145 = vmatprep.mubr.msk.bf16.mxu0 %vm3591_vm1, %v3590_v23  ;;  %3155 = vmatprep.subr.bf16.mxu0 %v3590_v23 }
 0x562   : > { %3140 = vmatmul.mubr.msk.bf16.vlgmr.msra.gmra.mrb[48].mxu1 %vm748_vm2, %v729_v43 }
 0x563   : > { %3150 = vmatpush3.bf16.msra.mxu1 %v2253_v47  ;;  %3151 = vmatprep.mubr.msk.bf16.mxu1 %vm3591_vm1, %v3590_v23 }
 0x564   : > { %3161 = vmatprep.subr.bf16.mxu1 %v3590_v23 }
 0x56e   : > { %v4216_v48 = vpop.f32.mrb[20].mxu0 }
 0x56f   : > { %v3051_v49 = vpop.f32.mrb[21].mxu0 }
 0x570   : > { %v1263_v54 = vpop.f32.mrb[22].mxu0 }
 0x571   : > { %v3052_v55 = vpop.f32.mrb[23].mxu0 }
 0x5d0   : > { %v4218_v50 = vpop.f32.mrb[20].mxu1 }
 0x5d1   : > { %v4220_v56 = vpop.f32.mrb[24].mxu0  ;;  %v3057_v25 = vpop.f32.mrb[21].mxu1 }
 0x5d2   : > { %v3063_v57 = vpop.f32.mrb[25].mxu0  ;;  %v1309_v51 = vpop.f32.mrb[22].mxu1 }
 0x5d3   : > { %v1355_v60 = vpop.f32.mrb[26].mxu0  ;;  %v3058_v61 = vpop.f32.mrb[23].mxu1 }
 0x5d4   : > { %v3064_v62 = vpop.f32.mrb[27].mxu0 }
 0x5d8   : > { %v4222_v63 = vpop.f32.mrb[24].mxu1 }
 0x5d9   : > { %v4224_v0 = vpop.f32.mrb[28].mxu0  ;;  %v3069_v3 = vpop.f32.mrb[25].mxu1 }
 0x5da   : > { %v3075_v4 = vpop.f32.mrb[29].mxu0  ;;  %v1401_v6 = vpop.f32.mrb[26].mxu1 }
 0x5db   : > { %v1447_v7 = vpop.f32.mrb[30].mxu0  ;;  %v3070_v9 = vpop.f32.mrb[27].mxu1 }
 0x5dc   : > { %v3076_v10 = vpop.f32.mrb[31].mxu0 }
 0x5e0   : > { %v4226_v11 = vpop.f32.mrb[28].mxu1 }
 0x5e1   : > { %v3081_v12 = vpop.f32.mrb[29].mxu1 }
 0x5e2   : > { %v1493_v13 = vpop.f32.mrb[30].mxu1 }
 0x5e3   : > { %v3082_v14 = vpop.f32.mrb[31].mxu1 }
 0x60d   : > { %v4228_v15 = vpop.f32.mrb[32].mxu0 }
 0x60e   : > { %v3087_v16 = vpop.f32.mrb[33].mxu0 }
 0x60f   : > { %v1539_v17 = vpop.f32.mrb[34].mxu0 }
 0x610   : > { %v3088_v20 = vpop.f32.mrb[35].mxu0 }
 0x615   : > { %v4230_v21 = vpop.f32.mrb[32].mxu1  ;;  %v4232_v22 = vpop.f32.mrb[36].mxu0 }
 0x616   : > { %v3093_v19 = vpop.f32.mrb[33].mxu1  ;;  %v3099_v26 = vpop.f32.mrb[37].mxu0  ;;  %v2029_v28 = vsel %vm1625_vm5, %v4232_v22, -inf }
 0x617   : > { %v1585_v29 = vpop.f32.mrb[34].mxu1  ;;  %2030 = vmax.xlane.f32.xlu0 %v2029_v28  ;;  %v4236_v30 = vpop.f32.mrb[38].mxu0 }
 0x618   : > { %v3094_v31 = vpop.f32.mrb[35].mxu1  ;;  %v3100_v32 = vpop.f32.mrb[39].mxu0  ;;  %v2032_v33 = vsel %vm1625_vm5, %v4236_v30, -inf }
 0x619   : > { %2033 = vmax.xlane.f32.xlu1 %v2032_v33  ;;  %v1192_v33 = vsel %vm1131_vm3, %v4132_v2, 0.0  ;;  %v2297_v2 = vpop.permute.xlu1 %2296 }
 0x61d   : > { %v4240_v34 = vpop.f32.mrb[36].mxu1  ;;  %v4242_v35 = vpop.f32.mrb[40].mxu0 }
 0x61e   : > { %v3105_v36 = vpop.f32.mrb[37].mxu1  ;;  %v3111_v8 = vpop.f32.mrb[41].mxu0  ;;  %v2035_v37 = vsel %vm1625_vm5, %v4240_v34, -inf  ;;  %v2041_v43 = vsel %vm1625_vm5, %v4242_v35, -inf }
 0x61f   : > { %v4246_v38 = vpop.f32.mrb[38].mxu1  ;;  %2036 = vmax.xlane.f32.xlu0 %v2035_v37  ;;  %v4248_v39 = vpop.f32.mrb[42].mxu0  ;;  %v1183_v36 = vsel %vm1131_vm3, %v4112_v58, 0.0  ;;  %v1198_v8 = vsel %vm1131_vm3, %v4157_v18, 0.0  ;;  %v1186_v37 = vsel %vm1131_vm3, %v4114_v59, 0.0  ;;  %v1201_v58 = vsel %vm1131_vm3, %v4166_v27, 0.0 }
 0x620   : > { %v3106_v41 = vpop.f32.mrb[39].mxu1  ;;  %v3112_v42 = vpop.f32.mrb[43].mxu0  ;;  %v2044_v24 = vsel %vm1625_vm5, %v4248_v39, -inf  ;;  %v2038_v49 = vsel %vm1625_vm5, %v4246_v38, -inf }
 0x621   : > { %2045 = vmax.xlane.f32.xlu1 %v2044_v24  ;;  %v4314_v41 = vpop.permute.xlu1 %2345  ;;  %v4316_v18 = vpop.permute.xlu0 %2394 }
 0x623   : > { %2042 = vmax.xlane.f32.xlu0 %v2041_v43 }
 0x625   : > { %v4254_v44 = vpop.f32.mrb[40].mxu1  ;;  %v4256_v45 = vpop.f32.mrb[44].mxu0 }
 0x626   : > { %v3117_v46 = vpop.f32.mrb[41].mxu1  ;;  %v3123_v47 = vpop.f32.mrb[45].mxu0  ;;  %v2047_v60 = vsel %vm1625_vm5, %v4254_v44, -inf  ;;  %v2053_v7 = vsel %vm1625_vm5, %v4256_v45, -inf }
 0x627   : > { %2039 = vmax.xlane.f32.xlu0 %v2038_v49  ;;  %v4260_v54 = vpop.f32.mrb[42].mxu1  ;;  %v4262_v55 = vpop.f32.mrb[46].mxu0 }
 0x628   : > { %v3118_v25 = vpop.f32.mrb[43].mxu1  ;;  %v3124_v57 = vpop.f32.mrb[47].mxu0  ;;  %v2050_v51 = vsel %vm1625_vm5, %v4260_v54, -inf  ;;  %v2056_v61 = vsel %vm1625_vm5, %v4262_v55, -inf }
 0x629   : > { %2051 = vmax.xlane.f32.xlu1 %v2050_v51  ;;  %v4318_v42 = vpop.permute.xlu1 %2443 }
 0x62b   : > { %2048 = vmax.xlane.f32.xlu0 %v2047_v60 }
 0x62d   : > { %2057 = vmax.xlane.f32.xlu1 %v2056_v61  ;;  %v4270_v62 = vpop.f32.mrb[44].mxu1  ;;  %v4272_v3 = vpop.f32.mrb[48].mxu0 }
 0x62e   : > { %v3129_v4 = vpop.f32.mrb[45].mxu1  ;;  %v3135_v6 = vpop.f32.mrb[49].mxu0  ;;  %v2059_v16 = vsel %vm1625_vm5, %v4270_v62, -inf  ;;  %v2065_v26 = vsel %vm1625_vm5, %v4272_v3, -inf }
 0x62f   : > { %2054 = vmax.xlane.f32.xlu0 %v2053_v7  ;;  %v4276_v9 = vpop.f32.mrb[46].mxu1  ;;  %v4278_v10 = vpop.f32.mrb[50].mxu0 }
 0x630   : > { %v3130_v12 = vpop.f32.mrb[47].mxu1  ;;  %v3136_v13 = vpop.f32.mrb[51].mxu0  ;;  %v2062_v14 = vsel %vm1625_vm5, %v4276_v9, -inf  ;;  %v2068_v17 = vsel %vm1625_vm5, %v4278_v10, -inf }
 0x631   : > { %2063 = vmax.xlane.f32.xlu1 %v2062_v14  ;;  %v2302_v14 = vsel %vm2202_vm4, %v2297_v2, 0 }
 0x633   : > { %2060 = vmax.xlane.f32.xlu0 %v2059_v16 }
 0x635   : > { %2069 = vmax.xlane.f32.xlu1 %v2068_v17  ;;  %v4286_v20 = vpop.f32.mrb[48].mxu1 }
 0x636   : > { %v3141_v19 = vpop.f32.mrb[49].mxu1  ;;  %v2071_v32 = vsel %vm1625_vm5, %v4286_v20, -inf }
 0x637   : > { %2066 = vmax.xlane.f32.xlu0 %v2065_v26  ;;  %v4290_v28 = vpop.f32.mrb[50].mxu1 }
 0x638   : > { %v3142_v29 = vpop.f32.mrb[51].mxu1  ;;  %v2074_v31 = vsel %vm1625_vm5, %v4290_v28, -inf }
 0x639   : > { %2075 = vmax.xlane.f32.xlu1 %v2074_v31 }
 0x63b   : > { %2072 = vmax.xlane.f32.xlu0 %v2071_v32 }
 0x64a   : > { %2541 = vrot.lane.b32.xlu1 %v4017_v52, %s3600_s24  ;;  %v1189_v52 = vsel %vm1131_vm3, %v4130_v1, 0.0 }
 0x651   : > { %2492 = vrot.lane.b32.xlu0 %v4019_v53, %s3600_s24  ;;  %v1195_v53 = vsel %vm1131_vm3, %v4147_v5, 0.0  ;;  %s3475_s24 = scalar_lea.vmem %s2698_s12, 128 }
 0x652   : > { %p3476_p3 = scmp.ne.s32.totalorder %s2698_s12, %s3475_s24 }
 0x654   : > { %p3477_p7 = pnand %p3476_p3, %p3762_p12 }
 0x656   : > { %p3478_p9 = pneg %p3477_p7 }
 0x66e   : > { %1193 = vadd.xlane.f32.xlu1 %v1192_v33 }
 0x670   : > { %1184 = vadd.xlane.f32.xlu0 %v1183_v36 }
 0x672   : > { %1199 = vadd.xlane.f32.xlu1 %v1198_v8 }
 0x674   : > { %1187 = vadd.xlane.f32.xlu0 %v1186_v37 }
 0x678   : > { %1190 = vadd.xlane.f32.xlu0 %v1189_v52 }
 0x67c   : > { %1196 = vadd.xlane.f32.xlu0 %v1195_v53 }
 0x680   : > { %1202 = vadd.xlane.f32.xlu0 %v1201_v58 }
 0x6a4   : > { %v2031_v59 = vpop.xlane.xlu0 %2030 }
 0x6a5   : > { %v2077_v24 = vsub.f32 %v4232_v22, %v2031_v59 }
 0x6a6   : > { %v2034_v1 = vpop.xlane.xlu1 %2033 }
 0x6a7   : > { %v2093_v43 = vmul.f32 1.442695, %v2077_v24  ;;  %v2078_v46 = vsub.f32 %v4236_v30, %v2034_v1 }
 0x6a9   : > { %v2095_v5 = vmul.f32 1.442695, %v2078_v46  ;;  %3307 = vpow2.f32 %v2093_v43 }
 0x6ab   : > { %3309 = vpow2.f32 %v2095_v5 }
 0x6ac   : > { %v2037_v47 = vpop.xlane.xlu0 %2036 }
 0x6ad   : > { %v2079_v27 = vsub.f32 %v4240_v34, %v2037_v47 }
 0x6ae   : > { %v2046_v49 = vpop.xlane.xlu1 %2045 }
 0x6af   : > { %v2097_v25 = vmul.f32 1.442695, %v2079_v27  ;;  %v2082_v57 = vsub.f32 %v4248_v39, %v2046_v49 }
 0x6b0   : > { %v2043_v51 = vpop.xlane.xlu0 %2042 }
 0x6b1   : > { %3311 = vpow2.f32 %v2097_v25  ;;  %v2103_v60 = vmul.f32 1.442695, %v2082_v57  ;;  %v2081_v61 = vsub.f32 %v4242_v35, %v2043_v51  ;;  %v2351_v25 = vsel %vm2202_vm4, %v4314_v41, 0 }
 0x6b3   : > { %3313 = vpow2.f32 %v2103_v60  ;;  %v2101_v22 = vmul.f32 1.442695, %v2081_v61  ;;  %v4325_v4 = vpop.eup %3307 }
 0x6b4   : > { %v2040_v30 = vpop.xlane.xlu0 %2039 }
 0x6b5   : > { %v4327_v6 = vpop.eup %3309  ;;  %3315 = vpow2.f32 %v2101_v22  ;;  %v2080_v7 = vsub.f32 %v4246_v38, %v2040_v30 }
 0x6b6   : > { %v2052_v34 = vpop.xlane.xlu1 %2051  ;;  %v2189_v12 = vpack.c.bf16 %v4327_v6, %v4325_v4 }
 0x6b7   : > { %v2099_v39 = vmul.f32 1.442695, %v2080_v7  ;;  %v2084_v13 = vsub.f32 %v4260_v54, %v2052_v34 }
 0x6b8   : > { %v2049_v35 = vpop.xlane.xlu0 %2048  ;;  %3146 = vmatmul.mubr.msk.bf16.vlgmr.msra.gmra.mrb[52].mxu0 %vm1625_vm5, %v2189_v12 }
 0x6b9   : > { %3317 = vpow2.f32 %v2099_v39  ;;  %v2107_v16 = vmul.f32 1.442695, %v2084_v13  ;;  %v2083_v17 = vsub.f32 %v4254_v44, %v2049_v35  ;;  %3156 = vmatpush3.bf16.msra.mxu0 %v2302_v14  ;;  %3157 = vmatprep.mubr.msk.bf16.mxu0 %vm3591_vm1, %v3590_v23 }
 0x6ba   : > { %v2058_v38 = vpop.xlane.xlu1 %2057  ;;  %3167 = vmatprep.subr.bf16.mxu0 %v3590_v23 }
 0x6bb   : > { %v3312_v19 = vpop.eup %3311  ;;  %v2105_v26 = vmul.f32 1.442695, %v2083_v17  ;;  %v2086_v54 = vsub.f32 %v4262_v55, %v2058_v38  ;;  %3319 = vpow2.f32 %v2107_v16  ;;  %v2449_v17 = vsel %vm2202_vm4, %v4318_v42, 0 }
 0x6bc   : > { %v2055_v29 = vpop.xlane.xlu0 %2054  ;;  %v2131_v31 = vsel %vm1625_vm5, %v3312_v19, 0.0 }
 0x6bd   : > { %v3314_v32 = vpop.eup %3313  ;;  %3321 = vpow2.f32 %v2105_v26  ;;  %v2111_v33 = vmul.f32 1.442695, %v2086_v54  ;;  %v2085_v44 = vsub.f32 %v4256_v45, %v2055_v29  ;;  %2132 = vadd.xlane.f32.xlu1 %v2131_v31  ;;  %v2400_v45 = vsel %vm2202_vm4, %v4316_v18, 0 }
 0x6be   : > { %v2064_v36 = vpop.xlane.xlu1 %2063  ;;  %v2140_v55 = vsel %vm1625_vm5, %v3314_v32, 0.0 }
 0x6bf   : > { %v3316_v8 = vpop.eup %3315  ;;  %3323 = vpow2.f32 %v2111_v33  ;;  %v2109_v37 = vmul.f32 1.442695, %v2085_v44  ;;  %v2088_v52 = vsub.f32 %v4276_v9, %v2064_v36 }
 0x6c0   : > { %v2061_v53 = vpop.xlane.xlu0 %2060  ;;  %v2137_v58 = vsel %vm1625_vm5, %v3316_v8, 0.0  ;;  %v2191_v2 = vpack.c.bf16 %v3314_v32, %v3316_v8 }
 0x6c1   : > { %3325 = vpow2.f32 %v2109_v37  ;;  %v2115_v59 = vmul.f32 1.442695, %v2088_v52  ;;  %v2087_v24 = vsub.f32 %v4270_v62, %v2061_v53  ;;  %2138 = vadd.xlane.f32.xlu0 %v2137_v58  ;;  %2141 = vadd.xlane.f32.xlu1 %v2140_v55  ;;  %v1180_v58 = vsel %vm1131_vm3, %v4056_v40, 0.0 }
 0x6c2   : > { %3158 = vmatmul.mubr.msk.bf16.vlgmr.msra.gmra.mrb[56].mxu0 %vm1625_vm5, %v2191_v2  ;;  %v2070_v1 = vpop.xlane.xlu1 %2069  ;;  %v2128_v2 = vsel %vm1625_vm5, %v4327_v6, 0.0 }
 0x6c3   : > { %v3318_v43 = vpop.eup %3317  ;;  %v2113_v9 = vmul.f32 1.442695, %v2087_v24  ;;  %3168 = vmatpush3.bf16.msra.mxu0 %v2400_v45  ;;  %v2090_v46 = vsub.f32 %v4278_v10, %v2070_v1  ;;  %3169 = vmatprep.mubr.msk.bf16.mxu0 %vm3591_vm1, %v3590_v23  ;;  %3327 = vpow2.f32 %v2115_v59 }
 0x6c4   : > { %v2067_v5 = vpop.xlane.xlu0 %2066  ;;  %v2134_v62 = vsel %vm1625_vm5, %v3318_v43, 0.0  ;;  %v2190_v47 = vpack.c.bf16 %v3318_v43, %v3312_v19  ;;  %3179 = vmatprep.subr.bf16.mxu0 %v3590_v23 }
 0x6c5   : > { %3329 = vpow2.f32 %v2113_v9  ;;  %v2119_v18 = vmul.f32 1.442695, %v2090_v46  ;;  %v2089_v27 = vsub.f32 %v4272_v3, %v2067_v5  ;;  %2135 = vadd.xlane.f32.xlu0 %v2134_v62  ;;  %v3320_v49 = vpop.eup %3319 }
 0x6c6   : > { %3152 = vmatmul.mubr.msk.bf16.vlgmr.msra.gmra.mrb[52].mxu1 %vm1625_vm5, %v2190_v47  ;;  %v2076_v10 = vpop.xlane.xlu1 %2075  ;;  %v2146_v38 = vsel %vm1625_vm5, %v3320_v49, 0.0 }
 0x6c7   : > { %v3322_v57 = vpop.eup %3321  ;;  %3331 = vpow2.f32 %v2119_v18  ;;  %v2117_v51 = vmul.f32 1.442695, %v2089_v27  ;;  %3162 = vmatpush3.bf16.msra.mxu1 %v2351_v25  ;;  %v2092_v60 = vsub.f32 %v4290_v28, %v2076_v10  ;;  %3163 = vmatprep.mubr.msk.bf16.mxu1 %vm3591_vm1, %v3590_v23 }
 0x6c8   : > { %v2073_v61 = vpop.xlane.xlu0 %2072  ;;  %v2143_v3 = vsel %vm1625_vm5, %v3322_v57, 0.0  ;;  %3173 = vmatprep.subr.bf16.mxu1 %v3590_v23  ;;  %v2192_v22 = vpack.c.bf16 %v3320_v49, %v3322_v57 }
 0x6c9   : > { %v3324_v30 = vpop.eup %3323  ;;  %3333 = vpow2.f32 %v2117_v51  ;;  %v2123_v41 = vmul.f32 1.442695, %v2092_v60  ;;  %v2091_v7 = vsub.f32 %v4286_v20, %v2073_v61  ;;  %2144 = vadd.xlane.f32.xlu1 %v2143_v3 }
 0x6ca   : > { %v2152_v13 = vsel %vm1625_vm5, %v3324_v30, 0.0  ;;  %v2542_v29 = vpop.permute.xlu1 %2541 }
 0x6cb   : > { %v3326_v34 = vpop.eup %3325  ;;  %v2121_v12 = vmul.f32 1.442695, %v2091_v7  ;;  %3335 = vpow2.f32 %v2123_v41  ;;  %v2547_v36 = vsel %vm2202_vm4, %v2542_v29, 0 }
 0x6cc   : > { %v2493_v39 = vpop.permute.xlu0 %2492  ;;  %v2149_v28 = vsel %vm1625_vm5, %v3326_v34, 0.0  ;;  %v2193_v14 = vpack.c.bf16 %v3324_v30, %v3326_v34 }
 0x6cd   : > { %3337 = vpow2.f32 %v2121_v12  ;;  %v2498_v35 = vsel %vm2202_vm4, %v2493_v39, 0  ;;  %2150 = vadd.xlane.f32.xlu0 %v2149_v28  ;;  %2153 = vadd.xlane.f32.xlu1 %v2152_v13  ;;  %v3328_v16 = vpop.eup %3327 }
 0x6ce   : > { %3164 = vmatmul.mubr.msk.bf16.vlgmr.msra.gmra.mrb[56].mxu1 %vm1625_vm5, %v2192_v22  ;;  %3170 = vmatmul.mubr.msk.bf16.vlgmr.msra.gmra.mrb[60].mxu0 %vm1625_vm5, %v2193_v14  ;;  %v2158_v37 = vsel %vm1625_vm5, %v3328_v16, 0.0 }
 0x6cf   : > { %v3330_v20 = vpop.eup %3329  ;;  %3174 = vmatpush3.bf16.msra.mxu1 %v2449_v17  ;;  %3180 = vmatpush3.bf16.msra.mxu0 %v2498_v35 }
 0x6d0   : > { %v2155_v19 = vsel %vm1625_vm5, %v3330_v20, 0.0  ;;  %3175 = vmatprep.mubr.msk.bf16.mxu1 %vm3591_vm1, %v3590_v23  ;;  %3185 = vmatprep.subr.bf16.mxu1 %v3590_v23  ;;  %v2194_v26 = vpack.c.bf16 %v3328_v16, %v3330_v20 }
 0x6d1   : > { %v3332_v54 = vpop.eup %3331  ;;  %2147 = vadd.xlane.f32.xlu0 %v2146_v38  ;;  %2156 = vadd.xlane.f32.xlu1 %v2155_v19 }
 0x6d2   : > { %3181 = vmatprep.mubr.msk.bf16.mxu0 %vm3591_vm1, %v3590_v23  ;;  %v2164_v32 = vsel %vm1625_vm5, %v3332_v54, 0.0 }
 0x6d3   : > { %v3334_v42 = vpop.eup %3333 }
 0x6d4   : > { %v2161_v31 = vsel %vm1625_vm5, %v3334_v42, 0.0  ;;  %v2195_v33 = vpack.c.bf16 %v3332_v54, %v3334_v42 }
 0x6d5   : > { %2162 = vadd.xlane.f32.xlu0 %v2161_v31  ;;  %2165 = vadd.xlane.f32.xlu1 %v2164_v32  ;;  %v3336_v44 = vpop.eup %3335 }
 0x6d6   : > { %3176 = vmatmul.mubr.msk.bf16.vlgmr.msra.gmra.mrb[60].mxu1 %vm1625_vm5, %v2194_v26  ;;  %3182 = vmatmul.mubr.msk.bf16.vlgmr.msra.gmra.mrb[64].mxu0 %vm1625_vm5, %v2195_v33  ;;  %v2170_v55 = vsel %vm1625_vm5, %v3336_v44, 0.0 }
 0x6d7   : > { %v3338_v8 = vpop.eup %3337  ;;  %3186 = vmatpush3.bf16.msra.mxu1 %v2547_v36  ;;  %3187 = vmatprep.mubr.msk.bf16.mxu1 %vm3591_vm1, %v3590_v23  ;;  %v2125_v23 = vsel %vm1625_vm5, %v4325_v4, 0.0 }
 0x6d8   : > { %v2167_v52 = vsel %vm1625_vm5, %v3338_v8, 0.0  ;;  %v2196_v53 = vpack.c.bf16 %v3336_v44, %v3338_v8 }
 0x6d9   : > { %2159 = vadd.xlane.f32.xlu0 %v2158_v37  ;;  %2168 = vadd.xlane.f32.xlu1 %v2167_v52 }
 0x6dd   : > { %1181 = vadd.xlane.f32.xlu1 %v1180_v58  ;;  %2171 = vadd.xlane.f32.xlu0 %v2170_v55 }
 0x6de   : > { %3188 = vmatmul.mubr.msk.bf16.vlgmr.msra.gmra.mrb[64].mxu1 %vm1625_vm5, %v2196_v53 }
 0x6e1   : > { %2129 = vadd.xlane.f32.xlu1 %v2128_v2  ;;  %2126 = vadd.xlane.f32.xlu0 %v2125_v23 }
 0x6fb   : > { %v1194_v24 = vpop.xlane.xlu1 %1193 }
 0x6fd   : > { %v1185_v59 = vpop.xlane.xlu0 %1184 }
 0x6fe   : > { %3339 = vrcp.f32 %v1185_v59 }
 0x6ff   : > { %v1200_v40 = vpop.xlane.xlu1 %1199 }
 0x701   : > { %v1188_v45 = vpop.xlane.xlu0 %1187 }
 0x702   : > { %3341 = vrcp.f32 %v1188_v45 }
 0x703   : > { %3343 = vrcp.f32 %v1194_v24 }
 0x705   : > { %v1191_v1 = vpop.xlane.xlu0 %1190 }
 0x706   : > { %3345 = vrcp.f32 %v1191_v1 }
 0x707   : > { %3347 = vrcp.f32 %v1200_v40 }
 0x708   : > { %v3340_v43 = vpop.eup %3339 }
 0x709   : > { %v1197_v9 = vpop.xlane.xlu0 %1196  ;;  %v1589_v46 = vmul.f32 %v3340_v43, %v4218_v50 }
 0x70a   : > { %3349 = vrcp.f32 %v1197_v9 }
 0x70b   : > { %1597 = vrot.lane.b32.xlu0 %v1589_v46, %s3601_s0 }
 0x70c   : > { %v3342_v4 = vpop.eup %3341 }
 0x70d   : > { %v1203_v6 = vpop.xlane.xlu0 %1202  ;;  %v1590_v5 = vmul.f32 %v3342_v4, %v4220_v56  ;;  %v3344_v62 = vpop.eup %3343 }
 0x70e   : > { %3351 = vrcp.f32 %v1203_v6  ;;  %v1592_v27 = vmul.f32 %v3344_v62, %v4224_v0 }
 0x70f   : > { %1601 = vrot.lane.b32.xlu1 %v1590_v5, %s3602_s25 }
 0x710   : > { %v3346_v47 = vpop.eup %3345 }
 0x711   : > { %v1591_v18 = vmul.f32 %v3346_v47, %v4222_v63  ;;  %v3348_v49 = vpop.eup %3347 }
 0x712   : > { %v1594_v25 = vmul.f32 %v3348_v49, %v4228_v15 }
 0x713   : > { %1605 = vrot.lane.b32.xlu0 %v1591_v18, %s3603_s14  ;;  %1609 = vrot.lane.b32.xlu1 %v1592_v27, %s3604_s23 }
 0x714   : > { %v3350_v50 = vpop.eup %3349 }
 0x715   : > { %v1593_v56 = vmul.f32 %v3350_v50, %v4226_v11 }
 0x717   : > { %1613 = vrot.lane.b32.xlu0 %v1593_v56, %s3605_s30  ;;  %1617 = vrot.lane.b32.xlu1 %v1594_v25, %s3606_s29 }
 0x718   : > { %v3352_v63 = vpop.eup %3351 }
 0x719   : > { %v1595_v0 = vmul.f32 %v3352_v63, %v4230_v21 }
 0x71b   : > { %1621 = vrot.lane.b32.xlu0 %v1595_v0, %s3607_s27 }
 0x74a   : > { %v2133_v10 = vpop.xlane.xlu1 %2132 }
 0x74e   : > { %v2142_v57 = vpop.xlane.xlu1 %2141  ;;  %v2139_v51 = vpop.xlane.xlu0 %2138 }
 0x752   : > { %v2136_v11 = vpop.xlane.xlu0 %2135 }
 0x756   : > { %v2145_v60 = vpop.xlane.xlu1 %2144 }
 0x75a   : > { %v4409_v61 = vpop.xlane.xlu1 %2153  ;;  %v2151_v15 = vpop.xlane.xlu0 %2150 }
 0x75e   : > { %v4411_v3 = vpop.xlane.xlu1 %2156  ;;  %v2148_v22 = vpop.xlane.xlu0 %2147 }
 0x762   : > { %v4413_v30 = vpop.xlane.xlu1 %2165  ;;  %v4415_v41 = vpop.xlane.xlu0 %2162 }
 0x766   : > { %v4417_v7 = vpop.xlane.xlu1 %2168  ;;  %v4419_v21 = vpop.xlane.xlu0 %2159 }
 0x76a   : > { %v1182_v34 = vpop.xlane.xlu1 %1181  ;;  %v4421_v12 = vpop.xlane.xlu0 %2171 }
 0x76b   : > { %3353 = vrcp.f32 %v1182_v34 }
 0x76e   : > { %v2127_v39 = vpop.xlane.xlu0 %2126  ;;  %v2130_v28 = vpop.xlane.xlu1 %2129 }
 0x76f   : > { %3355 = vrcp.f32 %v2127_v39 }
 0x770   : > { %3357 = vrcp.f32 %v2130_v28 }
 0x771   : > { %3359 = vrcp.f32 %v2139_v51 }
 0x772   : > { %3361 = vrcp.f32 %v2133_v10 }
 0x773   : > { %3363 = vrcp.f32 %v2136_v11 }
 0x774   : > { %3365 = vrcp.f32 %v2142_v57 }
 0x775   : > { %v3354_v13 = vpop.eup %3353  ;;  %3367 = vrcp.f32 %v2151_v15 }
 0x776   : > { %v1588_v16 = vmul.f32 %v3354_v13, %v4216_v48  ;;  %3369 = vrcp.f32 %v2145_v60 }
 0x777   : > { %3371 = vrcp.f32 %v2148_v22 }
 0x778   : > { %3373 = vrcp.f32 %v4409_v61 }
 0x779   : > { %v3356_v48 = vpop.eup %3355  ;;  %3375 = vrcp.f32 %v4415_v41 }
 0x77a   : > { %v3358_v36 = vpop.eup %3357  ;;  %3377 = vrcp.f32 %v4411_v3 }
 0x77b   : > { %v3360_v2 = vpop.eup %3359  ;;  %3379 = vrcp.f32 %v4419_v21 }
 0x77c   : > { %v3362_v1 = vpop.eup %3361  ;;  %3381 = vrcp.f32 %v4413_v30 }
 0x77d   : > { %v1598_v14 = vpop.permute.xlu0 %1597  ;;  %v3364_v5 = vpop.eup %3363  ;;  %3383 = vrcp.f32 %v4421_v12 }
 0x77e   : > { %v1624_v17 = vsel %vm748_vm2, %v1588_v16, %v1598_v14  ;;  %v3366_v47 = vpop.eup %3365  ;;  %3385 = vrcp.f32 %v4417_v7 }
 0x77f   : > { %v3368_v18 = vpop.eup %3367 }
 0x780   : > { %v3370_v57 = vpop.eup %3369 }
 0x781   : > { %v1602_v35 = vpop.permute.xlu1 %1601  ;;  %v3372_v61 = vpop.eup %3371 }
 0x782   : > { %v1626_v20 = vsel %vm1625_vm5, %v1624_v17, %v1602_v35  ;;  %v3374_v3 = vpop.eup %3373 }
 0x783   : > { %v3376_v22 = vpop.eup %3375 }
 0x784   : > { %v3378_v35 = vpop.eup %3377 }
 0x785   : > { %v1606_v38 = vpop.permute.xlu0 %1605  ;;  %v1610_v19 = vpop.permute.xlu1 %1609 }
 0x786   : > { %v1628_v26 = vsel %vm1627_vm6, %v1626_v20, %v1606_v38  ;;  %v3380_v12 = vpop.eup %3379 }
 0x787   : > { %v1629_v54 = vsel %vm1131_vm3, %v1628_v26, %v1610_v19 }
 0x789   : > { %v1614_v42 = vpop.permute.xlu0 %1613  ;;  %v1618_v31 = vpop.permute.xlu1 %1617 }
 0x78a   : > { %v1631_v29 = vsel %vm1630_vm7, %v1629_v54, %v1614_v42 }
 0x78b   : > { %v2240_v32 = vpop.f32.mrb[52].mxu0  ;;  %v1633_v8 = vsel %vm1632_vm8, %v1631_v29, %v1618_v31 }
 0x78c   : > { %v4429_v33 = vmul.f32 %v3356_v48, %v2240_v32  ;;  %v3147_v44 = vpop.f32.mrb[53].mxu0 }
 0x78d   : > { %v2243_v37 = vpop.f32.mrb[54].mxu0  ;;  %v1622_v52 = vpop.permute.xlu0 %1621 }
 0x78e   : > { %v4432_v53 = vmul.f32 %v3358_v36, %v2243_v37  ;;  %v1635_v58 = vsel %vm1634_vm9, %v1633_v8, %v1622_v52  ;;  %v3148_v55 = vpop.f32.mrb[55].mxu0 }
 0x78f   : > { %1636 = vst.msk [vmem:[%s4437_s28] sm:$0xff] %vm471_vm0, %v1635_v58 }
 0x795   : > { %v2338_v23 = vpop.f32.mrb[56].mxu0 }
 0x796   : > { %v2594_v59 = vmul.f32 %v3360_v2, %v2338_v23  ;;  %v3159_v24 = vpop.f32.mrb[57].mxu0 }
 0x797   : > { %v2341_v45 = vpop.f32.mrb[58].mxu0 }
 0x798   : > { %v3160_v40 = vpop.f32.mrb[59].mxu0  ;;  %2616 = vrot.lane.b32.xlu0 %v2594_v59, %s3602_s25  ;;  %v2595_v50 = vmul.f32 %v3366_v47, %v2341_v45 }
 0x799   : > { %v2289_v43 = vpop.f32.mrb[52].mxu1 }
 0x79a   : > { %v2592_v9 = vmul.f32 %v3362_v1, %v2289_v43  ;;  %v3153_v46 = vpop.f32.mrb[53].mxu1 }
 0x79b   : > { %v2292_v4 = vpop.f32.mrb[54].mxu1 }
 0x79c   : > { %v3154_v6 = vpop.f32.mrb[55].mxu1  ;;  %2608 = vrot.lane.b32.xlu1 %v2592_v9, %s3601_s0  ;;  %v2593_v62 = vmul.f32 %v3364_v5, %v2292_v4 }
 0x7a0   : > { %2610 = vrot.lane.b32.xlu1 %v2593_v62, %s3601_s0  ;;  %s3608_s0 = smov [#allocation8]  }
 0x7a1   : > { %v2387_v27 = vpop.f32.mrb[56].mxu1  ;;  %v2436_v49 = vpop.f32.mrb[60].mxu0 }
 0x7a2   : > { %v2598_v56 = vmul.f32 %v3368_v18, %v2436_v49  ;;  %v3165_v25 = vpop.f32.mrb[57].mxu1  ;;  %v3171_v63 = vpop.f32.mrb[61].mxu0  ;;  %v2596_v11 = vmul.f32 %v3370_v57, %v2387_v27 }
 0x7a3   : > { %v2390_v0 = vpop.f32.mrb[58].mxu1  ;;  %v2439_v10 = vpop.f32.mrb[62].mxu0 }
 0x7a4   : > { %v3166_v51 = vpop.f32.mrb[59].mxu1  ;;  %v3172_v60 = vpop.f32.mrb[63].mxu0  ;;  %2632 = vrot.lane.b32.xlu0 %v2598_v56, %s3604_s23  ;;  %2618 = vrot.lane.b32.xlu1 %v2595_v50, %s3602_s25  ;;  %v2597_v15 = vmul.f32 %v3372_v61, %v2390_v0  ;;  %v2599_v34 = vmul.f32 %v3374_v3, %v2439_v10 }
 0x7a8   : > { %2626 = vrot.lane.b32.xlu0 %v2597_v15, %s3603_s14  ;;  %2624 = vrot.lane.b32.xlu1 %v2596_v11, %s3603_s14  ;;  %s3479_s14 = sshll.u32 %s3608_s0, 4  ;;  %s3480_s14 = int_to_ptr.vmem [resolvable:$false] %s3479_s14 }
 0x7a9   : > { %v2485_v41 = vpop.f32.mrb[60].mxu1  ;;  %v2534_v21 = vpop.f32.mrb[64].mxu0  ;;  %p3482_p2 = scmp.lt.s32.totalorder %s2698_s12, %s3480_s14 }
 0x7aa   : > { %v2602_v39 = vmul.f32 %v3376_v22, %v2534_v21  ;;  %v3177_v28 = vpop.f32.mrb[61].mxu1  ;;  %v3183_v13 = vpop.f32.mrb[65].mxu0  ;;  %v2600_v20 = vmul.f32 %v3378_v35, %v2485_v41 }
 0x7ab   : > { %v2488_v30 = vpop.f32.mrb[62].mxu1  ;;  %v2537_v14 = vpop.f32.mrb[66].mxu0 }
 0x7ac   : > { %v3178_v16 = vpop.f32.mrb[63].mxu1  ;;  %v3184_v17 = vpop.f32.mrb[67].mxu0  ;;  %2648 = vrot.lane.b32.xlu0 %v2602_v39, %s3606_s29  ;;  %2634 = vrot.lane.b32.xlu1 %v2599_v34, %s3604_s23  ;;  %v2601_v7 = vmul.f32 %v3380_v12, %v2488_v30  ;;  %s3481_s23 = scalar_lea.vmem %s3480_s14, 256 }
 0x7ad   : > { %p3483_p5 = scmp.lt.s32.totalorder %s3481_s23, %s3475_s24 }
 0x7af   : > { %p3484_p1 = por %p3483_p5, %p3482_p2 }
 0x7b1   : > { %p3485_p6 = pnand %p3484_p1, %p3478_p9 }
 0x7b3   : > { %3488 = shalt.err (!%p3485_p6)
}
 0x7b4   : > { %s3489_s28 = scalar_lea.hbm %s4461_s17, 128  ;;  %s3493_s15 = scalar_lea.hbm %s4568_s10, 256 }
 0x7b5   : > { %p3490_p8 = scmp.ne.s32.totalorder %s4461_s17, %s3489_s28  ;;  %p3494_p4 = scmp.lt.u32.totalorder %s4461_s17, %s4568_s10 }
 0x7b6   : > { %p3495_p11 = scmp.lt.u32.totalorder %s3493_s15, %s3489_s28  ;;  %p3497_p3 = scmp.lt.u32.totalorder %s3489_s28, %s4461_s17 }
 0x7b7   : > { %p3491_p10 = pnand %p3490_p8, %p3762_p12 }
 0x7b8   : > { %p3496_p13 = por %p3495_p11, %p3494_p4 }
 0x7b9   : > { %p3492_p0 = pneg %p3491_p10 }
 0x7ba   : > { %p3498_p7 = por %p3497_p3, %p3496_p13 }
 0x7bc   : > { %p3499_p9 = pnand %p3498_p7, %p3492_p0 }
 0x7be   : > { %3502 = shalt.err (!%p3499_p9)
}
 0x7bf   : > { %3199 = dma.vmem_to_hbm [thread:$0]  (%p3762_p12), %s2698_s12, 128, %s4461_s17, %s2679_s13   ;;  %2642 = vrot.lane.b32.xlu0 %v2601_v7, %s3605_s30  ;;  %2640 = vrot.lane.b32.xlu1 %v2600_v20, %s3605_s30  ;;  %v3382_v38 = vpop.eup %3381  ;;  %v2583_v19 = vpop.f32.mrb[64].mxu1 }
 0x7c0   : > { %v2603_v26 = vmul.f32 %v3382_v38, %v2537_v14  ;;  %v3189_v54 = vpop.f32.mrb[65].mxu1  ;;  %v3384_v42 = vpop.eup %3383  ;;  %s466_s30 = scalar_lea.vmem [#allocation9], %s2858_s19  ;;  %s3609_s24 = smov [#allocation9]  }
 0x7c1   : > { %v2586_v29 = vpop.f32.mrb[66].mxu1  ;;  %v3386_v32 = vpop.eup %3385  ;;  %s3507_s23 = sshll.u32 %s3609_s24, 4  ;;  %s3508_s23 = int_to_ptr.vmem [resolvable:$false] %s3507_s23 }
 0x7c2   : > { %v2605_v31 = vmul.f32 %v3384_v42, %v2586_v29  ;;  %v3190_v48 = vpop.f32.mrb[67].mxu1  ;;  %v2604_v44 = vmul.f32 %v3386_v32, %v2583_v19  ;;  %s3509_s28 = scalar_lea.vmem %s3508_s23, 512 }
 0x7c3   : > { %2650 = vrot.lane.b32.xlu1 %v2603_v26, %s3606_s29  ;;  %s2710_s29 = sshll.u32 %s466_s30, 4  ;;  %s4503_s29 = int_to_ptr.vmem [resolvable:$true] %s2710_s29 }
 0x7c4   : > { %2658 = vrot.lane.b32.xlu0 %v2605_v31, %s3607_s27  ;;  %s3503_s13 = scalar_lea.vmem %s4503_s29, 256  ;;  %p3510_p6 = scmp.lt.s32.totalorder %s4503_s29, %s3508_s23 }
 0x7c5   : > { %p3504_p2 = scmp.ne.s32.totalorder %s4503_s29, %s3503_s13  ;;  %p3511_p8 = scmp.lt.s32.totalorder %s3509_s28, %s3503_s13 }
 0x7c7   : > { %2656 = vrot.lane.b32.xlu1 %v2604_v44, %s3607_s27  ;;  %s2912_s27 = sshll.u32 %s3692_s21, 8  ;;  %s2684_s21 = scalar_lea.sflag [#allocation10], %s3849_s8 }
 0x7c8   : > { %s4511_s12 = scalar_lea.hbm %s4569_s11, %s2912_s27  ;;  %p3505_p5 = pnand %p3504_p2, %p3762_p12 }
 0x7c9   : > { %p3512_p10 = por %p3511_p8, %p3510_p6 }
 0x7ca   : > { %p3506_p1 = pneg %p3505_p5 }
 0x7cc   : > { %p3513_p0 = pnand %p3512_p10, %p3506_p1 }
 0x80a   : > { %v2617_v8 = vpop.permute.xlu0 %2616 }
 0x80e   : > { %v2609_v36 = vpop.permute.xlu1 %2608 }
 0x80f   : > { %v2662_v24 = vsel %vm748_vm2, %v4429_v33, %v2609_v36 }
 0x810   : > { %v2664_v40 = vsel %vm1625_vm5, %v2662_v24, %v2617_v8 }
 0x812   : > { %v2611_v37 = vpop.permute.xlu1 %2610 }
 0x813   : > { %v2663_v45 = vsel %vm748_vm2, %v4432_v53, %v2611_v37 }
 0x816   : > { %v2633_v52 = vpop.permute.xlu0 %2632  ;;  %v2619_v58 = vpop.permute.xlu1 %2618 }
 0x817   : > { %v2665_v43 = vsel %vm1625_vm5, %v2663_v45, %v2619_v58 }
 0x81a   : > { %v2627_v55 = vpop.permute.xlu0 %2626  ;;  %v2625_v2 = vpop.permute.xlu1 %2624 }
 0x81b   : > { %v2666_v9 = vsel %vm1627_vm6, %v2664_v40, %v2625_v2  ;;  %v2667_v4 = vsel %vm1627_vm6, %v2665_v43, %v2627_v55 }
 0x81c   : > { %v2668_v33 = vsel %vm1131_vm3, %v2666_v9, %v2633_v52 }
 0x81e   : > { %v2649_v23 = vpop.permute.xlu0 %2648  ;;  %v2635_v59 = vpop.permute.xlu1 %2634 }
 0x81f   : > { %v2669_v6 = vsel %vm1131_vm3, %v2667_v4, %v2635_v59 }
 0x831   : > { %v2641_v1 = vpop.permute.xlu1 %2640  ;;  %v2643_v46 = vpop.permute.xlu0 %2642 }
 0x832   : > { %v2671_v5 = vsel %vm1630_vm7, %v2669_v6, %v2643_v46  ;;  %v2670_v53 = vsel %vm1630_vm7, %v2668_v33, %v2641_v1 }
 0x833   : > { %v2672_v49 = vsel %vm1632_vm8, %v2670_v53, %v2649_v23 }
 0x835   : > { %v2651_v62 = vpop.permute.xlu1 %2650 }
 0x836   : > { %v2673_v47 = vsel %vm1632_vm8, %v2671_v5, %v2651_v62  ;;  %v2659_v18 = vpop.permute.xlu0 %2658 }
 0x837   : > { %v2675_v27 = vsel %vm1634_vm9, %v2673_v47, %v2659_v18 }
 0x838   : > { %2677 = vst.msk [vmem:[%s466_s30 + $0x8] sm:$0xff] %vm471_vm0, %v2675_v27 }
 0x839   : > { %v2657_v50 = vpop.permute.xlu1 %2656 }
 0x83a   : > { %v2674_v56 = vsel %vm1634_vm9, %v2672_v49, %v2657_v50 }
 0x83b   : > { %2676 = vst.msk [vmem:[%s466_s30] sm:$0xff] %vm471_vm0, %v2674_v56 }
 0x83c   : > { %3516 = shalt.err (!%p3513_p0)
}
 0x83d   : > { %s3517_s22 = scalar_lea.hbm %s4511_s12, 256  ;;  %s3521_s0 = scalar_lea.hbm %s4569_s11, 512 }
 0x83e   : > { %p3518_p4 = scmp.ne.s32.totalorder %s4511_s12, %s3517_s22  ;;  %p3522_p3 = scmp.lt.u32.totalorder %s4511_s12, %s4569_s11 }
 0x83f   : > { %p3523_p7 = scmp.lt.u32.totalorder %s3521_s0, %s3517_s22  ;;  %p3525_p2 = scmp.lt.u32.totalorder %s3517_s22, %s4511_s12 }
 0x840   : > { %p3519_p11 = pnand %p3518_p4, %p3762_p12 }
 0x841   : > { %p3524_p9 = por %p3523_p7, %p3522_p3 }
 0x842   : > { %p3520_p13 = pneg %p3519_p11 }
 0x843   : > { %p3526_p5 = por %p3525_p2, %p3524_p9 }
 0x845   : > { %p3527_p1 = pnand %p3526_p5, %p3520_p13 }
 0x847   : > { %3530 = shalt.err (!%p3527_p1)
}
 0x848   : > { %s3610_s27 = smov 128  }
 0x849   : > { %3200 = dma.vmem_to_hbm [thread:$0]  (%p3762_p12), %s4503_s29, 256, %s4511_s12, %s2684_s21, %s3610_s27, %s3610_s27, %s3602_s25  }
 0x84a PF: > { %s4599_s19 = sld [smem:[#allocation16_spill]]  ;;  %s4600_s17 = sld [smem:[#allocation18_spill]] }
 0x84b   : > { %p4602_p8 = scmp.ge.s32.totalorder %s3581_s20, 2 }
 0x850   : > { %s2725_s13 = sand.u32 1, %s4599_s19   ;;  %p4601_p6 = scmp.ne.s32.totalorder %s4600_s17, 0 }
 0x851   : > { %s2726_s24 = scalar_lea.sflag [#allocation4], %s2725_s13 }
 0x852   : > { %p3215_p10 = pnand %p4602_p8, %p4601_p6 }
 0x854   : > { %3560 = dma.done.wait (!%p3215_p10), %s2726_s24, 128  }
 0x855   : > { %3562 = vsyncadd (!%p3215_p10), %s2726_s24, 4294967168  ;;  %s2735_s23 = scalar_lea.sflag [#allocation10], %s2725_s13 }
 0x856   : > { %3564 = dma.done.wait (!%p3215_p10), %s2735_s23, 256  }
 0x857   : > { %3566 = vsyncadd (!%p3215_p10), %s2735_s23, 4294967040  ;;  %s4603_s20 = sld [smem:[#allocation19_spill]]  ;;  %s4604_s16 = sld [smem:[#allocation17_spill]] }
 0x858   : > { %s4605_s19 = sld [smem:[#allocation20_spill]]  ;;  %s4606_s17 = smov %s3573_s18 }
 0x85d   : > { %p31_p12 = scmp.ge.s32.totalorder %s4603_s20, 4   ;;  %s4607_s18 = smov %s4604_s16 }
 0x85f   :  { %33 = sbr.rel (!%p31_p12) target bundleno = 12 (0xc), region = 139 }
 0x866   :  { %2740 = vsyncpa [#allocation3], 1 }
 0x867   :  { %2742 = vsyncpa [#allocation3 + $0x1], 1 }
 0x868   :  { %2743 = vsyncpa [#allocation6], 1 }
 0x869   :  { %2745 = vsyncpa [#allocation6 + $0x1], 1 }
 0x86a   :  { %2746 = vsyncpa [#allocation4], 1 }
 0x86b   :  { %2748 = vsyncpa [#allocation4 + $0x1], 1 }
 0x86c   :  { %2749 = vsyncpa [#allocation10], 1 }
 0x86d   :  { %2751 = vsyncpa [#allocation10 + $0x1], 1 }

</bundles_post_ra>
